<compile_context>
chip_gen: v7x
topology: tpu7x:2x2x1
jax: 0.10.0
libtpu: 0.0.40
codegen_flags: <defaults>
</compile_context>

<pallas_src>
import math

import numpy as np
import jax
import jax.numpy as jnp
from jax.experimental import pallas as pl
from jax.experimental.pallas import tpu as pltpu


def _round_up(x, m):
    return (x + m - 1) // m * m


# --------------------------------------------------------------------------
# Host-side (numpy, init-time only) reference convs used to build dense maps.
# TODO(synk): SAME-pad / SamePad-crop left/right split reconstructed per DSC-Net
# convention; verify against the original PyTorch helper modules.
# --------------------------------------------------------------------------

def _np_same_pad(x, k, s):
    """TF-style SAME padding (Conv2dSamePad convention). x: (B, H, W, C)."""
    _, H, W, _ = x.shape
    oh, ow = -(-H // s), -(-W // s)
    ph = max((oh - 1) * s + k - H, 0)
    pw = max((ow - 1) * s + k - W, 0)
    return np.pad(x, ((0, 0), (ph // 2, ph - ph // 2), (pw // 2, pw - pw // 2), (0, 0)))


def _np_conv2d(x, w, stride):
    """Valid conv on NHWC x (already padded); w in PyTorch layout (OC, IC, KH, KW)."""
    B, H, W, C = x.shape
    OC, IC, KH, KW = w.shape
    OH = (H - KH) // stride + 1
    OW = (W - KW) // stride + 1
    cols = []
    for i in range(KH):
        for j in range(KW):
            cols.append(x[:, i:i + stride * OH:stride, j:j + stride * OW:stride, :])
    col = np.concatenate(cols, axis=-1).reshape(B * OH * OW, KH * KW * IC)
    wm = w.transpose(2, 3, 1, 0).reshape(KH * KW * IC, OC)        # (i, j, c) ordering
    return (col @ wm).reshape(B, OH, OW, OC)


def _np_conv2d_same(x, w, stride):
    return _np_conv2d(_np_same_pad(x, w.shape[-1], stride), w, stride)


def _np_conv_transpose2d(x, w, stride):
    """PyTorch ConvTranspose2d (padding=0, output_padding=0); w: (IC, OC, KH, KW)."""
    B, H, W, C = x.shape
    IC, OC, KH, KW = w.shape
    if stride > 1:
        xd = np.zeros((B, (H - 1) * stride + 1, (W - 1) * stride + 1, C), x.dtype)
        xd[:, ::stride, ::stride, :] = x
    else:
        xd = x
    xp = np.pad(xd, ((0, 0), (KH - 1, KH - 1), (KW - 1, KW - 1), (0, 0)))
    w_eq = np.flip(w.transpose(1, 0, 2, 3), axis=(2, 3))          # (OC, IC, KH, KW)
    return _np_conv2d(xp, w_eq, 1)


def _np_tconv_crop(y, k, s):
    """ConvTranspose2dSamePad (DSC-Net convention): crop k - s total per spatial dim."""
    c = k - s
    t = c // 2
    b = c - t
    H, W = y.shape[1], y.shape[2]
    return y[:, t:H - b, t:W - b, :]


def _dense_linear_map(fn, h, w, c):
    """Exact dense (D_in, D_out) matrix of a linear NHWC->NHWC map at a fixed spatial size."""
    d = h * w * c
    basis = np.eye(d, dtype=np.float32).reshape(d, h, w, c)
    out = fn(basis)
    oh, ow, oc = out.shape[1], out.shape[2], out.shape[3]
    return out.reshape(d, oh * ow * oc).astype(np.float32), (oh, ow, oc)


# --------------------------------------------------------------------------
# Model construction: synthetic params -> dense layer matrices (built once)
# --------------------------------------------------------------------------

def build_model(seed=0):
    rng = np.random.default_rng(seed)

    def conv_w(oc, ic, k):
        fan = ic * k * k
        return (rng.standard_normal((oc, ic, k, k)) * math.sqrt(2.0 / fan)).astype(np.float32)

    def tconv_w(ic, oc, k):
        fan = oc * k * k
        return (rng.standard_normal((ic, oc, k, k)) * math.sqrt(2.0 / fan)).astype(np.float32)

    def dense_conv_same(w, h, ww, stride):
        return _dense_linear_map(lambda xb: _np_conv2d_same(xb, w, stride), h, ww, w.shape[1])

    def dense_tconv(w, h, ww, stride):
        k = w.shape[2]
        return _dense_linear_map(
            lambda xb: _np_tconv_crop(_np_conv_transpose2d(xb, w, stride), k, stride),
            h, ww, w.shape[0])

    def interleave(mats, n_pos, cb):
        """Column-interleave per-branch (D_in, n_pos*cb) matrices into concat-channel layout."""
        nb = len(mats)
        ct = nb * cb
        W = np.zeros((mats[0].shape[0], n_pos * ct), np.float32)
        for bi, Mb in enumerate(mats):
            for p in range(n_pos):
                W[:, p * ct + bi * cb:p * ct + (bi + 1) * cb] = Mb[:, p * cb:(p + 1) * cb]
        return W

    def eca_mat(w1d, n_pos, C):
        """(avg-pool over positions) composed with (Conv1d k over channels, pad k//2, no bias)."""
        P = np.zeros((n_pos * C, C), np.float32)
        for p in range(n_pos):
            P[p * C + np.arange(C), np.arange(C)] = 1.0 / n_pos
        k = int(w1d.shape[0])
        E = np.zeros((C, C), np.float32)
        for co in range(C):
            for d in range(k):
                ci = co + d - k // 2
                if 0 <= ci < C:
                    E[ci, co] = w1d[d]
        return P @ E                              # (n_pos*C, C)

    def bcast_mat(n_pos, C):
        B = np.zeros((C, n_pos * C), np.float32)
        for p in range(n_pos):
            B[np.arange(C), p * C + np.arange(C)] = 1.0
        return B                                  # (C, n_pos*C)

    # ---------------- encoder ----------------
    M1, (h, w_, c) = dense_conv_same(conv_w(6, 3, 3), 16, 16, 2)      # (768, 384) 8x8x6
    M2, (h, w_, c) = dense_conv_same(conv_w(12, 6, 3), h, w_, 2)      # (384, 192) 4x4x12
    M3, (h, w_, c) = dense_conv_same(conv_w(24, 12, 3), h, w_, 2)     # (192, 96)  2x2x24
    n_pos = h * w_                                                    # 4

    # TODO(synk): InceptionBlock reconstructed: parallel 1x1/3x3/5x5 SAME stride-1 convs
    # (8 channels each) + ReLU, concatenated on channels.
    Mi = [dense_conv_same(conv_w(8, 24, k), h, w_, 1)[0] for k in (1, 3, 5)]
    Minc = interleave(Mi, n_pos, 8)                                   # (96, 96)

    # TODO(synk): ECA_Block reconstructed: global avg pool -> Conv1d(k=3, pad=1) -> sigmoid.
    eca_w_enc = (rng.standard_normal(3) * 0.5).astype(np.float32)
    Peca_e = eca_mat(eca_w_enc, n_pos, 24)                            # (96, 24)
    Bc = bcast_mat(n_pos, 24)                                         # (24, 96)

    # TODO(synk): ResNetBlock reconstructed: SAME conv k1 + ReLU -> SAME conv k2 -> +x -> ReLU.
    Mr1, _ = dense_conv_same(conv_w(24, 24, 2), h, w_, 1)
    Mr2, _ = dense_conv_same(conv_w(24, 24, 3), h, w_, 1)

    M4, (h4, w4_, _) = dense_conv_same(conv_w(16, 24, 3), h, w_, 2)   # (96, 16)   1x1x16

    # ---------------- decoder ----------------
    Md1, (h, w_, c) = dense_tconv(tconv_w(16, 24, 3), h4, w4_, 2)     # (16, 96)   2x2x24

    # TODO(synk): TransposeResNetBlock / TransposeInceptionBlock reconstructed analogously
    # with stride-1 transpose convs + SamePad crop.
    Mtr1, _ = dense_tconv(tconv_w(24, 24, 3), h, w_, 1)
    Mtr2, _ = dense_tconv(tconv_w(24, 24, 2), h, w_, 1)
    Mti = [dense_tconv(tconv_w(24, 8, k), h, w_, 1)[0] for k in (1, 3, 5)]
    Mtinc = interleave(Mti, n_pos, 8)

    eca_w_dec = (rng.standard_normal(3) * 0.5).astype(np.float32)
    Peca_d = eca_mat(eca_w_dec, n_pos, 24)

    Md2, (h, w_, c) = dense_tconv(tconv_w(24, 12, 3), h, w_, 2)       # (96, 192)  4x4x12
    Md3, (h, w_, c) = dense_tconv(tconv_w(12, 6, 3), h, w_, 2)        # (192, 384) 8x8x6
    Md4, (h, w_, c) = dense_tconv(tconv_w(6, 3, 3), h, w_, 2)         # (384, 768) 16x16x3
    assert (h, w_, c) == (16, 16, 3)

    # ---- pad to lane-aligned widths once, cast weights to bf16 (MXU-native) ----
    def pw(d):
        return _round_up(d, 128)

    def wpad(M):
        out = np.zeros((pw(M.shape[0]), pw(M.shape[1])), np.float32)
        out[:M.shape[0], :M.shape[1]] = M
        return jnp.asarray(out, dtype=jnp.bfloat16)

    def bpad(d_out):
        # Conv/Deconv biases are zero-initialized (PyTorch init.constant_(bias, 0)).
        return jnp.zeros((1, pw(d_out)), jnp.float32)

    ops = [
        wpad(M1), bpad(384),
        wpad(M2), bpad(192),
        wpad(M3), bpad(96),
        wpad(Minc), bpad(96),
        wpad(Peca_e), wpad(Bc),
        wpad(Mr1), bpad(96),
        wpad(Mr2), bpad(96),
        wpad(M4), bpad(16),
        wpad(Md1), bpad(96),
        wpad(Mtr1), bpad(96),
        wpad(Mtr2), bpad(96),
        wpad(Mtinc), bpad(96),
        wpad(Peca_d),
        wpad(Md2), bpad(192),
        wpad(Md3), bpad(384),
        wpad(Md4), bpad(768),
    ]
    return ops


# --------------------------------------------------------------------------
# The fused Pallas kernel: the whole forward pass in one launch.
# --------------------------------------------------------------------------

def _fused_ae_kernel(x_ref,
                     w1, b1, w2, b2, w3, b3,
                     winc, binc, peca_e, bcast,
                     wr1, br1, wr2, br2,
                     w4, b4,
                     wd1, bd1,
                     wtr1, btr1, wtr2, btr2,
                     wtinc, btinc, peca_d,
                     wd2, bd2, wd3, bd3, wd4, bd4,
                     o_ref):
    f32 = jnp.float32

    def gemm(v, w_ref, b_ref=None, relu=False):
        acc = jnp.dot(v.astype(jnp.bfloat16), w_ref[...],
                      preferred_element_type=f32)
        if b_ref is not None:
            acc = acc + b_ref[...]
        if relu:
            acc = jnp.maximum(acc, 0.0)
        return acc

    def eca(v, peca_ref):
        # sigmoid((avg-pool over positions ∘ Conv1d over channels) v), broadcast, rescale.
        z = gemm(v, peca_ref)
        s = 1.0 / (1.0 + jnp.exp(-z))
        return v * gemm(s, bcast)

    x = x_ref[...].astype(f32)
    # ------------------------- encoder -------------------------
    h = gemm(x, w1, b1, relu=True)            # SAME conv 3->6,  s2, 16x16 -> 8x8
    h = gemm(h, w2, b2, relu=True)            # SAME conv 6->12, s2, 8x8  -> 4x4
    h = gemm(h, w3, b3, relu=True)            # SAME conv 12->24, s2, 4x4 -> 2x2
    h = gemm(h, winc, binc, relu=True)        # InceptionBlock (1x1/3x3/5x5 fused, concat)
    h = eca(h, peca_e)                        # ECA_Block
    r = gemm(h, wr1, br1, relu=True)          # ResNetBlock conv k=2 + ReLU
    r = gemm(r, wr2, br2, relu=False)         #             conv k=3
    h = jnp.maximum(r + h, 0.0)               #             residual + ReLU
    h = gemm(h, w4, b4, relu=True)            # SAME conv 24->16, s2, 2x2 -> 1x1 (latent)
    # ------------------------- decoder -------------------------
    y = gemm(h, wd1, bd1, relu=True)          # deconv 16->24, s2, 1x1 -> 2x2
    r = gemm(y, wtr1, btr1, relu=True)        # TransposeResNetBlock tconv k=3 + ReLU
    r = gemm(r, wtr2, btr2, relu=False)       #                      tconv k=2
    y = jnp.maximum(r + y, 0.0)               #                      residual + ReLU
    y = gemm(y, wtinc, btinc, relu=True)      # TransposeInceptionBlock (fused, concat)
    y = eca(y, peca_d)                        # ECA_Block
    y = gemm(y, wd2, bd2, relu=True)          # deconv 24->12, s2, 2x2 -> 4x4
    y = gemm(y, wd3, bd3, relu=True)          # deconv 12->6,  s2, 4x4 -> 8x8
    y = gemm(y, wd4, bd4, relu=True)          # deconv 6->3,   s2, 8x8 -> 16x16
    o_ref[...] = y


def forward(ops, x_nchw):
    B = x_nchw.shape[0]
    x_flat = jnp.transpose(x_nchw, (0, 2, 3, 1)).reshape(B, 16 * 16 * 3)
    args = [x_flat] + list(ops)

    def spec(a):
        return pl.BlockSpec(a.shape, lambda i: (0, 0))

    out_flat = pl.pallas_call(
        _fused_ae_kernel,
        out_shape=jax.ShapeDtypeStruct((B, 16 * 16 * 3), jnp.float32),
        grid=(1,),
        in_specs=[spec(a) for a in args],
        out_specs=pl.BlockSpec((B, 16 * 16 * 3), lambda i: (0, 0)),
        compiler_params=pltpu.CompilerParams(
            dimension_semantics=("arbitrary",),
            vmem_limit_bytes=32 * 1024 * 1024,
        ),
    )(*args)
    return jnp.transpose(out_flat.reshape(B, 16, 16, 3), (0, 3, 1, 2))


def loss_fn(x, x_recon):
    return jnp.sum((x_recon - x) ** 2)    # F.mse_loss(reduction='sum')


if __name__ == "__main__":
    ops = build_model(seed=0)

    key = jax.random.PRNGKey(0)
    x = jax.random.normal(key, (2, 3, 16, 16), jnp.float32)

    fwd = jax.jit(forward)
    y = jax.block_until_ready(fwd(ops, x))

    assert y.shape == (2, 3, 16, 16), y.shape
    assert bool(jnp.all(jnp.isfinite(y)))
    _ = jax.block_until_ready(loss_fn(x, y))
    print("KERNEL_OK")
</pallas_src>

<mosaic_0001>
module attributes {stable_mosaic.version = 11 : i64} {
  func.func @_fused_ae_kernel(%arg0: i32, %arg1: memref<2x768xf32, #tpu.memory_space<vmem>>, %arg2: memref<768x384xbf16, #tpu.memory_space<vmem>>, %arg3: memref<1x384xf32, #tpu.memory_space<vmem>>, %arg4: memref<384x256xbf16, #tpu.memory_space<vmem>>, %arg5: memref<1x256xf32, #tpu.memory_space<vmem>>, %arg6: memref<256x128xbf16, #tpu.memory_space<vmem>>, %arg7: memref<1x128xf32, #tpu.memory_space<vmem>>, %arg8: memref<128x128xbf16, #tpu.memory_space<vmem>>, %arg9: memref<1x128xf32, #tpu.memory_space<vmem>>, %arg10: memref<128x128xbf16, #tpu.memory_space<vmem>>, %arg11: memref<128x128xbf16, #tpu.memory_space<vmem>>, %arg12: memref<128x128xbf16, #tpu.memory_space<vmem>>, %arg13: memref<1x128xf32, #tpu.memory_space<vmem>>, %arg14: memref<128x128xbf16, #tpu.memory_space<vmem>>, %arg15: memref<1x128xf32, #tpu.memory_space<vmem>>, %arg16: memref<128x128xbf16, #tpu.memory_space<vmem>>, %arg17: memref<1x128xf32, #tpu.memory_space<vmem>>, %arg18: memref<128x128xbf16, #tpu.memory_space<vmem>>, %arg19: memref<1x128xf32, #tpu.memory_space<vmem>>, %arg20: memref<128x128xbf16, #tpu.memory_space<vmem>>, %arg21: memref<1x128xf32, #tpu.memory_space<vmem>>, %arg22: memref<128x128xbf16, #tpu.memory_space<vmem>>, %arg23: memref<1x128xf32, #tpu.memory_space<vmem>>, %arg24: memref<128x128xbf16, #tpu.memory_space<vmem>>, %arg25: memref<1x128xf32, #tpu.memory_space<vmem>>, %arg26: memref<128x128xbf16, #tpu.memory_space<vmem>>, %arg27: memref<128x256xbf16, #tpu.memory_space<vmem>>, %arg28: memref<1x256xf32, #tpu.memory_space<vmem>>, %arg29: memref<256x384xbf16, #tpu.memory_space<vmem>>, %arg30: memref<1x384xf32, #tpu.memory_space<vmem>>, %arg31: memref<384x768xbf16, #tpu.memory_space<vmem>>, %arg32: memref<1x768xf32, #tpu.memory_space<vmem>>, %arg33: memref<2x768xf32, #tpu.memory_space<vmem>>) attributes {dimension_semantics = [#tpu.dimension_semantics<arbitrary>], iteration_bounds = array<i64: 1>, scalar_prefetch = 0 : i64, scratch_operands = 0 : i64, tpu.core_type = #tpu.core_type<tc>, window_params = [{pipeline_mode = #tpu.pipeline_mode<synchronous>, transform_indices = @transform_0, window_bounds = array<i64: 2, 768>}, {pipeline_mode = #tpu.pipeline_mode<synchronous>, transform_indices = @transform_1, window_bounds = array<i64: 768, 384>}, {pipeline_mode = #tpu.pipeline_mode<synchronous>, transform_indices = @transform_2, window_bounds = array<i64: 1, 384>}, {pipeline_mode = #tpu.pipeline_mode<synchronous>, transform_indices = @transform_3, window_bounds = array<i64: 384, 256>}, {pipeline_mode = #tpu.pipeline_mode<synchronous>, transform_indices = @transform_4, window_bounds = array<i64: 1, 256>}, {pipeline_mode = #tpu.pipeline_mode<synchronous>, transform_indices = @transform_5, window_bounds = array<i64: 256, 128>}, {pipeline_mode = #tpu.pipeline_mode<synchronous>, transform_indices = @transform_6, window_bounds = array<i64: 1, 128>}, {pipeline_mode = #tpu.pipeline_mode<synchronous>, transform_indices = @transform_7, window_bounds = array<i64: 128, 128>}, {pipeline_mode = #tpu.pipeline_mode<synchronous>, transform_indices = @transform_8, window_bounds = array<i64: 1, 128>}, {pipeline_mode = #tpu.pipeline_mode<synchronous>, transform_indices = @transform_9, window_bounds = array<i64: 128, 128>}, {pipeline_mode = #tpu.pipeline_mode<synchronous>, transform_indices = @transform_10, window_bounds = array<i64: 128, 128>}, {pipeline_mode = #tpu.pipeline_mode<synchronous>, transform_indices = @transform_11, window_bounds = array<i64: 128, 128>}, {pipeline_mode = #tpu.pipeline_mode<synchronous>, transform_indices = @transform_12, window_bounds = array<i64: 1, 128>}, {pipeline_mode = #tpu.pipeline_mode<synchronous>, transform_indices = @transform_13, window_bounds = array<i64: 128, 128>}, {pipeline_mode = #tpu.pipeline_mode<synchronous>, transform_indices = @transform_14, window_bounds = array<i64: 1, 128>}, {pipeline_mode = #tpu.pipeline_mode<synchronous>, transform_indices = @transform_15, window_bounds = array<i64: 128, 128>}, {pipeline_mode = #tpu.pipeline_mode<synchronous>, transform_indices = @transform_16, window_bounds = array<i64: 1, 128>}, {pipeline_mode = #tpu.pipeline_mode<synchronous>, transform_indices = @transform_17, window_bounds = array<i64: 128, 128>}, {pipeline_mode = #tpu.pipeline_mode<synchronous>, transform_indices = @transform_18, window_bounds = array<i64: 1, 128>}, {pipeline_mode = #tpu.pipeline_mode<synchronous>, transform_indices = @transform_19, window_bounds = array<i64: 128, 128>}, {pipeline_mode = #tpu.pipeline_mode<synchronous>, transform_indices = @transform_20, window_bounds = array<i64: 1, 128>}, {pipeline_mode = #tpu.pipeline_mode<synchronous>, transform_indices = @transform_21, window_bounds = array<i64: 128, 128>}, {pipeline_mode = #tpu.pipeline_mode<synchronous>, transform_indices = @transform_22, window_bounds = array<i64: 1, 128>}, {pipeline_mode = #tpu.pipeline_mode<synchronous>, transform_indices = @transform_23, window_bounds = array<i64: 128, 128>}, {pipeline_mode = #tpu.pipeline_mode<synchronous>, transform_indices = @transform_24, window_bounds = array<i64: 1, 128>}, {pipeline_mode = #tpu.pipeline_mode<synchronous>, transform_indices = @transform_25, window_bounds = array<i64: 128, 128>}, {pipeline_mode = #tpu.pipeline_mode<synchronous>, transform_indices = @transform_26, window_bounds = array<i64: 128, 256>}, {pipeline_mode = #tpu.pipeline_mode<synchronous>, transform_indices = @transform_27, window_bounds = array<i64: 1, 256>}, {pipeline_mode = #tpu.pipeline_mode<synchronous>, transform_indices = @transform_28, window_bounds = array<i64: 256, 384>}, {pipeline_mode = #tpu.pipeline_mode<synchronous>, transform_indices = @transform_29, window_bounds = array<i64: 1, 384>}, {pipeline_mode = #tpu.pipeline_mode<synchronous>, transform_indices = @transform_30, window_bounds = array<i64: 384, 768>}, {pipeline_mode = #tpu.pipeline_mode<synchronous>, transform_indices = @transform_31, window_bounds = array<i64: 1, 768>}, {pipeline_mode = #tpu.pipeline_mode<synchronous>, transform_indices = @transform_32, window_bounds = array<i64: 2, 768>}]} {
    %c0 = arith.constant 0 : index
    %c0_0 = arith.constant 0 : index
    %0 = vector.load %arg1[%c0, %c0_0] : memref<2x768xf32, #tpu.memory_space<vmem>>, vector<2x768xf32>
    %1 = arith.truncf %0 : vector<2x768xf32> to vector<2x768xbf16>
    %c0_1 = arith.constant 0 : index
    %c0_2 = arith.constant 0 : index
    %2 = vector.load %arg2[%c0_1, %c0_2] : memref<768x384xbf16, #tpu.memory_space<vmem>>, vector<768x384xbf16>
    %cst = arith.constant dense<0.000000e+00> : vector<2x384xf32>
    %3 = tpu.matmul %1, %2, %cst {dimension_numbers = #tpu.dot_dimension_numbers<[1], [0], [0], [1], [0, 0, 1, 1], [], []>} : vector<2x768xbf16>, vector<768x384xbf16>, vector<2x384xf32> -> vector<2x384xf32>
    %c0_3 = arith.constant 0 : index
    %c0_4 = arith.constant 0 : index
    %4 = vector.load %arg3[%c0_3, %c0_4] : memref<1x384xf32, #tpu.memory_space<vmem>>, vector<1x384xf32>
    %5 = vector.broadcast %4 : vector<1x384xf32> to vector<2x384xf32>
    %6 = arith.addf %3, %5 : vector<2x384xf32>
    %cst_5 = arith.constant 0.000000e+00 : f32
    %7 = vector.broadcast %cst_5 : f32 to vector<2x384xf32>
    %8 = arith.maximumf %6, %7 : vector<2x384xf32>
    %9 = arith.truncf %8 : vector<2x384xf32> to vector<2x384xbf16>
    %c0_6 = arith.constant 0 : index
    %c0_7 = arith.constant 0 : index
    %10 = vector.load %arg4[%c0_6, %c0_7] : memref<384x256xbf16, #tpu.memory_space<vmem>>, vector<384x256xbf16>
    %cst_8 = arith.constant dense<0.000000e+00> : vector<2x256xf32>
    %11 = tpu.matmul %9, %10, %cst_8 {dimension_numbers = #tpu.dot_dimension_numbers<[1], [0], [0], [1], [0, 0, 1, 1], [], []>} : vector<2x384xbf16>, vector<384x256xbf16>, vector<2x256xf32> -> vector<2x256xf32>
    %c0_9 = arith.constant 0 : index
    %c0_10 = arith.constant 0 : index
    %12 = vector.load %arg5[%c0_9, %c0_10] : memref<1x256xf32, #tpu.memory_space<vmem>>, vector<1x256xf32>
    %13 = vector.broadcast %12 : vector<1x256xf32> to vector<2x256xf32>
    %14 = arith.addf %11, %13 : vector<2x256xf32>
    %cst_11 = arith.constant 0.000000e+00 : f32
    %15 = vector.broadcast %cst_11 : f32 to vector<2x256xf32>
    %16 = arith.maximumf %14, %15 : vector<2x256xf32>
    %17 = arith.truncf %16 : vector<2x256xf32> to vector<2x256xbf16>
    %c0_12 = arith.constant 0 : index
    %c0_13 = arith.constant 0 : index
    %18 = vector.load %arg6[%c0_12, %c0_13] : memref<256x128xbf16, #tpu.memory_space<vmem>>, vector<256x128xbf16>
    %cst_14 = arith.constant dense<0.000000e+00> : vector<2x128xf32>
    %19 = tpu.matmul %17, %18, %cst_14 {dimension_numbers = #tpu.dot_dimension_numbers<[1], [0], [0], [1], [0, 0, 1, 1], [], []>} : vector<2x256xbf16>, vector<256x128xbf16>, vector<2x128xf32> -> vector<2x128xf32>
    %c0_15 = arith.constant 0 : index
    %c0_16 = arith.constant 0 : index
    %20 = vector.load %arg7[%c0_15, %c0_16] : memref<1x128xf32, #tpu.memory_space<vmem>>, vector<1x128xf32>
    %21 = vector.broadcast %20 : vector<1x128xf32> to vector<2x128xf32>
    %22 = arith.addf %19, %21 : vector<2x128xf32>
    %cst_17 = arith.constant 0.000000e+00 : f32
    %23 = vector.broadcast %cst_17 : f32 to vector<2x128xf32>
    %24 = arith.maximumf %22, %23 : vector<2x128xf32>
    %25 = arith.truncf %24 : vector<2x128xf32> to vector<2x128xbf16>
    %c0_18 = arith.constant 0 : index
    %c0_19 = arith.constant 0 : index
    %26 = vector.load %arg8[%c0_18, %c0_19] : memref<128x128xbf16, #tpu.memory_space<vmem>>, vector<128x128xbf16>
    %cst_20 = arith.constant dense<0.000000e+00> : vector<2x128xf32>
    %27 = tpu.matmul %25, %26, %cst_20 {dimension_numbers = #tpu.dot_dimension_numbers<[1], [0], [0], [1], [0, 0, 1, 1], [], []>} : vector<2x128xbf16>, vector<128x128xbf16>, vector<2x128xf32> -> vector<2x128xf32>
    %c0_21 = arith.constant 0 : index
    %c0_22 = arith.constant 0 : index
    %28 = vector.load %arg9[%c0_21, %c0_22] : memref<1x128xf32, #tpu.memory_space<vmem>>, vector<1x128xf32>
    %29 = vector.broadcast %28 : vector<1x128xf32> to vector<2x128xf32>
    %30 = arith.addf %27, %29 : vector<2x128xf32>
    %cst_23 = arith.constant 0.000000e+00 : f32
    %31 = vector.broadcast %cst_23 : f32 to vector<2x128xf32>
    %32 = arith.maximumf %30, %31 : vector<2x128xf32>
    %33 = arith.truncf %32 : vector<2x128xf32> to vector<2x128xbf16>
    %c0_24 = arith.constant 0 : index
    %c0_25 = arith.constant 0 : index
    %34 = vector.load %arg10[%c0_24, %c0_25] : memref<128x128xbf16, #tpu.memory_space<vmem>>, vector<128x128xbf16>
    %cst_26 = arith.constant dense<0.000000e+00> : vector<2x128xf32>
    %35 = tpu.matmul %33, %34, %cst_26 {dimension_numbers = #tpu.dot_dimension_numbers<[1], [0], [0], [1], [0, 0, 1, 1], [], []>} : vector<2x128xbf16>, vector<128x128xbf16>, vector<2x128xf32> -> vector<2x128xf32>
    %cst_27 = arith.constant 0.000000e+00 : f32
    %36 = vector.broadcast %cst_27 : f32 to vector<2x128xf32>
    %37 = arith.subf %36, %35 : vector<2x128xf32>
    %38 = math.exp %37 : vector<2x128xf32>
    %cst_28 = arith.constant 1.000000e+00 : f32
    %39 = vector.broadcast %cst_28 : f32 to vector<2x128xf32>
    %40 = arith.addf %39, %38 : vector<2x128xf32>
    %cst_29 = arith.constant 1.000000e+00 : f32
    %41 = vector.broadcast %cst_29 : f32 to vector<2x128xf32>
    %42 = arith.divf %41, %40 : vector<2x128xf32>
    %43 = arith.truncf %42 : vector<2x128xf32> to vector<2x128xbf16>
    %c0_30 = arith.constant 0 : index
    %c0_31 = arith.constant 0 : index
    %44 = vector.load %arg11[%c0_30, %c0_31] : memref<128x128xbf16, #tpu.memory_space<vmem>>, vector<128x128xbf16>
    %cst_32 = arith.constant dense<0.000000e+00> : vector<2x128xf32>
    %45 = tpu.matmul %43, %44, %cst_32 {dimension_numbers = #tpu.dot_dimension_numbers<[1], [0], [0], [1], [0, 0, 1, 1], [], []>} : vector<2x128xbf16>, vector<128x128xbf16>, vector<2x128xf32> -> vector<2x128xf32>
    %46 = arith.mulf %32, %45 : vector<2x128xf32>
    %47 = arith.truncf %46 : vector<2x128xf32> to vector<2x128xbf16>
    %c0_33 = arith.constant 0 : index
    %c0_34 = arith.constant 0 : index
    %48 = vector.load %arg12[%c0_33, %c0_34] : memref<128x128xbf16, #tpu.memory_space<vmem>>, vector<128x128xbf16>
    %cst_35 = arith.constant dense<0.000000e+00> : vector<2x128xf32>
    %49 = tpu.matmul %47, %48, %cst_35 {dimension_numbers = #tpu.dot_dimension_numbers<[1], [0], [0], [1], [0, 0, 1, 1], [], []>} : vector<2x128xbf16>, vector<128x128xbf16>, vector<2x128xf32> -> vector<2x128xf32>
    %c0_36 = arith.constant 0 : index
    %c0_37 = arith.constant 0 : index
    %50 = vector.load %arg13[%c0_36, %c0_37] : memref<1x128xf32, #tpu.memory_space<vmem>>, vector<1x128xf32>
    %51 = vector.broadcast %50 : vector<1x128xf32> to vector<2x128xf32>
    %52 = arith.addf %49, %51 : vector<2x128xf32>
    %cst_38 = arith.constant 0.000000e+00 : f32
    %53 = vector.broadcast %cst_38 : f32 to vector<2x128xf32>
    %54 = arith.maximumf %52, %53 : vector<2x128xf32>
    %55 = arith.truncf %54 : vector<2x128xf32> to vector<2x128xbf16>
    %c0_39 = arith.constant 0 : index
    %c0_40 = arith.constant 0 : index
    %56 = vector.load %arg14[%c0_39, %c0_40] : memref<128x128xbf16, #tpu.memory_space<vmem>>, vector<128x128xbf16>
    %cst_41 = arith.constant dense<0.000000e+00> : vector<2x128xf32>
    %57 = tpu.matmul %55, %56, %cst_41 {dimension_numbers = #tpu.dot_dimension_numbers<[1], [0], [0], [1], [0, 0, 1, 1], [], []>} : vector<2x128xbf16>, vector<128x128xbf16>, vector<2x128xf32> -> vector<2x128xf32>
    %c0_42 = arith.constant 0 : index
    %c0_43 = arith.constant 0 : index
    %58 = vector.load %arg15[%c0_42, %c0_43] : memref<1x128xf32, #tpu.memory_space<vmem>>, vector<1x128xf32>
    %59 = vector.broadcast %58 : vector<1x128xf32> to vector<2x128xf32>
    %60 = arith.addf %57, %59 : vector<2x128xf32>
    %61 = arith.addf %60, %46 : vector<2x128xf32>
    %cst_44 = arith.constant 0.000000e+00 : f32
    %62 = vector.broadcast %cst_44 : f32 to vector<2x128xf32>
    %63 = arith.maximumf %61, %62 : vector<2x128xf32>
    %64 = arith.truncf %63 : vector<2x128xf32> to vector<2x128xbf16>
    %c0_45 = arith.constant 0 : index
    %c0_46 = arith.constant 0 : index
    %65 = vector.load %arg16[%c0_45, %c0_46] : memref<128x128xbf16, #tpu.memory_space<vmem>>, vector<128x128xbf16>
    %cst_47 = arith.constant dense<0.000000e+00> : vector<2x128xf32>
    %66 = tpu.matmul %64, %65, %cst_47 {dimension_numbers = #tpu.dot_dimension_numbers<[1], [0], [0], [1], [0, 0, 1, 1], [], []>} : vector<2x128xbf16>, vector<128x128xbf16>, vector<2x128xf32> -> vector<2x128xf32>
    %c0_48 = arith.constant 0 : index
    %c0_49 = arith.constant 0 : index
    %67 = vector.load %arg17[%c0_48, %c0_49] : memref<1x128xf32, #tpu.memory_space<vmem>>, vector<1x128xf32>
    %68 = vector.broadcast %67 : vector<1x128xf32> to vector<2x128xf32>
    %69 = arith.addf %66, %68 : vector<2x128xf32>
    %cst_50 = arith.constant 0.000000e+00 : f32
    %70 = vector.broadcast %cst_50 : f32 to vector<2x128xf32>
    %71 = arith.maximumf %69, %70 : vector<2x128xf32>
    %72 = arith.truncf %71 : vector<2x128xf32> to vector<2x128xbf16>
    %c0_51 = arith.constant 0 : index
    %c0_52 = arith.constant 0 : index
    %73 = vector.load %arg18[%c0_51, %c0_52] : memref<128x128xbf16, #tpu.memory_space<vmem>>, vector<128x128xbf16>
    %cst_53 = arith.constant dense<0.000000e+00> : vector<2x128xf32>
    %74 = tpu.matmul %72, %73, %cst_53 {dimension_numbers = #tpu.dot_dimension_numbers<[1], [0], [0], [1], [0, 0, 1, 1], [], []>} : vector<2x128xbf16>, vector<128x128xbf16>, vector<2x128xf32> -> vector<2x128xf32>
    %c0_54 = arith.constant 0 : index
    %c0_55 = arith.constant 0 : index
    %75 = vector.load %arg19[%c0_54, %c0_55] : memref<1x128xf32, #tpu.memory_space<vmem>>, vector<1x128xf32>
    %76 = vector.broadcast %75 : vector<1x128xf32> to vector<2x128xf32>
    %77 = arith.addf %74, %76 : vector<2x128xf32>
    %cst_56 = arith.constant 0.000000e+00 : f32
    %78 = vector.broadcast %cst_56 : f32 to vector<2x128xf32>
    %79 = arith.maximumf %77, %78 : vector<2x128xf32>
    %80 = arith.truncf %79 : vector<2x128xf32> to vector<2x128xbf16>
    %c0_57 = arith.constant 0 : index
    %c0_58 = arith.constant 0 : index
    %81 = vector.load %arg20[%c0_57, %c0_58] : memref<128x128xbf16, #tpu.memory_space<vmem>>, vector<128x128xbf16>
    %cst_59 = arith.constant dense<0.000000e+00> : vector<2x128xf32>
    %82 = tpu.matmul %80, %81, %cst_59 {dimension_numbers = #tpu.dot_dimension_numbers<[1], [0], [0], [1], [0, 0, 1, 1], [], []>} : vector<2x128xbf16>, vector<128x128xbf16>, vector<2x128xf32> -> vector<2x128xf32>
    %c0_60 = arith.constant 0 : index
    %c0_61 = arith.constant 0 : index
    %83 = vector.load %arg21[%c0_60, %c0_61] : memref<1x128xf32, #tpu.memory_space<vmem>>, vector<1x128xf32>
    %84 = vector.broadcast %83 : vector<1x128xf32> to vector<2x128xf32>
    %85 = arith.addf %82, %84 : vector<2x128xf32>
    %cst_62 = arith.constant 0.000000e+00 : f32
    %86 = vector.broadcast %cst_62 : f32 to vector<2x128xf32>
    %87 = arith.maximumf %85, %86 : vector<2x128xf32>
    %88 = arith.truncf %87 : vector<2x128xf32> to vector<2x128xbf16>
    %c0_63 = arith.constant 0 : index
    %c0_64 = arith.constant 0 : index
    %89 = vector.load %arg22[%c0_63, %c0_64] : memref<128x128xbf16, #tpu.memory_space<vmem>>, vector<128x128xbf16>
    %cst_65 = arith.constant dense<0.000000e+00> : vector<2x128xf32>
    %90 = tpu.matmul %88, %89, %cst_65 {dimension_numbers = #tpu.dot_dimension_numbers<[1], [0], [0], [1], [0, 0, 1, 1], [], []>} : vector<2x128xbf16>, vector<128x128xbf16>, vector<2x128xf32> -> vector<2x128xf32>
    %c0_66 = arith.constant 0 : index
    %c0_67 = arith.constant 0 : index
    %91 = vector.load %arg23[%c0_66, %c0_67] : memref<1x128xf32, #tpu.memory_space<vmem>>, vector<1x128xf32>
    %92 = vector.broadcast %91 : vector<1x128xf32> to vector<2x128xf32>
    %93 = arith.addf %90, %92 : vector<2x128xf32>
    %94 = arith.addf %93, %79 : vector<2x128xf32>
    %cst_68 = arith.constant 0.000000e+00 : f32
    %95 = vector.broadcast %cst_68 : f32 to vector<2x128xf32>
    %96 = arith.maximumf %94, %95 : vector<2x128xf32>
    %97 = arith.truncf %96 : vector<2x128xf32> to vector<2x128xbf16>
    %c0_69 = arith.constant 0 : index
    %c0_70 = arith.constant 0 : index
    %98 = vector.load %arg24[%c0_69, %c0_70] : memref<128x128xbf16, #tpu.memory_space<vmem>>, vector<128x128xbf16>
    %cst_71 = arith.constant dense<0.000000e+00> : vector<2x128xf32>
    %99 = tpu.matmul %97, %98, %cst_71 {dimension_numbers = #tpu.dot_dimension_numbers<[1], [0], [0], [1], [0, 0, 1, 1], [], []>} : vector<2x128xbf16>, vector<128x128xbf16>, vector<2x128xf32> -> vector<2x128xf32>
    %c0_72 = arith.constant 0 : index
    %c0_73 = arith.constant 0 : index
    %100 = vector.load %arg25[%c0_72, %c0_73] : memref<1x128xf32, #tpu.memory_space<vmem>>, vector<1x128xf32>
    %101 = vector.broadcast %100 : vector<1x128xf32> to vector<2x128xf32>
    %102 = arith.addf %99, %101 : vector<2x128xf32>
    %cst_74 = arith.constant 0.000000e+00 : f32
    %103 = vector.broadcast %cst_74 : f32 to vector<2x128xf32>
    %104 = arith.maximumf %102, %103 : vector<2x128xf32>
    %105 = arith.truncf %104 : vector<2x128xf32> to vector<2x128xbf16>
    %c0_75 = arith.constant 0 : index
    %c0_76 = arith.constant 0 : index
    %106 = vector.load %arg26[%c0_75, %c0_76] : memref<128x128xbf16, #tpu.memory_space<vmem>>, vector<128x128xbf16>
    %cst_77 = arith.constant dense<0.000000e+00> : vector<2x128xf32>
    %107 = tpu.matmul %105, %106, %cst_77 {dimension_numbers = #tpu.dot_dimension_numbers<[1], [0], [0], [1], [0, 0, 1, 1], [], []>} : vector<2x128xbf16>, vector<128x128xbf16>, vector<2x128xf32> -> vector<2x128xf32>
    %cst_78 = arith.constant 0.000000e+00 : f32
    %108 = vector.broadcast %cst_78 : f32 to vector<2x128xf32>
    %109 = arith.subf %108, %107 : vector<2x128xf32>
    %110 = math.exp %109 : vector<2x128xf32>
    %cst_79 = arith.constant 1.000000e+00 : f32
    %111 = vector.broadcast %cst_79 : f32 to vector<2x128xf32>
    %112 = arith.addf %111, %110 : vector<2x128xf32>
    %cst_80 = arith.constant 1.000000e+00 : f32
    %113 = vector.broadcast %cst_80 : f32 to vector<2x128xf32>
    %114 = arith.divf %113, %112 : vector<2x128xf32>
    %115 = arith.truncf %114 : vector<2x128xf32> to vector<2x128xbf16>
    %c0_81 = arith.constant 0 : index
    %c0_82 = arith.constant 0 : index
    %116 = vector.load %arg11[%c0_81, %c0_82] : memref<128x128xbf16, #tpu.memory_space<vmem>>, vector<128x128xbf16>
    %cst_83 = arith.constant dense<0.000000e+00> : vector<2x128xf32>
    %117 = tpu.matmul %115, %116, %cst_83 {dimension_numbers = #tpu.dot_dimension_numbers<[1], [0], [0], [1], [0, 0, 1, 1], [], []>} : vector<2x128xbf16>, vector<128x128xbf16>, vector<2x128xf32> -> vector<2x128xf32>
    %118 = arith.mulf %104, %117 : vector<2x128xf32>
    %119 = arith.truncf %118 : vector<2x128xf32> to vector<2x128xbf16>
    %c0_84 = arith.constant 0 : index
    %c0_85 = arith.constant 0 : index
    %120 = vector.load %arg27[%c0_84, %c0_85] : memref<128x256xbf16, #tpu.memory_space<vmem>>, vector<128x256xbf16>
    %cst_86 = arith.constant dense<0.000000e+00> : vector<2x256xf32>
    %121 = tpu.matmul %119, %120, %cst_86 {dimension_numbers = #tpu.dot_dimension_numbers<[1], [0], [0], [1], [0, 0, 1, 1], [], []>} : vector<2x128xbf16>, vector<128x256xbf16>, vector<2x256xf32> -> vector<2x256xf32>
    %c0_87 = arith.constant 0 : index
    %c0_88 = arith.constant 0 : index
    %122 = vector.load %arg28[%c0_87, %c0_88] : memref<1x256xf32, #tpu.memory_space<vmem>>, vector<1x256xf32>
    %123 = vector.broadcast %122 : vector<1x256xf32> to vector<2x256xf32>
    %124 = arith.addf %121, %123 : vector<2x256xf32>
    %cst_89 = arith.constant 0.000000e+00 : f32
    %125 = vector.broadcast %cst_89 : f32 to vector<2x256xf32>
    %126 = arith.maximumf %124, %125 : vector<2x256xf32>
    %127 = arith.truncf %126 : vector<2x256xf32> to vector<2x256xbf16>
    %c0_90 = arith.constant 0 : index
    %c0_91 = arith.constant 0 : index
    %128 = vector.load %arg29[%c0_90, %c0_91] : memref<256x384xbf16, #tpu.memory_space<vmem>>, vector<256x384xbf16>
    %cst_92 = arith.constant dense<0.000000e+00> : vector<2x384xf32>
    %129 = tpu.matmul %127, %128, %cst_92 {dimension_numbers = #tpu.dot_dimension_numbers<[1], [0], [0], [1], [0, 0, 1, 1], [], []>} : vector<2x256xbf16>, vector<256x384xbf16>, vector<2x384xf32> -> vector<2x384xf32>
    %c0_93 = arith.constant 0 : index
    %c0_94 = arith.constant 0 : index
    %130 = vector.load %arg30[%c0_93, %c0_94] : memref<1x384xf32, #tpu.memory_space<vmem>>, vector<1x384xf32>
    %131 = vector.broadcast %130 : vector<1x384xf32> to vector<2x384xf32>
    %132 = arith.addf %129, %131 : vector<2x384xf32>
    %cst_95 = arith.constant 0.000000e+00 : f32
    %133 = vector.broadcast %cst_95 : f32 to vector<2x384xf32>
    %134 = arith.maximumf %132, %133 : vector<2x384xf32>
    %135 = arith.truncf %134 : vector<2x384xf32> to vector<2x384xbf16>
    %c0_96 = arith.constant 0 : index
    %c0_97 = arith.constant 0 : index
    %136 = vector.load %arg31[%c0_96, %c0_97] : memref<384x768xbf16, #tpu.memory_space<vmem>>, vector<384x768xbf16>
    %cst_98 = arith.constant dense<0.000000e+00> : vector<2x768xf32>
    %137 = tpu.matmul %135, %136, %cst_98 {dimension_numbers = #tpu.dot_dimension_numbers<[1], [0], [0], [1], [0, 0, 1, 1], [], []>} : vector<2x384xbf16>, vector<384x768xbf16>, vector<2x768xf32> -> vector<2x768xf32>
    %c0_99 = arith.constant 0 : index
    %c0_100 = arith.constant 0 : index
    %138 = vector.load %arg32[%c0_99, %c0_100] : memref<1x768xf32, #tpu.memory_space<vmem>>, vector<1x768xf32>
    %139 = vector.broadcast %138 : vector<1x768xf32> to vector<2x768xf32>
    %140 = arith.addf %137, %139 : vector<2x768xf32>
    %cst_101 = arith.constant 0.000000e+00 : f32
    %141 = vector.broadcast %cst_101 : f32 to vector<2x768xf32>
    %142 = arith.maximumf %140, %141 : vector<2x768xf32>
    %c0_102 = arith.constant 0 : index
    %c0_103 = arith.constant 0 : index
    %143 = vector.load %arg33[%c0_102, %c0_103] : memref<2x768xf32, #tpu.memory_space<vmem>>, vector<2x768xf32>
    tpu.vector_store %arg33[%c0_102, %c0_103], %142 {strides = array<i32>} : memref<2x768xf32, #tpu.memory_space<vmem>>, vector<2x768xf32>,
    return
  }
  func.func @transform_0(%arg0: i32) -> (i32, i32) {
    %c0_i32 = arith.constant 0 : i32
    %c0_i32_0 = arith.constant 0 : i32
    %c0_i32_1 = arith.constant 0 : i32
    return %c0_i32, %c0_i32_0 : i32, i32
  }
  func.func @transform_1(%arg0: i32) -> (i32, i32) {
    %c0_i32 = arith.constant 0 : i32
    %c0_i32_0 = arith.constant 0 : i32
    %c0_i32_1 = arith.constant 0 : i32
    return %c0_i32, %c0_i32_0 : i32, i32
  }
  func.func @transform_2(%arg0: i32) -> (i32, i32) {
    %c0_i32 = arith.constant 0 : i32
    %c0_i32_0 = arith.constant 0 : i32
    %c0_i32_1 = arith.constant 0 : i32
    return %c0_i32, %c0_i32_0 : i32, i32
  }
  func.func @transform_3(%arg0: i32) -> (i32, i32) {
    %c0_i32 = arith.constant 0 : i32
    %c0_i32_0 = arith.constant 0 : i32
    %c0_i32_1 = arith.constant 0 : i32
    return %c0_i32, %c0_i32_0 : i32, i32
  }
  func.func @transform_4(%arg0: i32) -> (i32, i32) {
    %c0_i32 = arith.constant 0 : i32
    %c0_i32_0 = arith.constant 0 : i32
    %c0_i32_1 = arith.constant 0 : i32
    return %c0_i32, %c0_i32_0 : i32, i32
  }
  func.func @transform_5(%arg0: i32) -> (i32, i32) {
    %c0_i32 = arith.constant 0 : i32
    %c0_i32_0 = arith.constant 0 : i32
    %c0_i32_1 = arith.constant 0 : i32
    return %c0_i32, %c0_i32_0 : i32, i32
  }
  func.func @transform_6(%arg0: i32) -> (i32, i32) {
    %c0_i32 = arith.constant 0 : i32
    %c0_i32_0 = arith.constant 0 : i32
    %c0_i32_1 = arith.constant 0 : i32
    return %c0_i32, %c0_i32_0 : i32, i32
  }
  func.func @transform_7(%arg0: i32) -> (i32, i32) {
    %c0_i32 = arith.constant 0 : i32
    %c0_i32_0 = arith.constant 0 : i32
    %c0_i32_1 = arith.constant 0 : i32
    return %c0_i32, %c0_i32_0 : i32, i32
  }
  func.func @transform_8(%arg0: i32) -> (i32, i32) {
    %c0_i32 = arith.constant 0 : i32
    %c0_i32_0 = arith.constant 0 : i32
    %c0_i32_1 = arith.constant 0 : i32
    return %c0_i32, %c0_i32_0 : i32, i32
  }
  func.func @transform_9(%arg0: i32) -> (i32, i32) {
    %c0_i32 = arith.constant 0 : i32
    %c0_i32_0 = arith.constant 0 : i32
    %c0_i32_1 = arith.constant 0 : i32
    return %c0_i32, %c0_i32_0 : i32, i32
  }
  func.func @transform_10(%arg0: i32) -> (i32, i32) {
    %c0_i32 = arith.constant 0 : i32
    %c0_i32_0 = arith.constant 0 : i32
    %c0_i32_1 = arith.constant 0 : i32
    return %c0_i32, %c0_i32_0 : i32, i32
  }
  func.func @transform_11(%arg0: i32) -> (i32, i32) {
    %c0_i32 = arith.constant 0 : i32
    %c0_i32_0 = arith.constant 0 : i32
    %c0_i32_1 = arith.constant 0 : i32
    return %c0_i32, %c0_i32_0 : i32, i32
  }
  func.func @transform_12(%arg0: i32) -> (i32, i32) {
    %c0_i32 = arith.constant 0 : i32
    %c0_i32_0 = arith.constant 0 : i32
    %c0_i32_1 = arith.constant 0 : i32
    return %c0_i32, %c0_i32_0 : i32, i32
  }
  func.func @transform_13(%arg0: i32) -> (i32, i32) {
    %c0_i32 = arith.constant 0 : i32
    %c0_i32_0 = arith.constant 0 : i32
    %c0_i32_1 = arith.constant 0 : i32
    return %c0_i32, %c0_i32_0 : i32, i32
  }
  func.func @transform_14(%arg0: i32) -> (i32, i32) {
    %c0_i32 = arith.constant 0 : i32
    %c0_i32_0 = arith.constant 0 : i32
    %c0_i32_1 = arith.constant 0 : i32
    return %c0_i32, %c0_i32_0 : i32, i32
  }
  func.func @transform_15(%arg0: i32) -> (i32, i32) {
    %c0_i32 = arith.constant 0 : i32
    %c0_i32_0 = arith.constant 0 : i32
    %c0_i32_1 = arith.constant 0 : i32
    return %c0_i32, %c0_i32_0 : i32, i32
  }
  func.func @transform_16(%arg0: i32) -> (i32, i32) {
    %c0_i32 = arith.constant 0 : i32
    %c0_i32_0 = arith.constant 0 : i32
    %c0_i32_1 = arith.constant 0 : i32
    return %c0_i32, %c0_i32_0 : i32, i32
  }
  func.func @transform_17(%arg0: i32) -> (i32, i32) {
    %c0_i32 = arith.constant 0 : i32
    %c0_i32_0 = arith.constant 0 : i32
    %c0_i32_1 = arith.constant 0 : i32
    return %c0_i32, %c0_i32_0 : i32, i32
  }
  func.func @transform_18(%arg0: i32) -> (i32, i32) {
    %c0_i32 = arith.constant 0 : i32
    %c0_i32_0 = arith.constant 0 : i32
    %c0_i32_1 = arith.constant 0 : i32
    return %c0_i32, %c0_i32_0 : i32, i32
  }
  func.func @transform_19(%arg0: i32) -> (i32, i32) {
    %c0_i32 = arith.constant 0 : i32
    %c0_i32_0 = arith.constant 0 : i32
    %c0_i32_1 = arith.constant 0 : i32
    return %c0_i32, %c0_i32_0 : i32, i32
  }
  func.func @transform_20(%arg0: i32) -> (i32, i32) {
    %c0_i32 = arith.constant 0 : i32
    %c0_i32_0 = arith.constant 0 : i32
    %c0_i32_1 = arith.constant 0 : i32
    return %c0_i32, %c0_i32_0 : i32, i32
  }
  func.func @transform_21(%arg0: i32) -> (i32, i32) {
    %c0_i32 = arith.constant 0 : i32
    %c0_i32_0 = arith.constant 0 : i32
    %c0_i32_1 = arith.constant 0 : i32
    return %c0_i32, %c0_i32_0 : i32, i32
  }
  func.func @transform_22(%arg0: i32) -> (i32, i32) {
    %c0_i32 = arith.constant 0 : i32
    %c0_i32_0 = arith.constant 0 : i32
    %c0_i32_1 = arith.constant 0 : i32
    return %c0_i32, %c0_i32_0 : i32, i32
  }
  func.func @transform_23(%arg0: i32) -> (i32, i32) {
    %c0_i32 = arith.constant 0 : i32
    %c0_i32_0 = arith.constant 0 : i32
    %c0_i32_1 = arith.constant 0 : i32
    return %c0_i32, %c0_i32_0 : i32, i32
  }
  func.func @transform_24(%arg0: i32) -> (i32, i32) {
    %c0_i32 = arith.constant 0 : i32
    %c0_i32_0 = arith.constant 0 : i32
    %c0_i32_1 = arith.constant 0 : i32
    return %c0_i32, %c0_i32_0 : i32, i32
  }
  func.func @transform_25(%arg0: i32) -> (i32, i32) {
    %c0_i32 = arith.constant 0 : i32
    %c0_i32_0 = arith.constant 0 : i32
    %c0_i32_1 = arith.constant 0 : i32
    return %c0_i32, %c0_i32_0 : i32, i32
  }
  func.func @transform_26(%arg0: i32) -> (i32, i32) {
    %c0_i32 = arith.constant 0 : i32
    %c0_i32_0 = arith.constant 0 : i32
    %c0_i32_1 = arith.constant 0 : i32
    return %c0_i32, %c0_i32_0 : i32, i32
  }
  func.func @transform_27(%arg0: i32) -> (i32, i32) {
    %c0_i32 = arith.constant 0 : i32
    %c0_i32_0 = arith.constant 0 : i32
    %c0_i32_1 = arith.constant 0 : i32
    return %c0_i32, %c0_i32_0 : i32, i32
  }
  func.func @transform_28(%arg0: i32) -> (i32, i32) {
    %c0_i32 = arith.constant 0 : i32
    %c0_i32_0 = arith.constant 0 : i32
    %c0_i32_1 = arith.constant 0 : i32
    return %c0_i32, %c0_i32_0 : i32, i32
  }
  func.func @transform_29(%arg0: i32) -> (i32, i32) {
    %c0_i32 = arith.constant 0 : i32
    %c0_i32_0 = arith.constant 0 : i32
    %c0_i32_1 = arith.constant 0 : i32
    return %c0_i32, %c0_i32_0 : i32, i32
  }
  func.func @transform_30(%arg0: i32) -> (i32, i32) {
    %c0_i32 = arith.constant 0 : i32
    %c0_i32_0 = arith.constant 0 : i32
    %c0_i32_1 = arith.constant 0 : i32
    return %c0_i32, %c0_i32_0 : i32, i32
  }
  func.func @transform_31(%arg0: i32) -> (i32, i32) {
    %c0_i32 = arith.constant 0 : i32
    %c0_i32_0 = arith.constant 0 : i32
    %c0_i32_1 = arith.constant 0 : i32
    return %c0_i32, %c0_i32_0 : i32, i32
  }
  func.func @transform_32(%arg0: i32) -> (i32, i32) {
    %c0_i32 = arith.constant 0 : i32
    %c0_i32_0 = arith.constant 0 : i32
    %c0_i32_1 = arith.constant 0 : i32
    return %c0_i32, %c0_i32_0 : i32, i32
  }
}

</mosaic_0001>

<bundles_post_ra>
// kernel: forward.1
= control target key start
LH: loop header
LB: loop body
LE: loop exit
PB: predicated region body
PF: predicated region fallthrough
CT: control target
= control target key end

     0   :  { %s7811_s6 = smov 1   ;;  %s7812_s10 = smov 2   ;;  %s8669_s0 = inlined_call_operand.smem [shape: u32[33], index: -1, kind: input, shape index: {}] }
   0x1   :  { %s7889_s5 = sld [smem:[%s8669_s0]]   ;;  %s7813_s14 = smov 3  }
   0x2   :  { %s7894_s9 = sld [smem:[%s8669_s0 + %s7811_s6]]   ;;  %s7814_s18 = smov 4  }
   0x3   :  { %s7899_s13 = sld [smem:[%s8669_s0 + %s7812_s10]]   ;;  %s7815_s22 = smov 5  }
   0x4   :  { %s7904_s17 = sld [smem:[%s8669_s0 + %s7813_s14]]   ;;  %s7816_s26 = smov 6  }
   0x5   :  { %s7909_s21 = sld [smem:[%s8669_s0 + %s7814_s18]]   ;;  %s7817_s30 = smov 7  }
   0x6   :  { %s7914_s25 = sld [smem:[%s8669_s0 + %s7815_s22]]   ;;  %s7818_s4 = smov 8  }
   0x7   :  { %8683 = sst [smem:[#allocation60_spill]] %s7889_s5  ;;  %s7819_s10 = smov 9  }
   0x8   :  { %s7919_s29 = sld [smem:[%s8669_s0 + %s7816_s26]]   ;;  %s7820_s15 = smov 10  }
   0x9   :  { %8684 = sst [smem:[#allocation61_spill]] %s7899_s13  ;;  %s7821_s20 = smov 11  }
   0xa   :  { %s7924_s3 = sld [smem:[%s8669_s0 + %s7817_s30]]   ;;  %s7822_s26 = smov 12  }
   0xb   :  { %8685 = sst [smem:[#allocation62_spill]] %s7909_s21  ;;  %s7823_s1 = smov 13  }
   0xc   :  { %8686 = sst [smem:[#allocation63_spill]] %s7914_s25  ;;  %s7824_s7 = smov 14  }
   0xd   :  { %s7929_s8 = sld [smem:[%s8669_s0 + %s7818_s4]]   ;;  %s7826_s22 = smov 16  }
   0xe   :  { %s7934_s14 = sld [smem:[%s8669_s0 + %s7819_s10]]   ;;  %s7827_s28 = smov 17  }
   0xf   :  { %s7939_s19 = sld [smem:[%s8669_s0 + %s7820_s15]]   ;;  %s7825_s15 = smov 15  }
  0x10   :  { %8687 = sst [smem:[#allocation64_spill]] %s7924_s3 }
  0x11   :  { %s7944_s24 = sld [smem:[%s8669_s0 + %s7821_s20]]  }
  0x12   :  { %s7949_s30 = sld [smem:[%s8669_s0 + %s7822_s26]]  }
  0x13   :  { %s7954_s6 = sld [smem:[%s8669_s0 + %s7823_s1]]  }
  0x14   :  { %8688 = sst [smem:[#allocation65_spill]] %s7934_s14 }
  0x15   :  { %s7959_s12 = sld [smem:[%s8669_s0 + %s7824_s7]]   ;;  %s7828_s7 = smov 18  }
  0x16   :  { %s7964_s20 = sld [smem:[%s8669_s0 + %s7825_s15]]   ;;  %s7829_s15 = smov 19  }
  0x17   :  { %8689 = sst [smem:[#allocation66_spill]] %s7944_s24 }
  0x18   :  { %s7969_s27 = sld [smem:[%s8669_s0 + %s7826_s22]]   ;;  %s7830_s22 = smov 20  }
  0x19   :  { %8690 = sst [smem:[#allocation67_spill]] %s7954_s6 }
  0x1a   :  { %s7974_s4 = sld [smem:[%s8669_s0 + %s7827_s28]]   ;;  %s7831_s28 = smov 21  }
  0x1b   :  { %s7979_s21 = sld [smem:[%s8669_s0 + %s7828_s7]]   ;;  %s7832_s7 = smov 22  }
  0x1c   :  { %8691 = sst [smem:[#allocation68_spill]] %s7964_s20 }
  0x1d   :  { %s7984_s13 = sld [smem:[%s8669_s0 + %s7829_s15]]   ;;  %s7833_s15 = smov 23  }
  0x1e   :  { %s7989_s5 = sld [smem:[%s8669_s0 + %s7830_s22]]   ;;  %s7834_s22 = smov 24  }
  0x1f   :  { %s7999_s20 = sld [smem:[%s8669_s0 + %s7832_s7]]   ;;  %s7836_s7 = smov 26  }
  0x20   :  { %8692 = sst [smem:[#allocation69_spill]] %s7974_s4 }
  0x21   :  { %s7994_s4 = sld [smem:[%s8669_s0 + %s7831_s28]]   ;;  %s7835_s28 = smov 25  }
  0x22   :  { %s8009_s6 = sld [smem:[%s8669_s0 + %s7834_s22]]   ;;  %s7838_s22 = smov 28  }
  0x23   :  { %8693 = sst [smem:[#allocation70_spill]] %s7984_s13 }
  0x24   :  { %s8004_s13 = sld [smem:[%s8669_s0 + %s7833_s15]]   ;;  %s7837_s15 = smov 27  }
  0x25   :  { %s8019_s24 = sld [smem:[%s8669_s0 + %s7836_s7]]   ;;  %s7840_s7 = smov 30  }
  0x26   :  { %s8029_s14 = sld [smem:[%s8669_s0 + %s7838_s22]]   ;;  %s7842_s22 = smov 32  }
  0x27   :  { %8694 = sst [smem:[#allocation71_spill]] %s7994_s4 }
  0x28   :  { %s8014_s4 = sld [smem:[%s8669_s0 + %s7835_s28]]   ;;  %s7839_s28 = smov 29  }
  0x29   :  { %s8039_s3 = sld [smem:[%s8669_s0 + %s7840_s7]]  }
  0x2a   :  { %8695 = sst [smem:[#allocation72_spill]] %s8004_s13 }
  0x2b   :  { %s8024_s13 = sld [smem:[%s8669_s0 + %s7837_s15]]   ;;  %s7841_s15 = smov 31  }
  0x2c   :  { %s8049_s25 = sld [smem:[%s8669_s0 + %s7842_s22]]  }
  0x2e   :  { %8696 = sst [smem:[#allocation73_spill]] %s8014_s4 }
  0x2f   :  { %s8034_s4 = sld [smem:[%s8669_s0 + %s7839_s28]]  }
  0x31   :  { %8697 = sst [smem:[#allocation74_spill]] %s8024_s13 }
  0x32   :  { %s8044_s13 = sld [smem:[%s8669_s0 + %s7841_s15]]  }
  0x33   :  { %70 = vsyncpa [#allocation3], 0 }
  0x34   :  { %71 = vsyncpa [#allocation5], 0 }
  0x35   :  { %72 = vsyncpa [#allocation8], 0 }
  0x36   :  { %73 = vsyncpa [#allocation11], 0 }
  0x37   :  { %74 = vsyncpa [#allocation14], 0 }
  0x38   :  { %75 = vsyncpa [#allocation17], 0 }
  0x39   :  { %76 = vsyncpa [#allocation20], 0 }
  0x3a   :  { %77 = vsyncpa [#allocation23], 0 }
  0x3b   :  { %78 = vsyncpa [#allocation26], 0 }
  0x3c   :  { %79 = vsyncpa [#allocation29], 0 }
  0x3d   :  { %80 = vsyncpa [#allocation32], 0 }
  0x3e   :  { %81 = vsyncpa [#allocation35], 0 }
  0x3f   :  { %82 = vsyncpa [#allocation38], 0 }
  0x40   :  { %83 = vsyncpa [#allocation41], 0 }
  0x41   :  { %84 = vsyncpa [#allocation44], 0  ;;  %s7843_s0 = smov [#allocation4]   ;;  %s7165_s1 = scalar_lea.hbm %s7904_s17, 6144 }
  0x42   :  { %s106_s28 = sshll.u32 %s7843_s0, 4  ;;  %p7166_p0 = scmp.ne.s32.totalorder %s7904_s17, %s7165_s1  ;;  %s107_s28 = int_to_ptr.vmem [resolvable:$true] %s106_s28 }
  0x43   :  { %p7169_p1 = scmp.lt.u32.totalorder %s7165_s1, %s7904_s17 }
  0x45   :  { %p7171_p2 = pnand %p7169_p1, %p7166_p0 }
  0x47   :  { %7174 = shalt.err (!%p7171_p2)
}
  0x48   :  { %s7175_s2 = scalar_lea.vmem %s107_s28, 6144  ;;  %p7180_p4 = scmp.lt.s32.totalorder %s107_s28, %s107_s28 }
  0x49   :  { %p7176_p3 = scmp.ne.s32.totalorder %s107_s28, %s7175_s2  ;;  %p7181_p5 = scmp.lt.s32.totalorder %s7175_s2, %s7175_s2 }
  0x4b   :  { %p7182_p6 = por %p7181_p5, %p7180_p4 }
  0x4d   :  { %p7183_p7 = pnand %p7182_p6, %p7176_p3 }
  0x4f   :  { %7186 = shalt.err (!%p7183_p7)
}
  0x50   :  { %s7844_s7 = smov 128   ;;  %s7845_s10 = smov 8  }
  0x51   :  { %112 = dma.hbm_to_vmem [thread:$0]  %s7904_s17, 6144, %s107_s28, [#allocation5], %s7844_s7, %s7844_s7, %s7845_s10  }
  0x52   :  { %s7846_s11 = smov [#allocation7]   ;;  %s7847_s16 = smov [#allocation10]  }
  0x53   :  { %s133_s15 = sshll.u32 %s7846_s11, 4  ;;  %s155_s18 = sshll.u32 %s7847_s16, 4  ;;  %s134_s15 = int_to_ptr.vmem [resolvable:$true] %s133_s15  ;;  %s156_s18 = int_to_ptr.vmem [resolvable:$true] %s155_s18 }
  0x54   :  { %s7187_s22 = scalar_lea.hbm %s7919_s29, 16 }
  0x55   :  { %p7188_p8 = scmp.ne.s32.totalorder %s7919_s29, %s7187_s22  ;;  %p7191_p9 = scmp.lt.u32.totalorder %s7187_s22, %s7919_s29 }
  0x57   :  { %p7193_p10 = pnand %p7191_p9, %p7188_p8 }
  0x59   :  { %7196 = shalt.err (!%p7193_p10)
}
  0x5a   :  { %s7197_s23 = scalar_lea.vmem %s134_s15, 16  ;;  %s7201_s26 = scalar_lea.vmem %s134_s15, 32 }
  0x5b   :  { %p7198_p11 = scmp.ne.s32.totalorder %s134_s15, %s7197_s23  ;;  %p7202_p12 = scmp.lt.s32.totalorder %s134_s15, %s134_s15 }
  0x5c   :  { %p7203_p13 = scmp.lt.s32.totalorder %s7201_s26, %s7197_s23 }
  0x5e   :  { %p7204_p0 = por %p7203_p13, %p7202_p12 }
  0x60   :  { %p7205_p1 = pnand %p7204_p0, %p7198_p11 }
  0x62   :  { %7208 = shalt.err (!%p7205_p1)
}
  0x63   :  { %136 = dma.hbm_to_vmem [thread:$0]  %s7919_s29, 16, %s134_s15, [#allocation8]  }
  0x64   :  { %s7209_s17 = scalar_lea.hbm %s7929_s8, 16 }
  0x65   :  { %p7210_p2 = scmp.ne.s32.totalorder %s7929_s8, %s7209_s17  ;;  %p7213_p3 = scmp.lt.u32.totalorder %s7209_s17, %s7929_s8 }
  0x67   :  { %p7215_p4 = pnand %p7213_p3, %p7210_p2 }
  0x69   :  { %7218 = shalt.err (!%p7215_p4)
}
  0x6a   :  { %s7219_s0 = scalar_lea.vmem %s156_s18, 16  ;;  %s7223_s28 = scalar_lea.vmem %s156_s18, 32 }
  0x6b   :  { %p7220_p5 = scmp.ne.s32.totalorder %s156_s18, %s7219_s0  ;;  %p7224_p6 = scmp.lt.s32.totalorder %s156_s18, %s156_s18 }
  0x6c   :  { %p7225_p7 = scmp.lt.s32.totalorder %s7223_s28, %s7219_s0 }
  0x6e   :  { %p7226_p8 = por %p7225_p7, %p7224_p6 }
  0x70   :  { %p7227_p9 = pnand %p7226_p8, %p7220_p5 }
  0x72   :  { %7230 = shalt.err (!%p7227_p9)
}
  0x73   :  { %158 = dma.hbm_to_vmem [thread:$0]  %s7929_s8, 16, %s156_s18, [#allocation11]  }
  0x74   :  { %s7848_s29 = smov [#allocation13]   ;;  %s7849_s2 = smov [#allocation16]  }
  0x75   :  { %s176_s1 = sshll.u32 %s7848_s29, 4  ;;  %s201_s11 = sshll.u32 %s7849_s2, 4  ;;  %s177_s1 = int_to_ptr.vmem [resolvable:$true] %s176_s1  ;;  %s202_s11 = int_to_ptr.vmem [resolvable:$true] %s201_s11 }
  0x76   :  { %s7231_s15 = scalar_lea.hbm %s7939_s19, 1024 }
  0x77   :  { %p7232_p10 = scmp.ne.s32.totalorder %s7939_s19, %s7231_s15  ;;  %p7235_p11 = scmp.lt.u32.totalorder %s7231_s15, %s7939_s19 }
  0x79   :  { %p7237_p12 = pnand %p7235_p11, %p7232_p10 }
  0x7b   :  { %7240 = shalt.err (!%p7237_p12)
}
  0x7c   :  { %s7241_s16 = scalar_lea.vmem %s177_s1, 1024  ;;  %p7246_p0 = scmp.lt.s32.totalorder %s177_s1, %s177_s1 }
  0x7d   :  { %p7242_p13 = scmp.ne.s32.totalorder %s177_s1, %s7241_s16  ;;  %p7247_p1 = scmp.lt.s32.totalorder %s7241_s16, %s7241_s16 }
  0x7f   :  { %p7248_p2 = por %p7247_p1, %p7246_p0 }
  0x81   :  { %p7249_p3 = pnand %p7248_p2, %p7242_p13 }
  0x83   :  { %7252 = shalt.err (!%p7249_p3)
}
  0x84   :  { %s7850_s22 = smov 64   ;;  %s7851_s8 = smov 4  }
  0x85   :  { %182 = dma.hbm_to_vmem [thread:$0]  %s7939_s19, 1024, %s177_s1, [#allocation14], %s7850_s22, %s7850_s22, %s7851_s8  }
  0x86   :  { %s7253_s18 = scalar_lea.hbm %s7949_s30, 16 }
  0x87   :  { %p7254_p4 = scmp.ne.s32.totalorder %s7949_s30, %s7253_s18  ;;  %p7257_p5 = scmp.lt.u32.totalorder %s7253_s18, %s7949_s30 }
  0x89   :  { %p7259_p6 = pnand %p7257_p5, %p7254_p4 }
  0x8b   :  { %7262 = shalt.err (!%p7259_p6)
}
  0x8c   :  { %s7263_s23 = scalar_lea.vmem %s202_s11, 16  ;;  %s7267_s26 = scalar_lea.vmem %s202_s11, 32 }
  0x8d   :  { %p7264_p7 = scmp.ne.s32.totalorder %s202_s11, %s7263_s23  ;;  %p7268_p8 = scmp.lt.s32.totalorder %s202_s11, %s202_s11 }
  0x8e   :  { %p7269_p9 = scmp.lt.s32.totalorder %s7267_s26, %s7263_s23 }
  0x90   :  { %p7270_p10 = por %p7269_p9, %p7268_p8 }
  0x92   :  { %p7271_p11 = pnand %p7270_p10, %p7264_p7 }
  0x94   :  { %7274 = shalt.err (!%p7271_p11)
}
  0x95   :  { %204 = dma.hbm_to_vmem [thread:$0]  %s7949_s30, 16, %s202_s11, [#allocation17]  }
  0x96   :  { %s7852_s19 = smov [#allocation19]   ;;  %s7853_s0 = smov [#allocation22]  }
  0x97   :  { %s223_s17 = sshll.u32 %s7852_s19, 4  ;;  %s245_s28 = sshll.u32 %s7853_s0, 4  ;;  %s224_s17 = int_to_ptr.vmem [resolvable:$true] %s223_s17  ;;  %s246_s28 = int_to_ptr.vmem [resolvable:$true] %s245_s28 }
  0x98   :  { %s7275_s29 = scalar_lea.hbm %s7959_s12, 16 }
  0x99   :  { %p7276_p12 = scmp.ne.s32.totalorder %s7959_s12, %s7275_s29  ;;  %p7279_p13 = scmp.lt.u32.totalorder %s7275_s29, %s7959_s12 }
  0x9b   :  { %p7281_p0 = pnand %p7279_p13, %p7276_p12 }
  0x9d   :  { %7284 = shalt.err (!%p7281_p0)
}
  0x9e   :  { %s7285_s1 = scalar_lea.vmem %s224_s17, 16  ;;  %s7289_s2 = scalar_lea.vmem %s224_s17, 32 }
  0x9f   :  { %p7286_p1 = scmp.ne.s32.totalorder %s224_s17, %s7285_s1  ;;  %p7290_p2 = scmp.lt.s32.totalorder %s224_s17, %s224_s17 }
  0xa0   :  { %p7291_p3 = scmp.lt.s32.totalorder %s7289_s2, %s7285_s1 }
  0xa2   :  { %p7292_p4 = por %p7291_p3, %p7290_p2 }
  0xa4   :  { %p7293_p5 = pnand %p7292_p4, %p7286_p1 }
  0xa6   :  { %7296 = shalt.err (!%p7293_p5)
}
  0xa7   :  { %226 = dma.hbm_to_vmem [thread:$0]  %s7959_s12, 16, %s224_s17, [#allocation20]  }
  0xa8   :  { %s7297_s30 = scalar_lea.hbm %s7969_s27, 16 }
  0xa9   :  { %p7298_p6 = scmp.ne.s32.totalorder %s7969_s27, %s7297_s30  ;;  %p7301_p7 = scmp.lt.u32.totalorder %s7297_s30, %s7969_s27 }
  0xab   :  { %p7303_p8 = pnand %p7301_p7, %p7298_p6 }
  0xad   :  { %7306 = shalt.err (!%p7303_p8)
}
  0xae   :  { %s7307_s11 = scalar_lea.vmem %s246_s28, 16  ;;  %s7311_s15 = scalar_lea.vmem %s246_s28, 32 }
  0xaf   :  { %p7308_p9 = scmp.ne.s32.totalorder %s246_s28, %s7307_s11  ;;  %p7312_p10 = scmp.lt.s32.totalorder %s246_s28, %s246_s28 }
  0xb0   :  { %p7313_p11 = scmp.lt.s32.totalorder %s7311_s15, %s7307_s11 }
  0xb2   :  { %p7314_p12 = por %p7313_p11, %p7312_p10 }
  0xb4   :  { %p7315_p13 = pnand %p7314_p12, %p7308_p9 }
  0xb6   :  { %7318 = shalt.err (!%p7315_p13)
}
  0xb7   :  { %248 = dma.hbm_to_vmem [thread:$0]  %s7969_s27, 16, %s246_s28, [#allocation23]  }
  0xb8   :  { %s7854_s12 = smov [#allocation25]   ;;  %s7855_s18 = smov [#allocation28]  }
  0xb9   :  { %s267_s16 = sshll.u32 %s7854_s12, 4  ;;  %s289_s23 = sshll.u32 %s7855_s18, 4  ;;  %s268_s16 = int_to_ptr.vmem [resolvable:$true] %s267_s16  ;;  %s290_s23 = int_to_ptr.vmem [resolvable:$true] %s289_s23 }
  0xba   :  { %s7319_s26 = scalar_lea.hbm %s7979_s21, 16 }
  0xbb   :  { %p7320_p0 = scmp.ne.s32.totalorder %s7979_s21, %s7319_s26  ;;  %p7323_p1 = scmp.lt.u32.totalorder %s7319_s26, %s7979_s21 }
  0xbd   :  { %p7325_p2 = pnand %p7323_p1, %p7320_p0 }
  0xbf   :  { %7328 = shalt.err (!%p7325_p2)
}
  0xc0   :  { %s7329_s19 = scalar_lea.vmem %s268_s16, 16  ;;  %s7333_s17 = scalar_lea.vmem %s268_s16, 32 }
  0xc1   :  { %p7330_p3 = scmp.ne.s32.totalorder %s268_s16, %s7329_s19  ;;  %p7334_p4 = scmp.lt.s32.totalorder %s268_s16, %s268_s16 }
  0xc2   :  { %p7335_p5 = scmp.lt.s32.totalorder %s7333_s17, %s7329_s19 }
  0xc4   :  { %p7336_p6 = por %p7335_p5, %p7334_p4 }
  0xc6   :  { %p7337_p7 = pnand %p7336_p6, %p7330_p3 }
  0xc8   :  { %7340 = shalt.err (!%p7337_p7)
}
  0xc9   :  { %270 = dma.hbm_to_vmem [thread:$0]  %s7979_s21, 16, %s268_s16, [#allocation26]  }
  0xca   :  { %s7341_s27 = scalar_lea.hbm %s7989_s5, 16 }
  0xcb   :  { %p7342_p8 = scmp.ne.s32.totalorder %s7989_s5, %s7341_s27  ;;  %p7345_p9 = scmp.lt.u32.totalorder %s7341_s27, %s7989_s5 }
  0xcd   :  { %p7347_p10 = pnand %p7345_p9, %p7342_p8 }
  0xcf   :  { %7350 = shalt.err (!%p7347_p10)
}
  0xd0   :  { %s7351_s0 = scalar_lea.vmem %s290_s23, 16  ;;  %s7355_s28 = scalar_lea.vmem %s290_s23, 32 }
  0xd1   :  { %p7352_p11 = scmp.ne.s32.totalorder %s290_s23, %s7351_s0  ;;  %p7356_p12 = scmp.lt.s32.totalorder %s290_s23, %s290_s23 }
  0xd2   :  { %p7357_p13 = scmp.lt.s32.totalorder %s7355_s28, %s7351_s0 }
  0xd4   :  { %p7358_p0 = por %p7357_p13, %p7356_p12 }
  0xd6   :  { %p7359_p1 = pnand %p7358_p0, %p7352_p11 }
  0xd8   :  { %7362 = shalt.err (!%p7359_p1)
}
  0xd9   :  { %292 = dma.hbm_to_vmem [thread:$0]  %s7989_s5, 16, %s290_s23, [#allocation29]  }
  0xda   :  { %s7856_s21 = smov [#allocation31]   ;;  %s7857_s1 = smov [#allocation34]  }
  0xdb   :  { %s311_s29 = sshll.u32 %s7856_s21, 4  ;;  %s333_s2 = sshll.u32 %s7857_s1, 4  ;;  %s312_s29 = int_to_ptr.vmem [resolvable:$true] %s311_s29  ;;  %s334_s2 = int_to_ptr.vmem [resolvable:$true] %s333_s2 }
  0xdc   :  { %s7363_s30 = scalar_lea.hbm %s7999_s20, 16 }
  0xdd   :  { %p7364_p2 = scmp.ne.s32.totalorder %s7999_s20, %s7363_s30  ;;  %p7367_p3 = scmp.lt.u32.totalorder %s7363_s30, %s7999_s20 }
  0xdf   :  { %p7369_p4 = pnand %p7367_p3, %p7364_p2 }
  0xe1   :  { %7372 = shalt.err (!%p7369_p4)
}
  0xe2   :  { %s7373_s11 = scalar_lea.vmem %s312_s29, 16  ;;  %s7377_s15 = scalar_lea.vmem %s312_s29, 32 }
  0xe3   :  { %p7374_p5 = scmp.ne.s32.totalorder %s312_s29, %s7373_s11  ;;  %p7378_p6 = scmp.lt.s32.totalorder %s312_s29, %s312_s29 }
  0xe4   :  { %p7379_p7 = scmp.lt.s32.totalorder %s7377_s15, %s7373_s11 }
  0xe6   :  { %p7380_p8 = por %p7379_p7, %p7378_p6 }
  0xe8   :  { %p7381_p9 = pnand %p7380_p8, %p7374_p5 }
  0xea   :  { %7384 = shalt.err (!%p7381_p9)
}
  0xeb   :  { %314 = dma.hbm_to_vmem [thread:$0]  %s7999_s20, 16, %s312_s29, [#allocation32]  }
  0xec   :  { %s7385_s5 = scalar_lea.hbm %s8009_s6, 16 }
  0xed   :  { %p7386_p10 = scmp.ne.s32.totalorder %s8009_s6, %s7385_s5  ;;  %p7389_p11 = scmp.lt.u32.totalorder %s7385_s5, %s8009_s6 }
  0xef   :  { %p7391_p12 = pnand %p7389_p11, %p7386_p10 }
  0xf1   :  { %7394 = shalt.err (!%p7391_p12)
}
  0xf2   :  { %s7395_s12 = scalar_lea.vmem %s334_s2, 16  ;;  %s7399_s16 = scalar_lea.vmem %s334_s2, 32 }
  0xf3   :  { %p7396_p13 = scmp.ne.s32.totalorder %s334_s2, %s7395_s12  ;;  %p7400_p0 = scmp.lt.s32.totalorder %s334_s2, %s334_s2 }
  0xf4   :  { %p7401_p1 = scmp.lt.s32.totalorder %s7399_s16, %s7395_s12 }
  0xf6   :  { %p7402_p2 = por %p7401_p1, %p7400_p0 }
  0xf8   :  { %p7403_p3 = pnand %p7402_p2, %p7396_p13 }
  0xfa   :  { %7406 = shalt.err (!%p7403_p3)
}
  0xfb   :  { %336 = dma.hbm_to_vmem [thread:$0]  %s8009_s6, 16, %s334_s2, [#allocation35]  }
  0xfc   :  { %s7858_s20 = smov [#allocation37]   ;;  %s7407_s23 = scalar_lea.hbm %s8019_s24, 2048 }
  0xfd   :  { %s354_s18 = sshll.u32 %s7858_s20, 4  ;;  %p7408_p4 = scmp.ne.s32.totalorder %s8019_s24, %s7407_s23  ;;  %s355_s18 = int_to_ptr.vmem [resolvable:$true] %s354_s18 }
  0xfe   :  { %p7411_p5 = scmp.lt.u32.totalorder %s7407_s23, %s8019_s24 }
 0x100   :  { %p7413_p6 = pnand %p7411_p5, %p7408_p4 }
 0x102   :  { %7416 = shalt.err (!%p7413_p6)
}
 0x103   :  { %s7417_s26 = scalar_lea.vmem %s355_s18, 2048  ;;  %p7422_p8 = scmp.lt.s32.totalorder %s355_s18, %s355_s18 }
 0x104   :  { %p7418_p7 = scmp.ne.s32.totalorder %s355_s18, %s7417_s26  ;;  %p7423_p9 = scmp.lt.s32.totalorder %s7417_s26, %s7417_s26 }
 0x106   :  { %p7424_p10 = por %p7423_p9, %p7422_p8 }
 0x108   :  { %p7425_p11 = pnand %p7424_p10, %p7418_p7 }
 0x10a   :  { %7428 = shalt.err (!%p7425_p11)
}
 0x10b   :  { %360 = dma.hbm_to_vmem [thread:$0]  %s8019_s24, 2048, %s355_s18, [#allocation38], %s7844_s7, %s7844_s7, %s7845_s10  }
 0x10c   :  { %s7859_s6 = smov [#allocation40]   ;;  %s7860_s17 = smov [#allocation2]  }
 0x10d   :  { %s376_s19 = sshll.u32 %s7859_s6, 4  ;;  %s92_s27 = sshll.u32 %s7860_s17, 4  ;;  %s377_s19 = int_to_ptr.vmem [resolvable:$true] %s376_s19  ;;  %s8108_s27 = int_to_ptr.vmem [resolvable:$true] %s92_s27 }
 0x10e   :  { %s7429_s0 = scalar_lea.hbm %s8029_s14, 6144 }
 0x10f   :  { %p7430_p12 = scmp.ne.s32.totalorder %s8029_s14, %s7429_s0  ;;  %p7433_p13 = scmp.lt.u32.totalorder %s7429_s0, %s8029_s14 }
 0x111   :  { %p7435_p0 = pnand %p7433_p13, %p7430_p12 }
 0x113   :  { %7438 = shalt.err (!%p7435_p0)
}
 0x114   :  { %s7439_s28 = scalar_lea.vmem %s377_s19, 6144  ;;  %p7444_p2 = scmp.lt.s32.totalorder %s377_s19, %s377_s19 }
 0x115   :  { %p7440_p1 = scmp.ne.s32.totalorder %s377_s19, %s7439_s28  ;;  %p7445_p3 = scmp.lt.s32.totalorder %s7439_s28, %s7439_s28 }
 0x117   :  { %p7446_p4 = por %p7445_p3, %p7444_p2 }
 0x119   :  { %p7447_p5 = pnand %p7446_p4, %p7440_p1 }
 0x11b   :  { %7450 = shalt.err (!%p7447_p5)
}
 0x11c   :  { %s7861_s24 = smov 192   ;;  %s7862_s7 = smov 12  }
 0x11d   :  { %382 = dma.hbm_to_vmem [thread:$0]  %s8029_s14, 6144, %s377_s19, [#allocation41], %s7861_s24, %s7861_s24, %s7862_s7  }
 0x11e   :  { %s7451_s10 = scalar_lea.hbm %s7894_s9, 18432 }
 0x11f   :  { %p7452_p6 = scmp.ne.s32.totalorder %s7894_s9, %s7451_s10  ;;  %p7455_p7 = scmp.lt.u32.totalorder %s7451_s10, %s7894_s9 }
 0x121   :  { %p7457_p8 = pnand %p7455_p7, %p7452_p6 }
 0x123   :  { %7460 = shalt.err (!%p7457_p8)
}
 0x124   :  { %s7461_s21 = scalar_lea.vmem %s8108_s27, 18432  ;;  %p7466_p10 = scmp.lt.s32.totalorder %s8108_s27, %s8108_s27 }
 0x125   :  { %p7462_p9 = scmp.ne.s32.totalorder %s8108_s27, %s7461_s21  ;;  %p7467_p11 = scmp.lt.s32.totalorder %s7461_s21, %s7461_s21 }
 0x127   :  { %p7468_p12 = por %p7467_p11, %p7466_p10 }
 0x129   :  { %p7469_p13 = pnand %p7468_p12, %p7462_p9 }
 0x12b   :  { %7472 = shalt.err (!%p7469_p13)
}
 0x12c   :  { %s8698_s29 = sld [smem:[#allocation63_spill]]  ;;  %s7863_s14 = smov [#allocation6]  }
 0x12d   :  { %98 = dma.hbm_to_vmem [thread:$0]  %s7894_s9, 18432, %s8108_s27, [#allocation3], %s7861_s24, %s7861_s24, %s7862_s7  }
 0x12e   :  { %s120_s1 = sshll.u32 %s7863_s14, 4  ;;  %s7864_s2 = smov [#allocation9]   ;;  %s121_s1 = int_to_ptr.vmem [resolvable:$true] %s120_s1 }
 0x12f   :  { %s142_s30 = sshll.u32 %s7864_s2, 4  ;;  %s8123_s30 = int_to_ptr.vmem [resolvable:$true] %s142_s30 }
 0x132   :  { %s7473_s11 = scalar_lea.hbm %s8698_s29, 2048 }
 0x133   :  { %p7474_p0 = scmp.ne.s32.totalorder %s8698_s29, %s7473_s11  ;;  %p7477_p1 = scmp.lt.u32.totalorder %s7473_s11, %s8698_s29 }
 0x135   :  { %p7479_p2 = pnand %p7477_p1, %p7474_p0 }
 0x137   :  { %7482 = shalt.err (!%p7479_p2)
}
 0x138   :  { %s7483_s15 = scalar_lea.vmem %s121_s1, 2048  ;;  %p7488_p4 = scmp.lt.s32.totalorder %s121_s1, %s121_s1 }
 0x139   :  { %p7484_p3 = scmp.ne.s32.totalorder %s121_s1, %s7483_s15  ;;  %p7489_p5 = scmp.lt.s32.totalorder %s7483_s15, %s7483_s15 }
 0x13b   :  { %p7490_p6 = por %p7489_p5, %p7488_p4 }
 0x13d   :  { %p7491_p7 = pnand %p7490_p6, %p7484_p3 }
 0x13f   :  { %7494 = shalt.err (!%p7491_p7)
}
 0x140   :  { %s8699_s9 = sld [smem:[#allocation64_spill]] }
 0x141   :  { %126 = dma.hbm_to_vmem [thread:$0]  %s8698_s29, 2048, %s121_s1, [#allocation5], %s7850_s22, %s7850_s22, %s7851_s8  }
 0x146   :  { %s7495_s5 = scalar_lea.hbm %s8699_s9, 1024 }
 0x147   :  { %p7496_p8 = scmp.ne.s32.totalorder %s8699_s9, %s7495_s5  ;;  %p7499_p9 = scmp.lt.u32.totalorder %s7495_s5, %s8699_s9 }
 0x149   :  { %p7501_p10 = pnand %p7499_p9, %p7496_p8 }
 0x14b   :  { %7504 = shalt.err (!%p7501_p10)
}
 0x14c   :  { %s7505_s12 = scalar_lea.vmem %s8123_s30, 1024  ;;  %p7510_p12 = scmp.lt.s32.totalorder %s8123_s30, %s8123_s30 }
 0x14d   :  { %p7506_p11 = scmp.ne.s32.totalorder %s8123_s30, %s7505_s12  ;;  %p7511_p13 = scmp.lt.s32.totalorder %s7505_s12, %s7505_s12 }
 0x14f   :  { %p7512_p0 = por %p7511_p13, %p7510_p12 }
 0x151   :  { %p7513_p1 = pnand %p7512_p0, %p7506_p11 }
 0x153   :  { %7516 = shalt.err (!%p7513_p1)
}
 0x154   :  { %s8700_s16 = sld [smem:[#allocation65_spill]]  ;;  %s7865_s20 = smov [#allocation12]  }
 0x155   :  { %148 = dma.hbm_to_vmem [thread:$0]  %s8699_s9, 1024, %s8123_s30, [#allocation8], %s7850_s22, %s7850_s22, %s7851_s8  }
 0x156   :  { %s164_s18 = sshll.u32 %s7865_s20, 4  ;;  %s7866_s23 = smov [#allocation15]   ;;  %s165_s18 = int_to_ptr.vmem [resolvable:$true] %s164_s18 }
 0x157   :  { %s188_s26 = sshll.u32 %s7866_s23, 4  ;;  %s8144_s26 = int_to_ptr.vmem [resolvable:$true] %s188_s26 }
 0x15a   :  { %s7517_s6 = scalar_lea.hbm %s8700_s16, 1024 }
 0x15b   :  { %p7518_p2 = scmp.ne.s32.totalorder %s8700_s16, %s7517_s6  ;;  %p7521_p3 = scmp.lt.u32.totalorder %s7517_s6, %s8700_s16 }
 0x15d   :  { %p7523_p4 = pnand %p7521_p3, %p7518_p2 }
 0x15f   :  { %7526 = shalt.err (!%p7523_p4)
}
 0x160   :  { %s7527_s19 = scalar_lea.vmem %s165_s18, 1024  ;;  %p7532_p6 = scmp.lt.s32.totalorder %s165_s18, %s165_s18 }
 0x161   :  { %p7528_p5 = scmp.ne.s32.totalorder %s165_s18, %s7527_s19  ;;  %p7533_p7 = scmp.lt.s32.totalorder %s7527_s19, %s7527_s19 }
 0x163   :  { %p7534_p8 = por %p7533_p7, %p7532_p6 }
 0x165   :  { %p7535_p9 = pnand %p7534_p8, %p7528_p5 }
 0x167   :  { %7538 = shalt.err (!%p7535_p9)
}
 0x168   :  { %s8701_s17 = sld [smem:[#allocation66_spill]] }
 0x169   :  { %170 = dma.hbm_to_vmem [thread:$0]  %s8700_s16, 1024, %s165_s18, [#allocation11], %s7850_s22, %s7850_s22, %s7851_s8  }
 0x16e   :  { %s7539_s27 = scalar_lea.hbm %s8701_s17, 1024 }
 0x16f   :  { %p7540_p10 = scmp.ne.s32.totalorder %s8701_s17, %s7539_s27  ;;  %p7543_p11 = scmp.lt.u32.totalorder %s7539_s27, %s8701_s17 }
 0x171   :  { %p7545_p12 = pnand %p7543_p11, %p7540_p10 }
 0x173   :  { %7548 = shalt.err (!%p7545_p12)
}
 0x174   :  { %s7549_s0 = scalar_lea.vmem %s8144_s26, 1024  ;;  %p7554_p0 = scmp.lt.s32.totalorder %s8144_s26, %s8144_s26 }
 0x175   :  { %p7550_p13 = scmp.ne.s32.totalorder %s8144_s26, %s7549_s0  ;;  %p7555_p1 = scmp.lt.s32.totalorder %s7549_s0, %s7549_s0 }
 0x177   :  { %p7556_p2 = por %p7555_p1, %p7554_p0 }
 0x179   :  { %p7557_p3 = pnand %p7556_p2, %p7550_p13 }
 0x17b   :  { %7560 = shalt.err (!%p7557_p3)
}
 0x17c   :  { %s8702_s28 = sld [smem:[#allocation67_spill]]  ;;  %s7867_s24 = smov [#allocation18]  }
 0x17d   :  { %194 = dma.hbm_to_vmem [thread:$0]  %s8701_s17, 1024, %s8144_s26, [#allocation14], %s7850_s22, %s7850_s22, %s7851_s8  }
 0x17e   :  { %s210_s7 = sshll.u32 %s7867_s24, 4  ;;  %s7868_s10 = smov [#allocation21]   ;;  %s211_s7 = int_to_ptr.vmem [resolvable:$true] %s210_s7 }
 0x17f   :  { %s232_s21 = sshll.u32 %s7868_s10, 4  ;;  %s8165_s21 = int_to_ptr.vmem [resolvable:$true] %s232_s21 }
 0x182   :  { %s7561_s29 = scalar_lea.hbm %s8702_s28, 1024 }
 0x183   :  { %p7562_p4 = scmp.ne.s32.totalorder %s8702_s28, %s7561_s29  ;;  %p7565_p5 = scmp.lt.u32.totalorder %s7561_s29, %s8702_s28 }
 0x185   :  { %p7567_p6 = pnand %p7565_p5, %p7562_p4 }
 0x187   :  { %7570 = shalt.err (!%p7567_p6)
}
 0x188   :  { %s7571_s14 = scalar_lea.vmem %s211_s7, 1024  ;;  %p7576_p8 = scmp.lt.s32.totalorder %s211_s7, %s211_s7 }
 0x189   :  { %p7572_p7 = scmp.ne.s32.totalorder %s211_s7, %s7571_s14  ;;  %p7577_p9 = scmp.lt.s32.totalorder %s7571_s14, %s7571_s14 }
 0x18b   :  { %p7578_p10 = por %p7577_p9, %p7576_p8 }
 0x18d   :  { %p7579_p11 = pnand %p7578_p10, %p7572_p7 }
 0x18f   :  { %7582 = shalt.err (!%p7579_p11)
}
 0x190   :  { %s8703_s1 = sld [smem:[#allocation68_spill]] }
 0x191   :  { %216 = dma.hbm_to_vmem [thread:$0]  %s8702_s28, 1024, %s211_s7, [#allocation17], %s7850_s22, %s7850_s22, %s7851_s8  }
 0x196   :  { %s7583_s2 = scalar_lea.hbm %s8703_s1, 1024 }
 0x197   :  { %p7584_p12 = scmp.ne.s32.totalorder %s8703_s1, %s7583_s2  ;;  %p7587_p13 = scmp.lt.u32.totalorder %s7583_s2, %s8703_s1 }
 0x199   :  { %p7589_p0 = pnand %p7587_p13, %p7584_p12 }
 0x19b   :  { %7592 = shalt.err (!%p7589_p0)
}
 0x19c   :  { %s7593_s30 = scalar_lea.vmem %s8165_s21, 1024  ;;  %p7598_p2 = scmp.lt.s32.totalorder %s8165_s21, %s8165_s21 }
 0x19d   :  { %p7594_p1 = scmp.ne.s32.totalorder %s8165_s21, %s7593_s30  ;;  %p7599_p3 = scmp.lt.s32.totalorder %s7593_s30, %s7593_s30 }
 0x19f   :  { %p7600_p4 = por %p7599_p3, %p7598_p2 }
 0x1a1   :  { %p7601_p5 = pnand %p7600_p4, %p7594_p1 }
 0x1a3   :  { %7604 = shalt.err (!%p7601_p5)
}
 0x1a4   :  { %s8704_s11 = sld [smem:[#allocation69_spill]]  ;;  %s7869_s15 = smov [#allocation24]  }
 0x1a5   :  { %238 = dma.hbm_to_vmem [thread:$0]  %s8703_s1, 1024, %s8165_s21, [#allocation20], %s7850_s22, %s7850_s22, %s7851_s8  }
 0x1a6   :  { %s254_s9 = sshll.u32 %s7869_s15, 4  ;;  %s7870_s5 = smov [#allocation27]   ;;  %s255_s9 = int_to_ptr.vmem [resolvable:$true] %s254_s9 }
 0x1a7   :  { %s276_s12 = sshll.u32 %s7870_s5, 4  ;;  %s8186_s12 = int_to_ptr.vmem [resolvable:$true] %s276_s12 }
 0x1aa   :  { %s7605_s16 = scalar_lea.hbm %s8704_s11, 1024 }
 0x1ab   :  { %p7606_p6 = scmp.ne.s32.totalorder %s8704_s11, %s7605_s16  ;;  %p7609_p7 = scmp.lt.u32.totalorder %s7605_s16, %s8704_s11 }
 0x1ad   :  { %p7611_p8 = pnand %p7609_p7, %p7606_p6 }
 0x1af   :  { %7614 = shalt.err (!%p7611_p8)
}
 0x1b0   :  { %s7615_s20 = scalar_lea.vmem %s255_s9, 1024  ;;  %p7620_p10 = scmp.lt.s32.totalorder %s255_s9, %s255_s9 }
 0x1b1   :  { %p7616_p9 = scmp.ne.s32.totalorder %s255_s9, %s7615_s20  ;;  %p7621_p11 = scmp.lt.s32.totalorder %s7615_s20, %s7615_s20 }
 0x1b3   :  { %p7622_p12 = por %p7621_p11, %p7620_p10 }
 0x1b5   :  { %p7623_p13 = pnand %p7622_p12, %p7616_p9 }
 0x1b7   :  { %7626 = shalt.err (!%p7623_p13)
}
 0x1b8   :  { %s8705_s18 = sld [smem:[#allocation70_spill]] }
 0x1b9   :  { %260 = dma.hbm_to_vmem [thread:$0]  %s8704_s11, 1024, %s255_s9, [#allocation23], %s7850_s22, %s7850_s22, %s7851_s8  }
 0x1be   :  { %s7627_s23 = scalar_lea.hbm %s8705_s18, 1024 }
 0x1bf   :  { %p7628_p0 = scmp.ne.s32.totalorder %s8705_s18, %s7627_s23  ;;  %p7631_p1 = scmp.lt.u32.totalorder %s7627_s23, %s8705_s18 }
 0x1c1   :  { %p7633_p2 = pnand %p7631_p1, %p7628_p0 }
 0x1c3   :  { %7636 = shalt.err (!%p7633_p2)
}
 0x1c4   :  { %s7637_s26 = scalar_lea.vmem %s8186_s12, 1024  ;;  %p7642_p4 = scmp.lt.s32.totalorder %s8186_s12, %s8186_s12 }
 0x1c5   :  { %p7638_p3 = scmp.ne.s32.totalorder %s8186_s12, %s7637_s26  ;;  %p7643_p5 = scmp.lt.s32.totalorder %s7637_s26, %s7637_s26 }
 0x1c7   :  { %p7644_p6 = por %p7643_p5, %p7642_p4 }
 0x1c9   :  { %p7645_p7 = pnand %p7644_p6, %p7638_p3 }
 0x1cb   :  { %7648 = shalt.err (!%p7645_p7)
}
 0x1cc   :  { %s8706_s6 = sld [smem:[#allocation71_spill]]  ;;  %s7871_s19 = smov [#allocation30]  }
 0x1cd   :  { %282 = dma.hbm_to_vmem [thread:$0]  %s8705_s18, 1024, %s8186_s12, [#allocation26], %s7850_s22, %s7850_s22, %s7851_s8  }
 0x1ce   :  { %s298_s17 = sshll.u32 %s7871_s19, 4  ;;  %s7872_s27 = smov [#allocation33]   ;;  %s299_s17 = int_to_ptr.vmem [resolvable:$true] %s298_s17 }
 0x1cf   :  { %s320_s0 = sshll.u32 %s7872_s27, 4  ;;  %s8207_s0 = int_to_ptr.vmem [resolvable:$true] %s320_s0 }
 0x1d2   :  { %s7649_s28 = scalar_lea.hbm %s8706_s6, 1024 }
 0x1d3   :  { %p7650_p8 = scmp.ne.s32.totalorder %s8706_s6, %s7649_s28  ;;  %p7653_p9 = scmp.lt.u32.totalorder %s7649_s28, %s8706_s6 }
 0x1d5   :  { %p7655_p10 = pnand %p7653_p9, %p7650_p8 }
 0x1d7   :  { %7658 = shalt.err (!%p7655_p10)
}
 0x1d8   :  { %s7659_s24 = scalar_lea.vmem %s299_s17, 1024  ;;  %p7664_p12 = scmp.lt.s32.totalorder %s299_s17, %s299_s17 }
 0x1d9   :  { %p7660_p11 = scmp.ne.s32.totalorder %s299_s17, %s7659_s24  ;;  %p7665_p13 = scmp.lt.s32.totalorder %s7659_s24, %s7659_s24 }
 0x1db   :  { %p7666_p0 = por %p7665_p13, %p7664_p12 }
 0x1dd   :  { %p7667_p1 = pnand %p7666_p0, %p7660_p11 }
 0x1df   :  { %7670 = shalt.err (!%p7667_p1)
}
 0x1e0   :  { %s8707_s7 = sld [smem:[#allocation72_spill]] }
 0x1e1   :  { %304 = dma.hbm_to_vmem [thread:$0]  %s8706_s6, 1024, %s299_s17, [#allocation29], %s7850_s22, %s7850_s22, %s7851_s8  }
 0x1e6   :  { %s7671_s10 = scalar_lea.hbm %s8707_s7, 1024 }
 0x1e7   :  { %p7672_p2 = scmp.ne.s32.totalorder %s8707_s7, %s7671_s10  ;;  %p7675_p3 = scmp.lt.u32.totalorder %s7671_s10, %s8707_s7 }
 0x1e9   :  { %p7677_p4 = pnand %p7675_p3, %p7672_p2 }
 0x1eb   :  { %7680 = shalt.err (!%p7677_p4)
}
 0x1ec   :  { %s7681_s21 = scalar_lea.vmem %s8207_s0, 1024  ;;  %p7686_p6 = scmp.lt.s32.totalorder %s8207_s0, %s8207_s0 }
 0x1ed   :  { %p7682_p5 = scmp.ne.s32.totalorder %s8207_s0, %s7681_s21  ;;  %p7687_p7 = scmp.lt.s32.totalorder %s7681_s21, %s7681_s21 }
 0x1ef   :  { %p7688_p8 = por %p7687_p7, %p7686_p6 }
 0x1f1   :  { %p7689_p9 = pnand %p7688_p8, %p7682_p5 }
 0x1f3   :  { %7692 = shalt.err (!%p7689_p9)
}
 0x1f4   :  { %s8708_s29 = sld [smem:[#allocation73_spill]]  ;;  %s7873_s14 = smov [#allocation36]  }
 0x1f5   :  { %326 = dma.hbm_to_vmem [thread:$0]  %s8707_s7, 1024, %s8207_s0, [#allocation32], %s7850_s22, %s7850_s22, %s7851_s8  }
 0x1f6   :  { %s342_s1 = sshll.u32 %s7873_s14, 4  ;;  %s7874_s2 = smov [#allocation39]   ;;  %s343_s1 = int_to_ptr.vmem [resolvable:$true] %s342_s1 }
 0x1f7   :  { %s367_s30 = sshll.u32 %s7874_s2, 4  ;;  %s368_s30 = int_to_ptr.vmem [resolvable:$true] %s367_s30 }
 0x1fa   :  { %s7693_s11 = scalar_lea.hbm %s8708_s29, 1024 }
 0x1fb   :  { %p7694_p10 = scmp.ne.s32.totalorder %s8708_s29, %s7693_s11  ;;  %p7697_p11 = scmp.lt.u32.totalorder %s7693_s11, %s8708_s29 }
 0x1fd   :  { %p7699_p12 = pnand %p7697_p11, %p7694_p10 }
 0x1ff   :  { %7702 = shalt.err (!%p7699_p12)
}
 0x200   :  { %s7703_s15 = scalar_lea.vmem %s343_s1, 1024  ;;  %p7708_p0 = scmp.lt.s32.totalorder %s343_s1, %s343_s1 }
 0x201   :  { %p7704_p13 = scmp.ne.s32.totalorder %s343_s1, %s7703_s15  ;;  %p7709_p1 = scmp.lt.s32.totalorder %s7703_s15, %s7703_s15 }
 0x203   :  { %p7710_p2 = por %p7709_p1, %p7708_p0 }
 0x205   :  { %p7711_p3 = pnand %p7710_p2, %p7704_p13 }
 0x207   :  { %7714 = shalt.err (!%p7711_p3)
}
 0x208   :  { %s8709_s9 = sld [smem:[#allocation74_spill]] }
 0x209   :  { %348 = dma.hbm_to_vmem [thread:$0]  %s8708_s29, 1024, %s343_s1, [#allocation35], %s7850_s22, %s7850_s22, %s7851_s8  }
 0x20e   :  { %s7715_s5 = scalar_lea.hbm %s8709_s9, 32 }
 0x20f   :  { %p7716_p4 = scmp.ne.s32.totalorder %s8709_s9, %s7715_s5  ;;  %p7719_p5 = scmp.lt.u32.totalorder %s7715_s5, %s8709_s9 }
 0x211   :  { %p7721_p6 = pnand %p7719_p5, %p7716_p4 }
 0x213   :  { %7724 = shalt.err (!%p7721_p6)
}
 0x214   :  { %s7725_s12 = scalar_lea.vmem %s368_s30, 32  ;;  %p7730_p8 = scmp.lt.s32.totalorder %s368_s30, %s368_s30 }
 0x215   :  { %p7726_p7 = scmp.ne.s32.totalorder %s368_s30, %s7725_s12  ;;  %p7731_p9 = scmp.lt.s32.totalorder %s7725_s12, %s7725_s12 }
 0x217   :  { %p7732_p10 = por %p7731_p9, %p7730_p8 }
 0x219   :  { %p7733_p11 = pnand %p7732_p10, %p7726_p7 }
 0x21b   :  { %7736 = shalt.err (!%p7733_p11)
}
 0x21c   :  { %370 = dma.hbm_to_vmem [thread:$0]  %s8709_s9, 32, %s368_s30, [#allocation38]  }
 0x21d   :  { %s7875_s16 = smov [#allocation42]   ;;  %s7876_s22 = smov [#allocation43]  }
 0x21e   :  { %s389_s20 = sshll.u32 %s7875_s16, 4  ;;  %s401_s8 = sshll.u32 %s7876_s22, 4  ;;  %s390_s20 = int_to_ptr.vmem [resolvable:$true] %s389_s20  ;;  %s402_s8 = int_to_ptr.vmem [resolvable:$true] %s401_s8 }
 0x21f   :  { %s7737_s18 = scalar_lea.hbm %s8034_s4, 48 }
 0x220   :  { %p7738_p12 = scmp.ne.s32.totalorder %s8034_s4, %s7737_s18  ;;  %p7741_p13 = scmp.lt.u32.totalorder %s7737_s18, %s8034_s4 }
 0x222   :  { %p7743_p0 = pnand %p7741_p13, %p7738_p12 }
 0x224   :  { %7746 = shalt.err (!%p7743_p0)
}
 0x225   :  { %s7747_s23 = scalar_lea.vmem %s390_s20, 48  ;;  %s7751_s26 = scalar_lea.vmem %s390_s20, 64 }
 0x226   :  { %p7748_p1 = scmp.ne.s32.totalorder %s390_s20, %s7747_s23  ;;  %p7752_p2 = scmp.lt.s32.totalorder %s390_s20, %s390_s20 }
 0x227   :  { %p7753_p3 = scmp.lt.s32.totalorder %s7751_s26, %s7747_s23 }
 0x229   :  { %p7754_p4 = por %p7753_p3, %p7752_p2 }
 0x22b   :  { %p7755_p5 = pnand %p7754_p4, %p7748_p1 }
 0x22d   :  { %7758 = shalt.err (!%p7755_p5)
}
 0x22e   :  { %392 = dma.hbm_to_vmem [thread:$0]  %s8034_s4, 48, %s390_s20, [#allocation41]  }
 0x22f   :  { %s7759_s6 = scalar_lea.hbm %s8044_s13, 96 }
 0x230   :  { %p7760_p6 = scmp.ne.s32.totalorder %s8044_s13, %s7759_s6  ;;  %p7763_p7 = scmp.lt.u32.totalorder %s7759_s6, %s8044_s13 }
 0x232   :  { %p7765_p8 = pnand %p7763_p7, %p7760_p6 }
 0x234   :  { %7768 = shalt.err (!%p7765_p8)
}
 0x235   :  { %s7769_s19 = scalar_lea.vmem %s402_s8, 96  ;;  %p7774_p10 = scmp.lt.s32.totalorder %s402_s8, %s402_s8 }
 0x236   :  { %p7770_p9 = scmp.ne.s32.totalorder %s402_s8, %s7769_s19  ;;  %p7775_p11 = scmp.lt.s32.totalorder %s7769_s19, %s7769_s19 }
 0x238   :  { %p7776_p12 = por %p7775_p11, %p7774_p10 }
 0x23a   :  { %p7777_p13 = pnand %p7776_p12, %p7770_p9 }
 0x23c   :  { %7780 = shalt.err (!%p7777_p13)
}
 0x23d   :  { %404 = dma.hbm_to_vmem [thread:$0]  %s8044_s13, 96, %s402_s8, [#allocation44]  }
 0x23e   :  { %7781 = dma.done.wait [#allocation3], 18432  }
 0x23f   :  { %7782 = vsyncadd [#allocation3], 4294948864 }
 0x240   :  { %7783 = dma.done.wait [#allocation5], 8192  }
 0x241   :  { %7784 = vsyncadd [#allocation5], 4294959104 }
 0x242   :  { %7785 = dma.done.wait [#allocation8], 1040  }
 0x243   :  { %7786 = vsyncadd [#allocation8], 4294966256 }
 0x244   :  { %7787 = dma.done.wait [#allocation11], 1040  }
 0x245   :  { %7788 = vsyncadd [#allocation11], 4294966256 }
 0x246   :  { %7789 = dma.done.wait [#allocation14], 2048  }
 0x247   :  { %7790 = vsyncadd [#allocation14], 4294965248 }
 0x248   :  { %7791 = dma.done.wait [#allocation17], 1040  }
 0x249   :  { %7792 = vsyncadd [#allocation17], 4294966256 }
 0x24a   :  { %7793 = dma.done.wait [#allocation20], 1040  }
 0x24b   :  { %7794 = vsyncadd [#allocation20], 4294966256 }
 0x24c   :  { %7795 = dma.done.wait [#allocation23], 1040  }
 0x24d   :  { %7796 = vsyncadd [#allocation23], 4294966256 }
 0x24e   :  { %7797 = dma.done.wait [#allocation26], 1040  }
 0x24f   :  { %7798 = vsyncadd [#allocation26], 4294966256 }
 0x250   :  { %7799 = dma.done.wait [#allocation29], 1040  }
 0x251   :  { %7800 = vsyncadd [#allocation29], 4294966256 }
 0x252   :  { %7801 = dma.done.wait [#allocation32], 1040  }
 0x253   :  { %7802 = vsyncadd [#allocation32], 4294966256 }
 0x254   :  { %7803 = dma.done.wait [#allocation35], 1040  }
 0x255   :  { %7804 = vsyncadd [#allocation35], 4294966256 }
 0x256   :  { %7805 = dma.done.wait [#allocation38], 2080  }
 0x257   :  { %7806 = vsyncadd [#allocation38], 4294965216 }
 0x258   :  { %7807 = dma.done.wait [#allocation41], 6192  }
 0x259   :  { %7808 = vsyncadd [#allocation41], 4294961104 }
 0x25a   :  { %7809 = dma.done.wait [#allocation44], 96  }
 0x25b   :  { %7810 = vsyncadd [#allocation44], 4294967200  ;;  %v6484_v0 = vld [vmem:[#allocation2 + $0x4] ss:$12 sps:$4 sm:$0xff]   ;;  %v6486_v1 = vld [vmem:[#allocation2] ss:$12 sps:$4 sm:$0xff]   ;;  %v498_v9 = vlaneseq }
 0x25c   :  { %1508 = vmatprep.subr.bf16.mxu0 %v6484_v0  ;;  %v6487_v2 = vld [vmem:[#allocation2 + $0x1c] ss:$12 sps:$4 sm:$0xff]   ;;  %v6489_v3 = vld [vmem:[#allocation2 + $0x18] ss:$12 sps:$4 sm:$0xff]   ;;  %v6490_v4 = vld [vmem:[#allocation2 + $0x34] ss:$12 sps:$4 sm:$0xff]  }
 0x25d   :  { %1509 = vmatpush1.bf16.msra.mxu0 %v6486_v1  ;;  %v6492_v5 = vld [vmem:[#allocation2 + $0x30] ss:$12 sps:$4 sm:$0xff]   ;;  %v6493_v6 = vld [vmem:[#allocation2 + $0x4c] ss:$12 sps:$4 sm:$0xff]   ;;  %v7877_v7 = vmov 1983009808  }
 0x25e   :  { %1510 = vmatprep.subr.bf16.mxu0 %v6487_v2  ;;  %v496_v8 = vunpack.c.l.s4 %v7877_v7  ;;  %s8710_s13 = sld [smem:[#allocation60_spill]]  ;;  %v6495_v10 = vld [vmem:[#allocation2 + $0x48] ss:$12 sps:$4 sm:$0xff]   ;;  %v6496_v11 = vld [vmem:[#allocation2 + $0x64] ss:$12 sps:$4 sm:$0xff]   ;;  %v8247_v13 = vshrl.u32 %v498_v9, 7 }
 0x25f   :  { %v6498_v14 = vld [vmem:[#allocation2 + $0x60] ss:$12 sps:$4 sm:$0xff]   ;;  %v6499_v15 = vld [vmem:[#allocation2 + $0x7c] ss:$12 sps:$4 sm:$0xff]   ;;  %v6501_v17 = vld [vmem:[#allocation2 + $0x78] ss:$12 sps:$4 sm:$0xff]  }
 0x260   :  { %v497_v12 = vunpack.c.0.s8 %v496_v8  ;;  %v6502_v18 = vld [vmem:[#allocation2 + $0x94] ss:$12 sps:$4 sm:$0xff]   ;;  %v6504_v22 = vld [vmem:[#allocation2 + $0x90] ss:$12 sps:$4 sm:$0xff]   ;;  %v6505_v23 = vld [vmem:[#allocation2 + $0xac] ss:$12 sps:$4 sm:$0xff]  }
 0x261   :  { %1511 = vmatpush1.bf16.msra.mxu0 %v6489_v3  ;;  %v6507_v28 = vld [vmem:[#allocation2 + $0xa8] ss:$12 sps:$4 sm:$0xff]   ;;  %v6508_v29 = vld [vmem:[#allocation2 + $0xc4] ss:$12 sps:$4 sm:$0xff]   ;;  %v6510_v31 = vld [vmem:[#allocation2 + $0xc0] ss:$12 sps:$4 sm:$0xff]  }
 0x262   :  { %1512 = vmatprep.subr.bf16.mxu0 %v6490_v4  ;;  %v8250_v16 = vsub.s32 %v497_v12, %v8247_v13  ;;  %v6511_v32 = vld [vmem:[#allocation2 + $0xdc] ss:$12 sps:$4 sm:$0xff]   ;;  %v6513_v33 = vld [vmem:[#allocation2 + $0xd8] ss:$12 sps:$4 sm:$0xff]   ;;  %v6514_v34 = vld [vmem:[#allocation2 + $0xf4] ss:$12 sps:$4 sm:$0xff]  }
 0x263   :  { %v6516_v35 = vld [vmem:[#allocation2 + $0xf0] ss:$12 sps:$4 sm:$0xff]   ;;  %v6517_v36 = vld [vmem:[#allocation2 + $0x10c] ss:$12 sps:$4 sm:$0xff]   ;;  %v6519_v37 = vld [vmem:[#allocation2 + $0x108] ss:$12 sps:$4 sm:$0xff]  }
 0x264   :  { %v490_v19 = vld [vmem:[%s8710_s13] sm:$0xff]  ;;  %v6523_v40 = vld [vmem:[#allocation2 + $0x13c] ss:$12 sps:$4 sm:$0xff]   ;;  %v6529_v44 = vld [vmem:[#allocation2 + $0x16c] ss:$12 sps:$4 sm:$0xff]   ;;  %s8711_s4 = sld [smem:[#allocation61_spill]] }
 0x265   :  { %1513 = vmatpush1.bf16.msra.mxu0 %v6492_v5  ;;  %v494_v20 = vcombine.high %v490_v19, %v490_v19  ;;  %v501_v21 = vrot.slane %v490_v19, %v8250_v16  ;;  %v6520_v38 = vld [vmem:[#allocation2 + $0x124] ss:$12 sps:$4 sm:$0xff]   ;;  %v6522_v39 = vld [vmem:[#allocation2 + $0x120] ss:$12 sps:$4 sm:$0xff]   ;;  %v6608_v45 = vld [vmem:[#allocation2 + $0x248] ss:$12 sps:$4 sm:$0xff]  }
 0x266   :  { %1514 = vmatprep.subr.bf16.mxu0 %v6493_v6  ;;  %v6525_v41 = vld [vmem:[#allocation2 + $0x138] ss:$12 sps:$4 sm:$0xff]   ;;  %v6526_v42 = vld [vmem:[#allocation2 + $0x154] ss:$12 sps:$4 sm:$0xff]   ;;  %v6528_v43 = vld [vmem:[#allocation2 + $0x150] ss:$12 sps:$4 sm:$0xff]   ;;  %5944 = vmatprep.subr.bf16.mxu1 %v6608_v45 }
 0x267   :  { %v509_v24 = vcombine.high %v501_v21, %v501_v21  ;;  %v8255_v25 = vrot.slane %v494_v20, %v8250_v16  ;;  %v6609_v46 = vld [vmem:[#allocation2 + $0x188] ss:$12 sps:$4 sm:$0xff]   ;;  %v6535_v48 = vld [vmem:[#allocation2 + $0x184] ss:$12 sps:$4 sm:$0xff]   ;;  %v6613_v49 = vld [vmem:[#allocation2 + $0x260] ss:$12 sps:$4 sm:$0xff]   ;;  %v8262_v52 = vpack.c.bf16 %v501_v21, %v501_v21 }
 0x268   :  { %v6531_v47 = vld [vmem:[#allocation2 + $0x168] ss:$12 sps:$4 sm:$0xff]   ;;  %5945 = vmatpush3.bf16.msra.mxu1 %v6609_v46  ;;  %v6614_v50 = vld [vmem:[#allocation2 + $0x1a0] ss:$12 sps:$4 sm:$0xff]   ;;  %v6618_v53 = vld [vmem:[#allocation2 + $0x278] ss:$12 sps:$4 sm:$0xff]  }
 0x269   :  { %1515 = vmatpush1.bf16.msra.mxu0 %v6495_v10  ;;  %v8257_v26 = vpack.c.bf16 %v509_v24, %v509_v24  ;;  %v510_v27 = vcombine.high %v8255_v25, %v8255_v25  ;;  %v6533_v51 = vld [vmem:[#allocation2 + $0x180] ss:$12 sps:$4 sm:$0xff]   ;;  %5946 = vmatprep.subr.bf16.mxu1 %v6613_v49  ;;  %v6619_v54 = vld [vmem:[#allocation2 + $0x1b8] ss:$12 sps:$4 sm:$0xff]   ;;  %v6538_v55 = vld [vmem:[#allocation2 + $0x19c] ss:$12 sps:$4 sm:$0xff]   ;;  %v8272_v19 = vpack.c.bf16 %v8255_v25, %v8255_v25 }
 0x26a   :  { %1516 = vmatprep.subr.bf16.mxu0 %v6496_v11  ;;  %v6623_v56 = vld [vmem:[#allocation2 + $0x290] ss:$12 sps:$4 sm:$0xff]   ;;  %v6536_v58 = vld [vmem:[#allocation2 + $0x198] ss:$12 sps:$4 sm:$0xff]   ;;  %v6541_v59 = vld [vmem:[#allocation2 + $0x1b4] ss:$12 sps:$4 sm:$0xff]  }
 0x26b   :  { %1540 = vmatprep.mubr.bf16.mxu0 %v8257_v26  ;;  %v528_v30 = vpack.c.bf16 %v510_v27, %v510_v27  ;;  %v6624_v57 = vld [vmem:[#allocation2 + $0x1d0] ss:$12 sps:$4 sm:$0xff]   ;;  %v6628_v60 = vld [vmem:[#allocation2 + $0x2a8] ss:$12 sps:$4 sm:$0xff]   ;;  %v6544_v63 = vld [vmem:[#allocation2 + $0x1cc] ss:$12 sps:$4 sm:$0xff]  }
 0x26c   :  { %5947 = vmatpush3.bf16.msra.mxu1 %v6614_v50  ;;  %v6629_v61 = vld [vmem:[#allocation2 + $0x1e8] ss:$12 sps:$4 sm:$0xff]   ;;  %v6539_v62 = vld [vmem:[#allocation2 + $0x1b0] ss:$12 sps:$4 sm:$0xff]   ;;  %v6633_v0 = vld [vmem:[#allocation2 + $0x2c0] ss:$12 sps:$4 sm:$0xff]  }
 0x26d   :  { %1517 = vmatpush1.bf16.msra.mxu0 %v6498_v14  ;;  %1703 = vmatprep.mubr.bf16.mxu1 %v528_v30  ;;  %v6542_v1 = vld [vmem:[#allocation2 + $0x1c8] ss:$12 sps:$4 sm:$0xff]   ;;  %v6634_v2 = vld [vmem:[#allocation2 + $0x200] ss:$12 sps:$4 sm:$0xff]   ;;  %v6638_v3 = vld [vmem:[#allocation2 + $0x2d8] ss:$12 sps:$4 sm:$0xff]  }
 0x26e   :  { %1518 = vmatprep.subr.bf16.mxu0 %v6499_v15  ;;  %5948 = vmatprep.subr.bf16.mxu1 %v6618_v53  ;;  %v6547_v4 = vld [vmem:[#allocation2 + $0x1e4] ss:$12 sps:$4 sm:$0xff]   ;;  %v6545_v5 = vld [vmem:[#allocation2 + $0x1e0] ss:$12 sps:$4 sm:$0xff]   ;;  %v6550_v8 = vld [vmem:[#allocation2 + $0x1fc] ss:$12 sps:$4 sm:$0xff]  }
 0x26f   :  { %v6639_v6 = vld [vmem:[#allocation2 + $0x218] ss:$12 sps:$4 sm:$0xff]   ;;  %v6643_v7 = vld [vmem:[#allocation2 + $0x2f0] ss:$12 sps:$4 sm:$0xff]   ;;  %v6647_v12 = vld [vmem:[#allocation2 + $0x3c8] ss:$12 sps:$4 sm:$0xff]  }
 0x270   :  { %5949 = vmatpush3.bf16.msra.mxu1 %v6619_v54  ;;  %v8266_v9 = vld.sshfl [vmem:[%s8710_s13 + $0x8] sm:$0x33 pattern:$0x76325410]  ;;  %v6548_v10 = vld [vmem:[#allocation2 + $0x1f8] ss:$12 sps:$4 sm:$0xff]  }
 0x271   :  { %1519 = vmatpush1.bf16.msra.mxu0 %v6501_v17  ;;  %5950 = vmatprep.subr.bf16.mxu1 %v6623_v56  ;;  %v6644_v11 = vld [vmem:[#allocation2 + $0x230] ss:$12 sps:$4 sm:$0xff]   ;;  %v6553_v14 = vld [vmem:[#allocation2 + $0x214] ss:$12 sps:$4 sm:$0xff]   ;;  %v518_v15 = vcombine.high %v8266_v9, %v8266_v9  ;;  %v6556_v21 = vld [vmem:[#allocation2 + $0x22c] ss:$12 sps:$4 sm:$0xff]  }
 0x272   :  { %1520 = vmatprep.subr.bf16.mxu0 %v6502_v18  ;;  %v6551_v17 = vld [vmem:[#allocation2 + $0x210] ss:$12 sps:$4 sm:$0xff]   ;;  %v6648_v18 = vld [vmem:[#allocation2 + $0x308] ss:$12 sps:$4 sm:$0xff]   ;;  %v6651_v20 = vld [vmem:[#allocation2 + $0x3e0] ss:$12 sps:$4 sm:$0xff]  }
 0x273   :  { %v6652_v24 = vld [vmem:[#allocation2 + $0x320] ss:$12 sps:$4 sm:$0xff]   ;;  %v6655_v27 = vld [vmem:[#allocation2 + $0x3f8] ss:$12 sps:$4 sm:$0xff]   ;;  %v6675_v46 = vld [vmem:[#allocation2 + $0x470] ss:$12 sps:$4 sm:$0xff]  }
 0x274   :  { %5951 = vmatpush3.bf16.msra.mxu1 %v6624_v57  ;;  %v6557_v25 = vld [vmem:[#allocation2 + $0x240] ss:$12 sps:$4 sm:$0xff]   ;;  %v6672_v45 = vld [vmem:[#allocation2 + $0x398] ss:$12 sps:$4 sm:$0xff]   ;;  %v6575_v54 = vld [vmem:[#allocation2 + $0x2d0] ss:$12 sps:$4 sm:$0xff]  }
 0x275   :  { %1521 = vmatpush1.bf16.msra.mxu0 %v6504_v22  ;;  %5952 = vmatprep.subr.bf16.mxu1 %v6628_v60  ;;  %v8274_v22 = vpack.c.bf16 %v518_v15, %v518_v15  ;;  %v6572_v49 = vld [vmem:[#allocation2 + $0x2b8] ss:$12 sps:$4 sm:$0xff]   ;;  %v6677_v53 = vld [vmem:[#allocation4] ss:$8 sps:$4 sm:$0xff]   ;;  %v6682_v56 = vld [vmem:[#allocation4 + $0x14] ss:$8 sps:$4 sm:$0xff]  }
 0x276   :  { %1522 = vmatprep.subr.bf16.mxu0 %v6505_v23  ;;  %v6554_v23 = vld [vmem:[#allocation2 + $0x228] ss:$12 sps:$4 sm:$0xff]   ;;  %v6679_v50 = vld [vmem:[#allocation4 + $0x4] ss:$8 sps:$4 sm:$0xff]   ;;  %s8712_s17 = sld [smem:[#allocation62_spill]]  ;;  %vm7880_vm0 = vmmov 0  }
 0x277   :  { %v6580_v57 = vld [vmem:[#allocation2 + $0x2ec] ss:$12 sps:$4 sm:$0xff]   ;;  %v6695_v15 = vld [vmem:[#allocation4 + $0x60] ss:$8 sps:$4 sm:$0xff]  }
 0x278   :  { %5953 = vmatpush3.bf16.msra.mxu1 %v6629_v61  ;;  %v6685_v60 = vld [vmem:[#allocation4 + $0x24] ss:$8 sps:$4 sm:$0xff]  }
 0x279   :  { %1523 = vmatpush1.bf16.msra.mxu0 %v6507_v28  ;;  %5954 = vmatprep.subr.bf16.mxu1 %v6633_v0  ;;  %v6559_v28 = vld [vmem:[#allocation2 + $0x244] ss:$12 sps:$4 sm:$0xff]   ;;  %v6586_v0 = vld [vmem:[#allocation2 + $0x31c] ss:$12 sps:$4 sm:$0xff]  }
 0x27a   :  { %1524 = vmatprep.subr.bf16.mxu0 %v6508_v29  ;;  %v6656_v29 = vld [vmem:[#allocation2 + $0x338] ss:$12 sps:$4 sm:$0xff]  }
 0x27b   :  { %v6583_v61 = vld [vmem:[#allocation2 + $0x304] ss:$12 sps:$4 sm:$0xff]  }
 0x27c   :  { %5955 = vmatpush3.bf16.msra.mxu1 %v6634_v2  ;;  %v6686_v2 = vld [vmem:[#allocation4 + $0x30] ss:$8 sps:$4 sm:$0xff]  }
 0x27d   :  { %1525 = vmatpush1.bf16.msra.mxu0 %v6510_v31  ;;  %5956 = vmatprep.subr.bf16.mxu1 %v6638_v3  ;;  %v6562_v31 = vld [vmem:[#allocation2 + $0x25c] ss:$12 sps:$4 sm:$0xff]   ;;  %v6584_v3 = vld [vmem:[#allocation2 + $0x318] ss:$12 sps:$4 sm:$0xff]  }
 0x27e   :  { %1526 = vmatprep.subr.bf16.mxu0 %v6511_v32  ;;  %v6560_v32 = vld [vmem:[#allocation2 + $0x258] ss:$12 sps:$4 sm:$0xff]  }
 0x280   :  { %5957 = vmatpush3.bf16.msra.mxu1 %v6639_v6  ;;  %v6689_v6 = vld [vmem:[#allocation4 + $0x40] ss:$8 sps:$4 sm:$0xff]  }
 0x281   :  { %1527 = vmatpush1.bf16.msra.mxu0 %v6513_v33  ;;  %5958 = vmatprep.subr.bf16.mxu1 %v6643_v7  ;;  %v6660_v33 = vld [vmem:[#allocation2 + $0x350] ss:$12 sps:$4 sm:$0xff]  }
 0x282   :  { %1528 = vmatprep.subr.bf16.mxu0 %v6514_v34  ;;  %v6663_v34 = vld [vmem:[#allocation2 + $0x428] ss:$12 sps:$4 sm:$0xff]   ;;  %v6587_v7 = vld [vmem:[#allocation2 + $0x330] ss:$12 sps:$4 sm:$0xff]  }
 0x284   :  { %5959 = vmatpush3.bf16.msra.mxu1 %v6644_v11  ;;  %v6590_v11 = vld [vmem:[#allocation2 + $0x348] ss:$12 sps:$4 sm:$0xff]  }
 0x285   :  { %1529 = vmatpush1.bf16.msra.mxu0 %v6516_v35  ;;  %5966 = vmatprep.subr.bf16.mxu1 %v6647_v12  ;;  %v6565_v35 = vld [vmem:[#allocation2 + $0x274] ss:$12 sps:$4 sm:$0xff]   ;;  %v6697_v12 = vld [vmem:[#allocation4 + $0x64] ss:$8 sps:$4 sm:$0xff]  }
 0x286   :  { %1530 = vmatprep.subr.bf16.mxu0 %v6517_v36  ;;  %v6563_v36 = vld [vmem:[#allocation2 + $0x270] ss:$12 sps:$4 sm:$0xff]  }
 0x287   :  { %1704 = vmatmul.mubr.bf16.vlgmr.msra.gmra.mrb[0].mxu1 %v8272_v19 }
 0x288   :  { %5967 = vmatpush3.bf16.msra.mxu1 %v6648_v18  ;;  %1743 = vmatprep.mubr.bf16.mxu1 %v8274_v22  ;;  %v6700_v18 = vld [vmem:[#allocation4 + $0x74] ss:$8 sps:$4 sm:$0xff]  }
 0x289   :  { %1531 = vmatpush1.bf16.msra.mxu0 %v6519_v37  ;;  %5968 = vmatprep.subr.bf16.mxu1 %v6651_v20  ;;  %v6664_v37 = vld [vmem:[#allocation2 + $0x368] ss:$12 sps:$4 sm:$0xff]   ;;  %v6698_v20 = vld [vmem:[#allocation4 + $0x70] ss:$8 sps:$4 sm:$0xff]  }
 0x28a   :  { %1532 = vmatprep.subr.bf16.mxu0 %v6520_v38  ;;  %v6667_v38 = vld [vmem:[#allocation2 + $0x440] ss:$12 sps:$4 sm:$0xff]  }
 0x28c   :  { %5969 = vmatpush3.bf16.msra.mxu1 %v6652_v24  ;;  %v6701_v24 = vld [vmem:[#allocation4 + $0x80] ss:$8 sps:$4 sm:$0xff]  }
 0x28d   :  { %1533 = vmatpush1.bf16.msra.mxu0 %v6522_v39  ;;  %5970 = vmatprep.subr.bf16.mxu1 %v6655_v27  ;;  %v6568_v39 = vld [vmem:[#allocation2 + $0x28c] ss:$12 sps:$4 sm:$0xff]   ;;  %v6599_v27 = vld [vmem:[#allocation2 + $0x390] ss:$12 sps:$4 sm:$0xff]  }
 0x28e   :  { %1534 = vmatprep.subr.bf16.mxu0 %v6523_v40  ;;  %v6566_v40 = vld [vmem:[#allocation2 + $0x288] ss:$12 sps:$4 sm:$0xff]  }
 0x290   :  { %5971 = vmatpush3.bf16.msra.mxu1 %v6656_v29  ;;  %v6704_v29 = vld [vmem:[#allocation4 + $0x90] ss:$8 sps:$4 sm:$0xff]  }
 0x291   :  { %1535 = vmatpush1.bf16.msra.mxu0 %v6525_v41  ;;  %v6668_v41 = vld [vmem:[#allocation2 + $0x380] ss:$12 sps:$4 sm:$0xff]  }
 0x292   :  { %1536 = vmatprep.subr.bf16.mxu0 %v6526_v42  ;;  %v6671_v42 = vld [vmem:[#allocation2 + $0x458] ss:$12 sps:$4 sm:$0xff]  }
 0x295   :  { %1537 = vmatpush1.bf16.msra.mxu0 %v6528_v43  ;;  %v6571_v43 = vld [vmem:[#allocation2 + $0x2a4] ss:$12 sps:$4 sm:$0xff]  }
 0x296   :  { %1538 = vmatprep.subr.bf16.mxu0 %v6529_v44  ;;  %v6569_v44 = vld [vmem:[#allocation2 + $0x2a0] ss:$12 sps:$4 sm:$0xff]  }
 0x299   :  { %1539 = vmatpush1.bf16.msra.mxu0 %v6531_v47  ;;  %v6574_v47 = vld [vmem:[#allocation2 + $0x2bc] ss:$12 sps:$4 sm:$0xff]  }
 0x29a   :  { %1549 = vmatprep.subr.bf16.mxu0 %v6535_v48  ;;  %v6676_v48 = vld [vmem:[#allocation2 + $0x3b0] ss:$12 sps:$4 sm:$0xff]  }
 0x29c   :  { %1541 = vmatmul.mubr.bf16.vlgmr.msra.gmra.mrb[0].mxu0 %v8262_v52 }
 0x29d   :  { %1550 = vmatpush1.bf16.msra.mxu0 %v6533_v51  ;;  %1581 = vmatprep.mubr.bf16.mxu0 %v528_v30  ;;  %v6659_v30 = vld [vmem:[#allocation2 + $0x410] ss:$12 sps:$4 sm:$0xff]   ;;  %v6577_v51 = vld [vmem:[#allocation2 + $0x2d4] ss:$12 sps:$4 sm:$0xff]  }
 0x29e   :  { %1551 = vmatprep.subr.bf16.mxu0 %v6538_v55  ;;  %5972 = vmatprep.subr.bf16.mxu1 %v6659_v30  ;;  %v8280_v55 = vpack.c.bf16 %v8266_v9, %v8266_v9  ;;  %v6592_v9 = vld [vmem:[#allocation2 + $0x34c] ss:$12 sps:$4 sm:$0xff]   ;;  %v6602_v30 = vld [vmem:[#allocation2 + $0x3a8] ss:$12 sps:$4 sm:$0xff]  }
 0x29f   :  { %5973 = vmatpush3.bf16.msra.mxu1 %v6660_v33  ;;  %v6707_v33 = vld [vmem:[#allocation4 + $0xa0] ss:$8 sps:$4 sm:$0xff]  }
 0x2a0   :  { %5974 = vmatprep.subr.bf16.mxu1 %v6663_v34  ;;  %v6605_v34 = vld [vmem:[#allocation2 + $0x3c0] ss:$12 sps:$4 sm:$0xff]  }
 0x2a1   :  { %1552 = vmatpush1.bf16.msra.mxu0 %v6536_v58  ;;  %v6680_v58 = vld [vmem:[#allocation4 + $0x10] ss:$8 sps:$4 sm:$0xff]  }
 0x2a2   :  { %1553 = vmatprep.subr.bf16.mxu0 %v6541_v59  ;;  %v6578_v59 = vld [vmem:[#allocation2 + $0x2e8] ss:$12 sps:$4 sm:$0xff]  }
 0x2a3   :  { %5975 = vmatpush3.bf16.msra.mxu1 %v6664_v37  ;;  %v6710_v37 = vld [vmem:[#allocation4 + $0xb0] ss:$8 sps:$4 sm:$0xff]  }
 0x2a4   :  { %5976 = vmatprep.subr.bf16.mxu1 %v6667_v38  ;;  %v6610_v38 = vld [vmem:[#allocation2 + $0x3d8] ss:$12 sps:$4 sm:$0xff]  }
 0x2a5   :  { %1554 = vmatpush1.bf16.msra.mxu0 %v6539_v62  ;;  %v6683_v62 = vld [vmem:[#allocation4 + $0x20] ss:$8 sps:$4 sm:$0xff]  }
 0x2a6   :  { %1555 = vmatprep.subr.bf16.mxu0 %v6544_v63  ;;  %v6581_v63 = vld [vmem:[#allocation2 + $0x300] ss:$12 sps:$4 sm:$0xff]  }
 0x2a7   :  { %5977 = vmatpush3.bf16.msra.mxu1 %v6668_v41  ;;  %v6713_v41 = vld [vmem:[#allocation4 + $0xc0] ss:$8 sps:$4 sm:$0xff]  }
 0x2a8   :  { %5978 = vmatprep.subr.bf16.mxu1 %v6671_v42  ;;  %v6615_v42 = vld [vmem:[#allocation2 + $0x3f0] ss:$12 sps:$4 sm:$0xff]  }
 0x2a9   :  { %1556 = vmatpush1.bf16.msra.mxu0 %v6542_v1  ;;  %v6688_v1 = vld [vmem:[#allocation4 + $0x34] ss:$8 sps:$4 sm:$0xff]  }
 0x2aa   :  { %1557 = vmatprep.subr.bf16.mxu0 %v6547_v4  ;;  %v6589_v4 = vld [vmem:[#allocation2 + $0x334] ss:$12 sps:$4 sm:$0xff]  }
 0x2ab   :  { %5979 = vmatpush3.bf16.msra.mxu1 %v6672_v45  ;;  %v6716_v45 = vld [vmem:[#allocation4 + $0xd0] ss:$8 sps:$4 sm:$0xff]  }
 0x2ac   :  { %5980 = vmatprep.subr.bf16.mxu1 %v6675_v46  ;;  %v6620_v46 = vld [vmem:[#allocation2 + $0x408] ss:$12 sps:$4 sm:$0xff]  }
 0x2ad   :  { %1558 = vmatpush1.bf16.msra.mxu0 %v6545_v5  ;;  %v6691_v5 = vld [vmem:[#allocation4 + $0x44] ss:$8 sps:$4 sm:$0xff]  }
 0x2ae   :  { %1559 = vmatprep.subr.bf16.mxu0 %v6550_v8  ;;  %v6694_v8 = vld [vmem:[#allocation4 + $0x54] ss:$8 sps:$4 sm:$0xff]  }
 0x2af   :  { %5981 = vmatpush3.bf16.msra.mxu1 %v6676_v48  ;;  %v6625_v48 = vld [vmem:[#allocation2 + $0x420] ss:$12 sps:$4 sm:$0xff]  }
 0x2b0   :  { %2057 = vmatprep.subr.bf16.mxu1 %v6679_v50  ;;  %v6630_v50 = vld [vmem:[#allocation2 + $0x438] ss:$12 sps:$4 sm:$0xff]  }
 0x2b1   :  { %1560 = vmatpush1.bf16.msra.mxu0 %v6548_v10  ;;  %v6692_v10 = vld [vmem:[#allocation4 + $0x50] ss:$8 sps:$4 sm:$0xff]  }
 0x2b2   :  { %1561 = vmatprep.subr.bf16.mxu0 %v6553_v14  ;;  %1744 = vmatmul.mubr.bf16.vlgmr.msra.gmra.mrb[4].mxu1 %v8280_v55  ;;  %v6595_v14 = vld [vmem:[#allocation2 + $0x364] ss:$12 sps:$4 sm:$0xff]  }
 0x2b3   :  { %2058 = vmatpush1.bf16.msra.mxu1 %v6677_v53  ;;  %v6635_v53 = vld [vmem:[#allocation2 + $0x450] ss:$12 sps:$4 sm:$0xff]  }
 0x2b4   :  { %2059 = vmatprep.subr.bf16.mxu1 %v6682_v56  ;;  %v6640_v56 = vld [vmem:[#allocation2 + $0x468] ss:$12 sps:$4 sm:$0xff]  }
 0x2b5   :  { %1562 = vmatpush1.bf16.msra.mxu0 %v6551_v17  ;;  %v6593_v17 = vld [vmem:[#allocation2 + $0x360] ss:$12 sps:$4 sm:$0xff]  }
 0x2b6   :  { %1563 = vmatprep.subr.bf16.mxu0 %v6556_v21  ;;  %v6596_v21 = vld [vmem:[#allocation2 + $0x378] ss:$12 sps:$4 sm:$0xff]  }
 0x2b7   :  { %2060 = vmatpush1.bf16.msra.mxu1 %v6680_v58  ;;  %v6646_v58 = vld [vmem:[#allocation2 + $0x8] ss:$12 sps:$4 sm:$0xff]  }
 0x2b8   :  { %2061 = vmatprep.subr.bf16.mxu1 %v6685_v60  ;;  %v6650_v60 = vld [vmem:[#allocation2 + $0x20] ss:$12 sps:$4 sm:$0xff]  }
 0x2b9   :  { %1564 = vmatpush1.bf16.msra.mxu0 %v6554_v23  ;;  %v6601_v23 = vld [vmem:[#allocation2 + $0x394] ss:$12 sps:$4 sm:$0xff]  }
 0x2ba   :  { %1565 = vmatprep.subr.bf16.mxu0 %v6559_v28  ;;  %v6706_v28 = vld [vmem:[#allocation4 + $0x94] ss:$8 sps:$4 sm:$0xff]  }
 0x2bb   :  { %2062 = vmatpush1.bf16.msra.mxu1 %v6683_v62  ;;  %v6654_v62 = vld [vmem:[#allocation2 + $0x38] ss:$12 sps:$4 sm:$0xff]  }
 0x2bc   :  { %2063 = vmatprep.subr.bf16.mxu1 %v6688_v1  ;;  %v6661_v1 = vld [vmem:[#allocation2 + $0x128] ss:$12 sps:$4 sm:$0xff]  }
 0x2bd   :  { %1566 = vmatpush1.bf16.msra.mxu0 %v6557_v25  ;;  %v6604_v25 = vld [vmem:[#allocation2 + $0x3ac] ss:$12 sps:$4 sm:$0xff]  }
 0x2be   :  { %1567 = vmatprep.subr.bf16.mxu0 %v6562_v31  ;;  %v6709_v31 = vld [vmem:[#allocation4 + $0xa4] ss:$8 sps:$4 sm:$0xff]  }
 0x2bf   :  { %2064 = vmatpush1.bf16.msra.mxu1 %v6686_v2  ;;  %v6662_v2 = vld [vmem:[#allocation2 + $0x68] ss:$12 sps:$4 sm:$0xff]  }
 0x2c0   :  { %2065 = vmatprep.subr.bf16.mxu1 %v6691_v5  ;;  %v6669_v5 = vld [vmem:[#allocation2 + $0x158] ss:$12 sps:$4 sm:$0xff]  }
 0x2c1   :  { %1568 = vmatpush1.bf16.msra.mxu0 %v6560_v32  ;;  %v6607_v32 = vld [vmem:[#allocation2 + $0x3c4] ss:$12 sps:$4 sm:$0xff]  }
 0x2c2   :  { %1569 = vmatprep.subr.bf16.mxu0 %v6565_v35  ;;  %v6712_v35 = vld [vmem:[#allocation4 + $0xb4] ss:$8 sps:$4 sm:$0xff]  }
 0x2c3   :  { %2066 = vmatpush1.bf16.msra.mxu1 %v6689_v6  ;;  %v6673_v6 = vld [vmem:[#allocation2 + $0x170] ss:$12 sps:$4 sm:$0xff]  }
 0x2c4   :  { %2067 = vmatprep.subr.bf16.mxu1 %v6694_v8  ;;  %v6719_v8 = vld [vmem:[#allocation4 + $0xe0] ss:$8 sps:$4 sm:$0xff]  }
 0x2c5   :  { %1570 = vmatpush1.bf16.msra.mxu0 %v6563_v36  ;;  %v6612_v36 = vld [vmem:[#allocation2 + $0x3dc] ss:$12 sps:$4 sm:$0xff]  }
 0x2c6   :  { %1571 = vmatprep.subr.bf16.mxu0 %v6568_v39  ;;  %v6715_v39 = vld [vmem:[#allocation4 + $0xc4] ss:$8 sps:$4 sm:$0xff]  }
 0x2c7   :  { %2068 = vmatpush1.bf16.msra.mxu1 %v6692_v10  ;;  %v6722_v10 = vld [vmem:[#allocation4 + $0xf0] ss:$8 sps:$4 sm:$0xff]  }
 0x2c8   :  { %2069 = vmatprep.subr.bf16.mxu1 %v6697_v12 }
 0x2c9   :  { %1572 = vmatpush1.bf16.msra.mxu0 %v6566_v40  ;;  %v6617_v40 = vld [vmem:[#allocation2 + $0x3f4] ss:$12 sps:$4 sm:$0xff]  }
 0x2ca   :  { %1573 = vmatprep.subr.bf16.mxu0 %v6571_v43  ;;  %v6718_v43 = vld [vmem:[#allocation4 + $0xd4] ss:$8 sps:$4 sm:$0xff]  }
 0x2cb   :  { %2070 = vmatpush1.bf16.msra.mxu1 %v6695_v15 }
 0x2cc   :  { %2071 = vmatprep.subr.bf16.mxu1 %v6700_v18 }
 0x2cd   :  { %1574 = vmatpush1.bf16.msra.mxu0 %v6569_v44  ;;  %v6622_v44 = vld [vmem:[#allocation2 + $0x40c] ss:$12 sps:$4 sm:$0xff]  }
 0x2ce   :  { %1575 = vmatprep.subr.bf16.mxu0 %v6574_v47  ;;  %v6627_v47 = vld [vmem:[#allocation2 + $0x424] ss:$12 sps:$4 sm:$0xff]  }
 0x2cf   :  { %2072 = vmatpush1.bf16.msra.mxu1 %v6698_v20  ;;  %v6750_v20 = vld [vmem:[#allocation6] sm:$0xff]  }
 0x2d1   :  { %1576 = vmatpush1.bf16.msra.mxu0 %v6572_v49  ;;  %v6632_v49 = vld [vmem:[#allocation2 + $0x43c] ss:$12 sps:$4 sm:$0xff]  }
 0x2d2   :  { %1577 = vmatprep.subr.bf16.mxu0 %v6577_v51  ;;  %v6637_v51 = vld [vmem:[#allocation2 + $0x454] ss:$12 sps:$4 sm:$0xff]  }
 0x2d5   :  { %1578 = vmatpush1.bf16.msra.mxu0 %v6575_v54  ;;  %v6642_v54 = vld [vmem:[#allocation2 + $0x46c] ss:$12 sps:$4 sm:$0xff]  }
 0x2d6   :  { %1579 = vmatprep.subr.bf16.mxu0 %v6580_v57  ;;  %v6645_v57 = vld [vmem:[#allocation2 + $0xc8] ss:$12 sps:$4 sm:$0xff]  }
 0x2d9   :  { %1580 = vmatpush1.bf16.msra.mxu0 %v6578_v59  ;;  %v6649_v59 = vld [vmem:[#allocation2 + $0xe0] ss:$12 sps:$4 sm:$0xff]  }
 0x2da   :  { %1590 = vmatprep.subr.bf16.mxu0 %v6583_v61  ;;  %v6653_v61 = vld [vmem:[#allocation2 + $0xf8] ss:$12 sps:$4 sm:$0xff]  }
 0x2dc   :  { %1582 = vmatmul.mubr.bf16.vlgmr.msra.gmra.mrb[0].mxu0 %v8272_v19  ;;  %v6598_v19 = vld [vmem:[#allocation2 + $0x37c] ss:$12 sps:$4 sm:$0xff]  }
 0x2dd   :  { %1591 = vmatpush1.bf16.msra.mxu0 %v6581_v63  ;;  %1622 = vmatprep.mubr.bf16.mxu0 %v8274_v22  ;;  %v6703_v22 = vld [vmem:[#allocation4 + $0x84] ss:$8 sps:$4 sm:$0xff]   ;;  %v6657_v63 = vld [vmem:[#allocation2 + $0x110] ss:$12 sps:$4 sm:$0xff]  }
 0x2de   :  { %1592 = vmatprep.subr.bf16.mxu0 %v6586_v0  ;;  %2073 = vmatprep.subr.bf16.mxu1 %v6703_v22  ;;  %v6658_v0 = vld [vmem:[#allocation2 + $0x50] ss:$12 sps:$4 sm:$0xff]  }
 0x2df   :  { %2074 = vmatpush1.bf16.msra.mxu1 %v6701_v24  ;;  %v6753_v22 = vld [vmem:[#allocation6 + $0x50] sm:$0xff]   ;;  %v6755_v24 = vld [vmem:[#allocation6 + $0x58] sm:$0xff]  }
 0x2e0   :  { %2075 = vmatprep.subr.bf16.mxu1 %v6706_v28 }
 0x2e1   :  { %1593 = vmatpush1.bf16.msra.mxu0 %v6584_v3  ;;  %v6665_v3 = vld [vmem:[#allocation2 + $0x140] ss:$12 sps:$4 sm:$0xff]  }
 0x2e2   :  { %1594 = vmatprep.subr.bf16.mxu0 %v6589_v4  ;;  %v6666_v4 = vld [vmem:[#allocation2 + $0x80] ss:$12 sps:$4 sm:$0xff]  }
 0x2e3   :  { %2076 = vmatpush1.bf16.msra.mxu1 %v6704_v29 }
 0x2e4   :  { %2077 = vmatprep.subr.bf16.mxu1 %v6709_v31 }
 0x2e5   :  { %1595 = vmatpush1.bf16.msra.mxu0 %v6587_v7  ;;  %v6721_v7 = vld [vmem:[#allocation4 + $0xe4] ss:$8 sps:$4 sm:$0xff]  }
 0x2e6   :  { %1596 = vmatprep.subr.bf16.mxu0 %v6592_v9  ;;  %v6724_v9 = vld [vmem:[#allocation4 + $0xf4] ss:$8 sps:$4 sm:$0xff]  }
 0x2e7   :  { %2078 = vmatpush1.bf16.msra.mxu1 %v6707_v33  ;;  %v6758_v33 = vld [vmem:[#allocation6 + $0x20] sm:$0xff]  }
 0x2e8   :  { %2079 = vmatprep.subr.bf16.mxu1 %v6712_v35  ;;  %v6760_v35 = vld [vmem:[#allocation6 + $0x28] sm:$0xff]  }
 0x2e9   :  { %1597 = vmatpush1.bf16.msra.mxu0 %v6590_v11  ;;  %v6727_v11 = vld [vmem:[#allocation4 + $0x104] ss:$8 sps:$4 sm:$0xff]  }
 0x2ea   :  { %1598 = vmatprep.subr.bf16.mxu0 %v6595_v14 }
 0x2eb   :  { %2080 = vmatpush1.bf16.msra.mxu1 %v6710_v37  ;;  %v723_v37 = vld [vmem:[%s8711_s4] sm:$0x7] }
 0x2ec   :  { %2081 = vmatprep.subr.bf16.mxu1 %v6715_v39 }
 0x2ed   :  { %1599 = vmatpush1.bf16.msra.mxu0 %v6593_v17 }
 0x2ee   :  { %1600 = vmatprep.subr.bf16.mxu0 %v6598_v19  ;;  %v6749_v19 = vld [vmem:[#allocation6 + $0x40] sm:$0xff]  }
 0x2ef   :  { %2082 = vmatpush1.bf16.msra.mxu1 %v6713_v41 }
 0x2f0   :  { %2083 = vmatprep.subr.bf16.mxu1 %v6718_v43 }
 0x2f1   :  { %1601 = vmatpush1.bf16.msra.mxu0 %v6596_v21  ;;  %v6751_v21 = vld [vmem:[#allocation6 + $0x48] sm:$0xff]  }
 0x2f2   :  { %1602 = vmatprep.subr.bf16.mxu0 %v6601_v23  ;;  %v6754_v23 = vld [vmem:[#allocation6 + $0x10] sm:$0xff]  }
 0x2f3   :  { %2084 = vmatpush1.bf16.msra.mxu1 %v6716_v45 }
 0x2f4   :  { %2085 = vmatprep.subr.bf16.mxu1 %v6721_v7 }
 0x2f5   :  { %1603 = vmatpush1.bf16.msra.mxu0 %v6599_v27 }
 0x2f6   :  { %1604 = vmatprep.subr.bf16.mxu0 %v6604_v25 }
 0x2f7   :  { %2086 = vmatpush1.bf16.msra.mxu1 %v6719_v8  ;;  %v6746_v8 = vld [vmem:[#allocation4 + $0x170] ss:$8 sps:$4 sm:$0xff]  }
 0x2f8   :  { %2087 = vmatprep.subr.bf16.mxu1 %v6724_v9 }
 0x2f9   :  { %1605 = vmatpush1.bf16.msra.mxu0 %v6602_v30  ;;  %v6756_v30 = vld [vmem:[#allocation6 + $0x18] sm:$0xff]  }
 0x2fa   :  { %1606 = vmatprep.subr.bf16.mxu0 %v6607_v32  ;;  %v6757_v32 = vld [vmem:[#allocation6 + $0x60] sm:$0xff]  }
 0x2fb   :  { %2088 = vmatpush1.bf16.msra.mxu1 %v6722_v10 }
 0x2fc   :  { %2098 = vmatprep.subr.bf16.mxu1 %v6727_v11 }
 0x2fd   :  { %1607 = vmatpush1.bf16.msra.mxu0 %v6605_v34  ;;  %v6759_v34 = vld [vmem:[#allocation6 + $0x68] sm:$0xff]  }
 0x2fe   :  { %1608 = vmatprep.subr.bf16.mxu0 %v6612_v36  ;;  %v8293_v36 = vsub.s32 0, %v8247_v13 }
 0x300   :  { %v728_v39 = vrot.slane %v723_v37, %v8293_v36 }
 0x301   :  { %1609 = vmatpush1.bf16.msra.mxu0 %v6610_v38  ;;  %v8297_v38 = vsub.s32 1, %v8247_v13 }
 0x302   :  { %1610 = vmatprep.subr.bf16.mxu0 %v6617_v40 }
 0x303   :  { %v732_v40 = vrot.slane %v723_v37, %v8297_v38 }
 0x305   :  { %1611 = vmatpush1.bf16.msra.mxu0 %v6615_v42 }
 0x306   :  { %1612 = vmatprep.subr.bf16.mxu0 %v6622_v44 }
 0x309   :  { %1613 = vmatpush1.bf16.msra.mxu0 %v6620_v46 }
 0x30a   :  { %1614 = vmatprep.subr.bf16.mxu0 %v6627_v47 }
 0x30d   :  { %1615 = vmatpush1.bf16.msra.mxu0 %v6625_v48 }
 0x30e   :  { %1616 = vmatprep.subr.bf16.mxu0 %v6632_v49 }
 0x311   :  { %1617 = vmatpush1.bf16.msra.mxu0 %v6630_v50  ;;  %v6725_v50 = vld [vmem:[#allocation4 + $0x100] ss:$8 sps:$4 sm:$0xff]  }
 0x312   :  { %1618 = vmatprep.subr.bf16.mxu0 %v6637_v51 }
 0x315   :  { %1619 = vmatpush1.bf16.msra.mxu0 %v6635_v53  ;;  %v6730_v53 = vld [vmem:[#allocation4 + $0x114] ss:$8 sps:$4 sm:$0xff]  }
 0x316   :  { %1620 = vmatprep.subr.bf16.mxu0 %v6642_v54  ;;  %v6728_v54 = vld [vmem:[#allocation4 + $0x110] ss:$8 sps:$4 sm:$0xff]  }
 0x319   :  { %1621 = vmatpush1.bf16.msra.mxu0 %v6640_v56  ;;  %v7878_v56 = vmov 0  }
 0x31a   :  { %5922 = vmatprep.subr.bf16.mxu0 %v6645_v57  ;;  %v6733_v57 = vld [vmem:[#allocation4 + $0x124] ss:$8 sps:$4 sm:$0xff]  }
 0x31c   :  { %1623 = vmatmul.mubr.bf16.vlgmr.msra.gmra.mrb[0].mxu0 %v8280_v55  ;;  %v6670_v55 = vld [vmem:[#allocation2 + $0x98] ss:$12 sps:$4 sm:$0xff]  }
 0x31d   :  { %5923 = vmatpush3.bf16.msra.mxu0 %v6646_v58  ;;  %1663 = vmatprep.mubr.bf16.mxu0 %v8257_v26  ;;  %v6674_v26 = vld [vmem:[#allocation2 + $0xb0] ss:$12 sps:$4 sm:$0xff]   ;;  %v6731_v58 = vld [vmem:[#allocation4 + $0x120] ss:$8 sps:$4 sm:$0xff]  }
 0x31e   :  { %5924 = vmatprep.subr.bf16.mxu0 %v6649_v59  ;;  %v6736_v59 = vld [vmem:[#allocation4 + $0x134] ss:$8 sps:$4 sm:$0xff]  }
 0x321   :  { %5925 = vmatpush3.bf16.msra.mxu0 %v6650_v60  ;;  %v6734_v60 = vld [vmem:[#allocation4 + $0x130] ss:$8 sps:$4 sm:$0xff]  }
 0x322   :  { %5926 = vmatprep.subr.bf16.mxu0 %v6653_v61  ;;  %v6739_v61 = vld [vmem:[#allocation4 + $0x144] ss:$8 sps:$4 sm:$0xff]  }
 0x325   :  { %5927 = vmatpush3.bf16.msra.mxu0 %v6654_v62  ;;  %v6737_v62 = vld [vmem:[#allocation4 + $0x140] ss:$8 sps:$4 sm:$0xff]  }
 0x326   :  { %5928 = vmatprep.subr.bf16.mxu0 %v6657_v63  ;;  %v6742_v63 = vld [vmem:[#allocation4 + $0x154] ss:$8 sps:$4 sm:$0xff]  }
 0x329   :  { %5929 = vmatpush3.bf16.msra.mxu0 %v6658_v0  ;;  %v6740_v0 = vld [vmem:[#allocation4 + $0x150] ss:$8 sps:$4 sm:$0xff]  }
 0x32a   :  { %5930 = vmatprep.subr.bf16.mxu0 %v6661_v1  ;;  %v6745_v1 = vld [vmem:[#allocation4 + $0x164] ss:$8 sps:$4 sm:$0xff]  }
 0x32d   :  { %5931 = vmatpush3.bf16.msra.mxu0 %v6662_v2  ;;  %v8303_v2 = vsub.s32 2, %v8247_v13 }
 0x32e   :  { %5932 = vmatprep.subr.bf16.mxu0 %v6665_v3  ;;  %v6743_v3 = vld [vmem:[#allocation4 + $0x160] ss:$8 sps:$4 sm:$0xff]  }
 0x331   :  { %5933 = vmatpush3.bf16.msra.mxu0 %v6666_v4  ;;  %v6748_v4 = vld [vmem:[#allocation4 + $0x174] ss:$8 sps:$4 sm:$0xff]  }
 0x332   :  { %5934 = vmatprep.subr.bf16.mxu0 %v6669_v5 }
 0x335   :  { %5935 = vmatpush3.bf16.msra.mxu0 %v6670_v55  ;;  %v736_v55 = vrot.slane %v723_v37, %v8303_v2 }
 0x336   :  { %5936 = vmatprep.subr.bf16.mxu0 %v6673_v6 }
 0x339   :  { %5937 = vmatpush3.bf16.msra.mxu0 %v6674_v26 }
 0x33a   :  { %5988 = vmatprep.subr.bf16.mxu0 %v6749_v19  ;;  %v6762_v19 = vld [vmem:[#allocation6 + $0x30] sm:$0xff]  }
 0x33c   :  { %1664 = vmatmul.mubr.bf16.vlgmr.msra.gmra.mrb[4].mxu0 %v8262_v52  ;;  %v6752_v52 = vld [vmem:[#allocation6 + $0x8] sm:$0xff]  }
 0x33d   :  { %5989 = vmatpush3.bf16.msra.mxu0 %v6750_v20  ;;  %v6763_v20 = vld [vmem:[#allocation6 + $0x78] sm:$0xff]  }
 0x33e   :  { %5990 = vmatprep.subr.bf16.mxu0 %v6751_v21  ;;  %v6764_v21 = vld [vmem:[#allocation6 + $0x38] sm:$0xff]  }
 0x341   :  { %5991 = vmatpush3.bf16.msra.mxu0 %v6752_v52  ;;  %v6765_v52 = vld [vmem:[#allocation9] sm:$0xff]  }
 0x342   :  { %5992 = vmatprep.subr.bf16.mxu0 %v6753_v22  ;;  %v7879_v22 = vmov 0.0  }
 0x345   :  { %5993 = vmatpush3.bf16.msra.mxu0 %v6754_v23  ;;  %v6767_v23 = vld [vmem:[#allocation9 + $0x10] sm:$0xff]  }
 0x346   :  { %5994 = vmatprep.subr.bf16.mxu0 %v6755_v24  ;;  %v6768_v24 = vld [vmem:[#allocation9 + $0x18] sm:$0xff]  }
 0x349   :  { %5995 = vmatpush3.bf16.msra.mxu0 %v6756_v30 }
 0x34a   :  { %5996 = vmatprep.subr.bf16.mxu0 %v6757_v32 }
 0x34d   :  { %5997 = vmatpush3.bf16.msra.mxu0 %v6758_v33 }
 0x34e   :  { %5998 = vmatprep.subr.bf16.mxu0 %v6759_v34 }
 0x351   :  { %5999 = vmatpush3.bf16.msra.mxu0 %v6760_v35 }
 0x35a   :  { %v5960_v12 = vpop.f32.mrb[0].mxu1 }
 0x35b   :  { %v5961_v14 = vpop.f32.mrb[1].mxu1 }
 0x35c   :  { %v8288_v15 = vadd.f32 %v5961_v14, %v5960_v12  ;;  %v5963_v17 = vpop.f32.mrb[2].mxu1 }
 0x35d   :  { %v5964_v18 = vpop.f32.mrb[3].mxu1 }
 0x35e   :  { %v6761_v18 = vld [vmem:[#allocation6 + $0x70] sm:$0xff]  }
 0x35f   :  { %6000 = vmatprep.subr.bf16.mxu0 %v6761_v18  ;;  %v8368_v18 = vld [vmem:[#allocation13 + $0x38] sm:$0xff]  }
 0x360   :  { %6001 = vmatpush3.bf16.msra.mxu0 %v6762_v19  ;;  %v6789_v19 = vld [vmem:[#allocation15] sm:$0xff]  }
 0x361   :  { %6002 = vmatprep.subr.bf16.mxu0 %v6763_v20  ;;  %v6790_v20 = vld [vmem:[#allocation15 + $0x8] sm:$0xff]  }
 0x364   :  { %6003 = vmatpush3.bf16.msra.mxu0 %v6764_v21  ;;  %v6791_v21 = vld [vmem:[#allocation15 + $0x10] sm:$0xff]  }
 0x365   :  { %6160 = vmatprep.subr.bf16.mxu0 %v7879_v22 }
 0x385   :  { %v5982_v27 = vpop.f32.mrb[4].mxu1 }
 0x386   :  { %v5983_v28 = vpop.f32.mrb[5].mxu1 }
 0x387   :  { %v8290_v25 = vadd.f32 %v5983_v28, %v5982_v27  ;;  %v5985_v29 = vpop.f32.mrb[6].mxu1  ;;  %v6769_v27 = vld [vmem:[#allocation9 + $0x20] sm:$0xff]   ;;  %v6770_v28 = vld [vmem:[#allocation9 + $0x28] sm:$0xff]  }
 0x388   :  { %v5986_v31 = vpop.f32.mrb[7].mxu1 }
 0x3ef   :  { %v1624_v41 = vpop.f32.mrb[0].mxu0 }
 0x3f0   :  { %v6380_v42 = vadd.f32 %v1624_v41, %v728_v39  ;;  %v1626_v43 = vpop.f32.mrb[1].mxu0 }
 0x3f1   :  { %v6381_v44 = vadd.f32 %v1626_v43, %v732_v40  ;;  %v1628_v45 = vpop.f32.mrb[2].mxu0  ;;  %v6771_v43 = vld [vmem:[#allocation9 + $0x30] sm:$0xff]  }
 0x3f2   :  { %v1751_v46 = vmax.f32 %v6380_v42, 0.0  ;;  %v1629_v47 = vpop.f32.mrb[3].mxu0  ;;  %v6773_v45 = vld [vmem:[#allocation12] sm:$0xff]  }
 0x3f3   :  { %v1752_v48 = vmax.f32 %v6381_v44, 0.0  ;;  %v6772_v44 = vld [vmem:[#allocation9 + $0x38] sm:$0xff]  }
 0x3f4   :  { %v1754_v51 = vpack.c.bf16 %v1751_v46, %v1751_v46  ;;  %v6774_v46 = vld [vmem:[#allocation12 + $0x8] sm:$0xff]   ;;  %v6775_v47 = vld [vmem:[#allocation12 + $0x10] sm:$0xff]  }
 0x3f5   :  { %v1755_v49 = vpack.c.bf16 %v1752_v48, %v1752_v48  ;;  %v6776_v48 = vld [vmem:[#allocation12 + $0x18] sm:$0xff]  }
 0x3f7   :  { %2089 = vmatprep.mubr.bf16.mxu1 %v1755_v49  ;;  %v6777_v49 = vld [vmem:[#allocation12 + $0x20] sm:$0xff]  }
 0x3f8   :  { %2090 = vmatmul.mubr.bf16.vlgmr.msra.gmra.mrb[8].mxu1 %v1754_v51 }
 0x3f9   :  { %2099 = vmatpush1.bf16.msra.mxu1 %v6725_v50  ;;  %2130 = vmatprep.mubr.bf16.mxu1 %v7878_v56  ;;  %v6778_v50 = vld [vmem:[#allocation12 + $0x28] sm:$0xff]  }
 0x3fa   :  { %2100 = vmatprep.subr.bf16.mxu1 %v6730_v53  ;;  %v5600_v53 = vld [vmem:[#allocation7] ss:$0 sm:$0xff] }
 0x3fd   :  { %2101 = vmatpush1.bf16.msra.mxu1 %v6728_v54 }
 0x3fe   :  { %2102 = vmatprep.subr.bf16.mxu1 %v6733_v57 }
 0x401   :  { %2103 = vmatpush1.bf16.msra.mxu1 %v6731_v58 }
 0x402   :  { %2104 = vmatprep.subr.bf16.mxu1 %v6736_v59 }
 0x405   :  { %2105 = vmatpush1.bf16.msra.mxu1 %v6734_v60 }
 0x406   :  { %2106 = vmatprep.subr.bf16.mxu1 %v6739_v61 }
 0x409   :  { %2107 = vmatpush1.bf16.msra.mxu1 %v6737_v62 }
 0x40a   :  { %2108 = vmatprep.subr.bf16.mxu1 %v6742_v63  ;;  %v6779_v63 = vld [vmem:[#allocation12 + $0x30] sm:$0xff]  }
 0x40d   :  { %2109 = vmatpush1.bf16.msra.mxu1 %v6740_v0  ;;  %v6780_v0 = vld [vmem:[#allocation12 + $0x38] sm:$0xff]  }
 0x40e   :  { %2110 = vmatprep.subr.bf16.mxu1 %v6745_v1  ;;  %v5617_v1 = vld [vmem:[#allocation10] ss:$0 sm:$0xff] }
 0x40f   :  { %v5938_v5 = vpop.f32.mrb[4].mxu0 }
 0x410   :  { %v5939_v6 = vpop.f32.mrb[5].mxu0 }
 0x411   :  { %v5940_v26 = vadd.f32 %v5939_v6, %v5938_v5  ;;  %v5941_v7 = vpop.f32.mrb[6].mxu0  ;;  %2111 = vmatpush1.bf16.msra.mxu1 %v6743_v3 }
 0x412   :  { %v5942_v9 = vpop.f32.mrb[7].mxu0  ;;  %2112 = vmatprep.subr.bf16.mxu1 %v6748_v4 }
 0x413   :  { %v1666_v10 = vadd.f32 %v5940_v26, %v736_v55  ;;  %v8345_v9 = vld [vmem:[#allocation13 + $0x8] sm:$0xff]  }
 0x415   :  { %v1706_v11 = vadd.f32 %v8288_v15, %v1666_v10  ;;  %2113 = vmatpush1.bf16.msra.mxu1 %v6746_v8  ;;  %v6766_v15 = vld [vmem:[#allocation9 + $0x8] sm:$0xff]   ;;  %v8349_v10 = vld [vmem:[#allocation13 + $0x10] sm:$0xff]  }
 0x416   :  { %6140 = vmatprep.subr.bf16.mxu1 %v7879_v22  ;;  %v8341_v8 = vld [vmem:[#allocation13] sm:$0xff]  }
 0x417   :  { %v1746_v12 = vadd.f32 %v8290_v25, %v1706_v11  ;;  %v1805_v25 = vld [vmem:[%s8712_s17] sm:$0x3] }
 0x418   :  { %v1810_v29 = vrot.slane %v1805_v25, %v8293_v36  ;;  %v1814_v30 = vrot.slane %v1805_v25, %v8297_v38  ;;  %v8353_v11 = vld [vmem:[#allocation13 + $0x18] sm:$0xff]  }
 0x419   :  { %v1753_v14 = vmax.f32 %v1746_v12, 0.0  ;;  %v8357_v12 = vld [vmem:[#allocation13 + $0x20] sm:$0xff]  }
 0x41b   :  { %v1756_v17 = vpack.c.bf16 %v1753_v14, %v1753_v14  ;;  %v8361_v14 = vld [vmem:[#allocation13 + $0x28] sm:$0xff]  }
 0x41d   :  { %2131 = vmatmul.mubr.bf16.vlgmr.msra.gmra.mrb[8].mxu1 %v1756_v17  ;;  %v8364_v17 = vld [vmem:[#allocation13 + $0x30] sm:$0xff]  }
 0x41e   :  { %6141 = vmatpush3.bf16.msra.mxu1 %v6765_v52  ;;  %6156 = vmatprep.mubr.msk.bf16.mxu1 %vm7880_vm0, %v7879_v22  ;;  %v6792_v52 = vld [vmem:[#allocation15 + $0x18] sm:$0xff]  }
 0x41f   :  { %6142 = vmatprep.subr.bf16.mxu1 %v7879_v22 }
 0x422   :  { %6143 = vmatpush3.bf16.msra.mxu1 %v6766_v15  ;;  %v6793_v15 = vld [vmem:[#allocation15 + $0x20] sm:$0xff]  }
 0x423   :  { %6144 = vmatprep.subr.bf16.mxu1 %v7879_v22 }
 0x426   :  { %6145 = vmatpush3.bf16.msra.mxu1 %v6767_v23  ;;  %v6794_v23 = vld [vmem:[#allocation15 + $0x28] sm:$0xff]  }
 0x427   :  { %6146 = vmatprep.subr.bf16.mxu1 %v7879_v22 }
 0x42a   :  { %6147 = vmatpush3.bf16.msra.mxu1 %v6768_v24  ;;  %v6795_v24 = vld [vmem:[#allocation15 + $0x30] sm:$0xff]  }
 0x42b   :  { %6148 = vmatprep.subr.bf16.mxu1 %v7879_v22 }
 0x42e   :  { %6149 = vmatpush3.bf16.msra.mxu1 %v6769_v27 }
 0x42f   :  { %6150 = vmatprep.subr.bf16.mxu1 %v7879_v22 }
 0x432   :  { %6151 = vmatpush3.bf16.msra.mxu1 %v6770_v28 }
 0x433   :  { %6152 = vmatprep.subr.bf16.mxu1 %v7879_v22 }
 0x436   :  { %6153 = vmatpush3.bf16.msra.mxu1 %v6771_v43  ;;  %v6801_v43 = vld [vmem:[#allocation18 + $0x20] sm:$0xff]  }
 0x437   :  { %6154 = vmatprep.subr.bf16.mxu1 %v7879_v22 }
 0x43a   :  { %6155 = vmatpush3.bf16.msra.mxu1 %v6772_v44  ;;  %v6802_v44 = vld [vmem:[#allocation18 + $0x28] sm:$0xff]  }
 0x43b   :  { %6180 = vmatprep.subr.bf16.mxu1 %v7879_v22 }
 0x4f0   :  { %v2132_v31 = vpop.f32.mrb[8].mxu1 }
 0x4f1   :  { %v6382_v32 = vadd.f32 %v2132_v31, %v1810_v29  ;;  %v2134_v33 = vpop.f32.mrb[9].mxu1 }
 0x4f2   :  { %v6383_v34 = vadd.f32 %v2134_v33, %v1814_v30  ;;  %v2136_v35 = vpop.f32.mrb[10].mxu1 }
 0x4f3   :  { %v2139_v37 = vmax.f32 %v6382_v32, 0.0  ;;  %v2137_v39 = vpop.f32.mrb[11].mxu1 }
 0x4f4   :  { %v2140_v40 = vmax.f32 %v6383_v34, 0.0  ;;  %v6797_v39 = vld [vmem:[#allocation18] sm:$0xff]  }
 0x4f5   :  { %v2141_v42 = vpack.c.bf16 %v2139_v37, %v2139_v37  ;;  %v6796_v37 = vld [vmem:[#allocation15 + $0x38] sm:$0xff]  }
 0x4f6   :  { %v2142_v41 = vpack.c.bf16 %v2140_v40, %v2140_v40  ;;  %v6798_v40 = vld [vmem:[#allocation18 + $0x8] sm:$0xff]  }
 0x4f8   :  { %2310 = vmatprep.mubr.bf16.mxu0 %v2142_v41  ;;  %v6799_v41 = vld [vmem:[#allocation18 + $0x10] sm:$0xff]  }
 0x4f9   :  { %2311 = vmatmul.mubr.bf16.vlgmr.msra.gmra.mrb[8].mxu0 %v2141_v42  ;;  %v6800_v42 = vld [vmem:[#allocation18 + $0x18] sm:$0xff]  }
 0x4fa   :  { %6176 = vmatprep.mubr.msk.bf16.mxu0 %vm7880_vm0, %v7879_v22  ;;  %6161 = vmatpush3.bf16.msra.mxu0 %v6773_v45 }
 0x4fb   :  { %6162 = vmatprep.subr.bf16.mxu0 %v7879_v22 }
 0x4fe   :  { %6163 = vmatpush3.bf16.msra.mxu0 %v6774_v46 }
 0x4ff   :  { %6164 = vmatprep.subr.bf16.mxu0 %v7879_v22 }
 0x502   :  { %6165 = vmatpush3.bf16.msra.mxu0 %v6775_v47 }
 0x503   :  { %6166 = vmatprep.subr.bf16.mxu0 %v7879_v22 }
 0x506   :  { %6167 = vmatpush3.bf16.msra.mxu0 %v6776_v48 }
 0x507   :  { %6168 = vmatprep.subr.bf16.mxu0 %v7879_v22 }
 0x50a   :  { %6169 = vmatpush3.bf16.msra.mxu0 %v6777_v49 }
 0x50b   :  { %6170 = vmatprep.subr.bf16.mxu0 %v7879_v22 }
 0x50e   :  { %6171 = vmatpush3.bf16.msra.mxu0 %v6778_v50 }
 0x50f   :  { %6172 = vmatprep.subr.bf16.mxu0 %v7879_v22 }
 0x512   :  { %6173 = vmatpush3.bf16.msra.mxu0 %v6779_v63 }
 0x513   :  { %6174 = vmatprep.subr.bf16.mxu0 %v7879_v22 }
 0x516   :  { %6175 = vmatpush3.bf16.msra.mxu0 %v6780_v0 }
 0x517   :  { %6200 = vmatprep.subr.bf16.mxu0 %v7879_v22 }
 0x5cc   :  { %v6004_v51 = vpop.f32.mrb[8].mxu0 }
 0x5cd   :  { %v6005_v54 = vpop.f32.mrb[9].mxu0 }
 0x5ce   :  { %v6006_v57 = vadd.f32 %v6005_v54, %v6004_v51  ;;  %v6007_v58 = vpop.f32.mrb[10].mxu0  ;;  %v6803_v51 = vld [vmem:[#allocation18 + $0x30] sm:$0xff]   ;;  %v6805_v54 = vld [vmem:[#allocation21] sm:$0xff]  }
 0x5cf   :  { %v6008_v59 = vpop.f32.mrb[11].mxu0  ;;  %v6807_v58 = vld [vmem:[#allocation21 + $0x10] sm:$0xff]  }
 0x5d0   :  { %v2313_v60 = vadd.f32 %v6006_v57, %v5600_v53  ;;  %v6804_v53 = vld [vmem:[#allocation18 + $0x38] sm:$0xff]   ;;  %v6806_v57 = vld [vmem:[#allocation21 + $0x8] sm:$0xff]  }
 0x5d1   :  { %v6808_v59 = vld [vmem:[#allocation21 + $0x18] sm:$0xff]  }
 0x5d2   :  { %v2318_v61 = vmax.f32 %v2313_v60, 0.0  ;;  %v6809_v60 = vld [vmem:[#allocation21 + $0x20] sm:$0xff]  }
 0x5d4   :  { %v2319_v62 = vpack.c.bf16 %v2318_v61, %v2318_v61  ;;  %v6810_v61 = vld [vmem:[#allocation21 + $0x28] sm:$0xff]  }
 0x5d6   :  { %6157 = vmatmul.mubr.bf16.vlgmr.msra.gmra.mrb[12].mxu1 %v2319_v62  ;;  %v5642_v62 = vld [vmem:[#allocation16] ss:$0 sm:$0xff] }
 0x5d7   :  { %6196 = vmatprep.mubr.msk.bf16.mxu1 %vm7880_vm0, %v7879_v22  ;;  %6181 = vmatpush3.bf16.msra.mxu1 %v8341_v8 }
 0x5d8   :  { %6182 = vmatprep.subr.bf16.mxu1 %v7879_v22 }
 0x5db   :  { %6183 = vmatpush3.bf16.msra.mxu1 %v8345_v9 }
 0x5dc   :  { %6184 = vmatprep.subr.bf16.mxu1 %v7879_v22 }
 0x5df   :  { %6185 = vmatpush3.bf16.msra.mxu1 %v8349_v10 }
 0x5e0   :  { %6186 = vmatprep.subr.bf16.mxu1 %v7879_v22 }
 0x5e3   :  { %6187 = vmatpush3.bf16.msra.mxu1 %v8353_v11 }
 0x5e4   :  { %6188 = vmatprep.subr.bf16.mxu1 %v7879_v22 }
 0x5e7   :  { %6189 = vmatpush3.bf16.msra.mxu1 %v8357_v12 }
 0x5e8   :  { %6190 = vmatprep.subr.bf16.mxu1 %v7879_v22 }
 0x5eb   :  { %6191 = vmatpush3.bf16.msra.mxu1 %v8361_v14 }
 0x5ec   :  { %6192 = vmatprep.subr.bf16.mxu1 %v7879_v22 }
 0x5ef   :  { %6193 = vmatpush3.bf16.msra.mxu1 %v8364_v17 }
 0x5f0   :  { %6194 = vmatprep.subr.bf16.mxu1 %v7879_v22 }
 0x5f3   :  { %6195 = vmatpush3.bf16.msra.mxu1 %v8368_v18 }
 0x5f4   :  { %6220 = vmatprep.subr.bf16.mxu1 %v7879_v22 }
 0x6a9   :  { %v2425_v3 = vpop.f32.mrb[12].mxu1 }
 0x6aa   :  { %v2426_v4 = vadd.f32 %v5617_v1, %v2425_v3  ;;  %v6158_v5 = vpop.f32.mrb[13].mxu1 }
 0x6ab   :  { %v2428_v55 = vpop.f32.mrb[14].mxu1 }
 0x6ac   :  { %v8335_v6 = vmax.f32 %v2426_v4, 0.0  ;;  %v6159_v26 = vpop.f32.mrb[15].mxu1 }
 0x6ad   :  { %v6812_v26 = vld [vmem:[#allocation21 + $0x38] sm:$0xff]  }
 0x6ae   :  { %v2432_v7 = vpack.c.bf16 %v8335_v6, %v8335_v6 }
 0x6b0   :  { %6177 = vmatmul.mubr.bf16.vlgmr.msra.gmra.mrb[12].mxu0 %v2432_v7  ;;  %v6813_v7 = vld [vmem:[#allocation24] sm:$0xff]  }
 0x6b1   :  { %6216 = vmatprep.mubr.msk.bf16.mxu0 %vm7880_vm0, %v7879_v22  ;;  %6201 = vmatpush3.bf16.msra.mxu0 %v6789_v19  ;;  %v6814_v19 = vld [vmem:[#allocation24 + $0x8] sm:$0xff]  }
 0x6b2   :  { %6202 = vmatprep.subr.bf16.mxu0 %v7879_v22 }
 0x6b5   :  { %6203 = vmatpush3.bf16.msra.mxu0 %v6790_v20  ;;  %v6815_v20 = vld [vmem:[#allocation24 + $0x10] sm:$0xff]  }
 0x6b6   :  { %6204 = vmatprep.subr.bf16.mxu0 %v7879_v22 }
 0x6b9   :  { %6205 = vmatpush3.bf16.msra.mxu0 %v6791_v21  ;;  %v6816_v21 = vld [vmem:[#allocation24 + $0x18] sm:$0xff]  }
 0x6ba   :  { %6206 = vmatprep.subr.bf16.mxu0 %v7879_v22 }
 0x6bd   :  { %6207 = vmatpush3.bf16.msra.mxu0 %v6792_v52  ;;  %v6817_v52 = vld [vmem:[#allocation24 + $0x20] sm:$0xff]  }
 0x6be   :  { %6208 = vmatprep.subr.bf16.mxu0 %v7879_v22 }
 0x6c1   :  { %6209 = vmatpush3.bf16.msra.mxu0 %v6793_v15  ;;  %v6818_v15 = vld [vmem:[#allocation24 + $0x28] sm:$0xff]  }
 0x6c2   :  { %6210 = vmatprep.subr.bf16.mxu0 %v7879_v22 }
 0x6c5   :  { %6211 = vmatpush3.bf16.msra.mxu0 %v6794_v23  ;;  %v5651_v23 = vld [vmem:[#allocation19] ss:$0 sm:$0xff] }
 0x6c6   :  { %6212 = vmatprep.subr.bf16.mxu0 %v7879_v22 }
 0x6c9   :  { %6213 = vmatpush3.bf16.msra.mxu0 %v6795_v24 }
 0x6ca   :  { %6214 = vmatprep.subr.bf16.mxu0 %v7879_v22 }
 0x6cd   :  { %6215 = vmatpush3.bf16.msra.mxu0 %v6796_v37  ;;  %v6822_v37 = vld [vmem:[#allocation27 + $0x8] sm:$0xff]  }
 0x6ce   :  { %6240 = vmatprep.subr.bf16.mxu0 %v7879_v22 }
 0x783   :  { %v2531_v27 = vpop.f32.mrb[12].mxu0 }
 0x784   :  { %v2537_v28 = vsub.f32 0.0, %v2531_v27  ;;  %v6178_v25 = vpop.f32.mrb[13].mxu0 }
 0x785   :  { %v2534_v29 = vpop.f32.mrb[14].mxu0 }
 0x786   :  { %v2538_v30 = vmul.f32 1.442695, %v2537_v28  ;;  %v6179_v31 = vpop.f32.mrb[15].mxu0 }
 0x788   :  { %7157 = vpow2.f32 %v2538_v30 }
 0x792   :  { %v7158_v32 = vpop.eup %7157 }
 0x793   :  { %v2540_v33 = vadd.f32 1.0, %v7158_v32 }
 0x795   :  { %7159 = vrcp.f32 %v2540_v33  ;;  %v6819_v33 = vld [vmem:[#allocation24 + $0x30] sm:$0xff]  }
 0x79f   :  { %v7160_v34 = vpop.eup %7159 }
 0x7a0   :  { %v2543_v35 = vpack.c.bf16 %v7160_v34, %v7160_v34  ;;  %v6820_v34 = vld [vmem:[#allocation24 + $0x38] sm:$0xff]  }
 0x7a2   :  { %6197 = vmatmul.mubr.bf16.vlgmr.msra.gmra.mrb[16].mxu1 %v2543_v35  ;;  %v6821_v35 = vld [vmem:[#allocation27] sm:$0xff]  }
 0x7a3   :  { %6236 = vmatprep.mubr.msk.bf16.mxu1 %vm7880_vm0, %v7879_v22  ;;  %6221 = vmatpush3.bf16.msra.mxu1 %v6797_v39  ;;  %v6823_v39 = vld [vmem:[#allocation27 + $0x10] sm:$0xff]  }
 0x7a4   :  { %6222 = vmatprep.subr.bf16.mxu1 %v7879_v22 }
 0x7a7   :  { %6223 = vmatpush3.bf16.msra.mxu1 %v6798_v40  ;;  %v6824_v40 = vld [vmem:[#allocation27 + $0x18] sm:$0xff]  }
 0x7a8   :  { %6224 = vmatprep.subr.bf16.mxu1 %v7879_v22 }
 0x7ab   :  { %6225 = vmatpush3.bf16.msra.mxu1 %v6799_v41  ;;  %v6825_v41 = vld [vmem:[#allocation27 + $0x20] sm:$0xff]  }
 0x7ac   :  { %6226 = vmatprep.subr.bf16.mxu1 %v7879_v22 }
 0x7af   :  { %6227 = vmatpush3.bf16.msra.mxu1 %v6800_v42  ;;  %v6826_v42 = vld [vmem:[#allocation27 + $0x28] sm:$0xff]  }
 0x7b0   :  { %6228 = vmatprep.subr.bf16.mxu1 %v7879_v22 }
 0x7b3   :  { %6229 = vmatpush3.bf16.msra.mxu1 %v6801_v43  ;;  %v5660_v43 = vld [vmem:[#allocation22] ss:$0 sm:$0xff] }
 0x7b4   :  { %6230 = vmatprep.subr.bf16.mxu1 %v7879_v22 }
 0x7b7   :  { %6231 = vmatpush3.bf16.msra.mxu1 %v6802_v44 }
 0x7b8   :  { %6232 = vmatprep.subr.bf16.mxu1 %v7879_v22 }
 0x7bb   :  { %6233 = vmatpush3.bf16.msra.mxu1 %v6803_v51  ;;  %v6827_v51 = vld [vmem:[#allocation27 + $0x30] sm:$0xff]  }
 0x7bc   :  { %6234 = vmatprep.subr.bf16.mxu1 %v7879_v22 }
 0x7bf   :  { %6235 = vmatpush3.bf16.msra.mxu1 %v6804_v53  ;;  %v6828_v53 = vld [vmem:[#allocation27 + $0x38] sm:$0xff]  }
 0x7c0   :  { %6260 = vmatprep.subr.bf16.mxu1 %v7879_v22 }
 0x875   :  { %v2642_v45 = vpop.f32.mrb[16].mxu1 }
 0x876   :  { %v8390_v46 = vmul.f32 %v2642_v45, %v8335_v6  ;;  %v6198_v47 = vpop.f32.mrb[17].mxu1  ;;  %v6811_v6 = vld [vmem:[#allocation21 + $0x30] sm:$0xff]  }
 0x877   :  { %v2645_v48 = vpop.f32.mrb[18].mxu1 }
 0x878   :  { %v2649_v49 = vpack.c.bf16 %v8390_v46, %v8390_v46  ;;  %v6199_v50 = vpop.f32.mrb[19].mxu1 }
 0x87a   :  { %6217 = vmatmul.mubr.bf16.vlgmr.msra.gmra.mrb[16].mxu0 %v2649_v49 }
 0x87b   :  { %6256 = vmatprep.mubr.msk.bf16.mxu0 %vm7880_vm0, %v7879_v22  ;;  %6241 = vmatpush3.bf16.msra.mxu0 %v6805_v54  ;;  %v6829_v54 = vld [vmem:[#allocation30] sm:$0xff]  }
 0x87c   :  { %6242 = vmatprep.subr.bf16.mxu0 %v7879_v22 }
 0x87f   :  { %6243 = vmatpush3.bf16.msra.mxu0 %v6806_v57  ;;  %v6830_v57 = vld [vmem:[#allocation30 + $0x8] sm:$0xff]  }
 0x880   :  { %6244 = vmatprep.subr.bf16.mxu0 %v7879_v22 }
 0x883   :  { %6245 = vmatpush3.bf16.msra.mxu0 %v6807_v58  ;;  %v6831_v58 = vld [vmem:[#allocation30 + $0x10] sm:$0xff]  }
 0x884   :  { %6246 = vmatprep.subr.bf16.mxu0 %v7879_v22 }
 0x887   :  { %6247 = vmatpush3.bf16.msra.mxu0 %v6808_v59  ;;  %v6832_v59 = vld [vmem:[#allocation30 + $0x18] sm:$0xff]  }
 0x888   :  { %6248 = vmatprep.subr.bf16.mxu0 %v7879_v22 }
 0x88b   :  { %6249 = vmatpush3.bf16.msra.mxu0 %v6809_v60  ;;  %v6833_v60 = vld [vmem:[#allocation30 + $0x20] sm:$0xff]  }
 0x88c   :  { %6250 = vmatprep.subr.bf16.mxu0 %v7879_v22 }
 0x88f   :  { %6251 = vmatpush3.bf16.msra.mxu0 %v6810_v61  ;;  %v6834_v61 = vld [vmem:[#allocation30 + $0x28] sm:$0xff]  }
 0x890   :  { %6252 = vmatprep.subr.bf16.mxu0 %v7879_v22 }
 0x893   :  { %6253 = vmatpush3.bf16.msra.mxu0 %v6811_v6  ;;  %v6835_v6 = vld [vmem:[#allocation30 + $0x30] sm:$0xff]  }
 0x894   :  { %6254 = vmatprep.subr.bf16.mxu0 %v7879_v22 }
 0x897   :  { %6255 = vmatpush3.bf16.msra.mxu0 %v6812_v26  ;;  %v6836_v26 = vld [vmem:[#allocation30 + $0x38] sm:$0xff]  }
 0x898   :  { %6280 = vmatprep.subr.bf16.mxu0 %v7879_v22 }
 0x94d   :  { %v2755_v63 = vpop.f32.mrb[16].mxu0 }
 0x94e   :  { %v2756_v0 = vadd.f32 %v5642_v62, %v2755_v63  ;;  %v6218_v1 = vpop.f32.mrb[17].mxu0  ;;  %v5669_v62 = vld [vmem:[#allocation25] ss:$0 sm:$0xff] }
 0x94f   :  { %v2758_v3 = vpop.f32.mrb[18].mxu0 }
 0x950   :  { %v2761_v4 = vmax.f32 %v2756_v0, 0.0  ;;  %v6219_v5 = vpop.f32.mrb[19].mxu0 }
 0x952   :  { %v2762_v55 = vpack.c.bf16 %v2761_v4, %v2761_v4 }
 0x954   :  { %6237 = vmatmul.mubr.bf16.vlgmr.msra.gmra.mrb[20].mxu1 %v2762_v55 }
 0x955   :  { %6276 = vmatprep.mubr.msk.bf16.mxu1 %vm7880_vm0, %v7879_v22  ;;  %6261 = vmatpush3.bf16.msra.mxu1 %v6813_v7  ;;  %v6837_v7 = vld [vmem:[#allocation33] sm:$0xff]  }
 0x956   :  { %6262 = vmatprep.subr.bf16.mxu1 %v7879_v22 }
 0x959   :  { %6263 = vmatpush3.bf16.msra.mxu1 %v6814_v19  ;;  %v6838_v19 = vld [vmem:[#allocation33 + $0x8] sm:$0xff]  }
 0x95a   :  { %6264 = vmatprep.subr.bf16.mxu1 %v7879_v22 }
 0x95d   :  { %6265 = vmatpush3.bf16.msra.mxu1 %v6815_v20  ;;  %v6839_v20 = vld [vmem:[#allocation33 + $0x10] sm:$0xff]  }
 0x95e   :  { %6266 = vmatprep.subr.bf16.mxu1 %v7879_v22 }
 0x961   :  { %6267 = vmatpush3.bf16.msra.mxu1 %v6816_v21  ;;  %v6840_v21 = vld [vmem:[#allocation33 + $0x18] sm:$0xff]  }
 0x962   :  { %6268 = vmatprep.subr.bf16.mxu1 %v7879_v22 }
 0x965   :  { %6269 = vmatpush3.bf16.msra.mxu1 %v6817_v52  ;;  %v6841_v52 = vld [vmem:[#allocation33 + $0x20] sm:$0xff]  }
 0x966   :  { %6270 = vmatprep.subr.bf16.mxu1 %v7879_v22 }
 0x969   :  { %6271 = vmatpush3.bf16.msra.mxu1 %v6818_v15  ;;  %v6842_v15 = vld [vmem:[#allocation33 + $0x28] sm:$0xff]  }
 0x96a   :  { %6272 = vmatprep.subr.bf16.mxu1 %v7879_v22 }
 0x96d   :  { %6273 = vmatpush3.bf16.msra.mxu1 %v6819_v33  ;;  %v6844_v33 = vld [vmem:[#allocation33 + $0x38] sm:$0xff]  }
 0x96e   :  { %6274 = vmatprep.subr.bf16.mxu1 %v7879_v22 }
 0x971   :  { %6275 = vmatpush3.bf16.msra.mxu1 %v6820_v34  ;;  %v6845_v34 = vld [vmem:[#allocation36] sm:$0xff]  }
 0x972   :  { %6300 = vmatprep.subr.bf16.mxu1 %v7879_v22 }
 0xa27   :  { %v2868_v24 = vpop.f32.mrb[20].mxu1 }
 0xa28   :  { %v2869_v27 = vadd.f32 %v5651_v23, %v2868_v24  ;;  %v6238_v28 = vpop.f32.mrb[21].mxu1  ;;  %v5678_v23 = vld [vmem:[#allocation28] ss:$0 sm:$0xff] }
 0xa29   :  { %v2871_v25 = vpop.f32.mrb[22].mxu1 }
 0xa2a   :  { %v2874_v29 = vadd.f32 %v2869_v27, %v8390_v46  ;;  %v6239_v30 = vpop.f32.mrb[23].mxu1 }
 0xa2c   :  { %v2875_v31 = vmax.f32 %v2874_v29, 0.0 }
 0xa2e   :  { %v2876_v32 = vpack.c.bf16 %v2875_v31, %v2875_v31 }
 0xa30   :  { %6257 = vmatmul.mubr.bf16.vlgmr.msra.gmra.mrb[20].mxu0 %v2876_v32  ;;  %v6843_v32 = vld [vmem:[#allocation33 + $0x30] sm:$0xff]  }
 0xa31   :  { %6296 = vmatprep.mubr.msk.bf16.mxu0 %vm7880_vm0, %v7879_v22  ;;  %6281 = vmatpush3.bf16.msra.mxu0 %v6821_v35  ;;  %v6846_v35 = vld [vmem:[#allocation36 + $0x8] sm:$0xff]  }
 0xa32   :  { %6282 = vmatprep.subr.bf16.mxu0 %v7879_v22 }
 0xa35   :  { %6283 = vmatpush3.bf16.msra.mxu0 %v6822_v37  ;;  %v6847_v37 = vld [vmem:[#allocation36 + $0x10] sm:$0xff]  }
 0xa36   :  { %6284 = vmatprep.subr.bf16.mxu0 %v7879_v22 }
 0xa39   :  { %6285 = vmatpush3.bf16.msra.mxu0 %v6823_v39  ;;  %v6848_v39 = vld [vmem:[#allocation36 + $0x18] sm:$0xff]  }
 0xa3a   :  { %6286 = vmatprep.subr.bf16.mxu0 %v7879_v22 }
 0xa3d   :  { %6287 = vmatpush3.bf16.msra.mxu0 %v6824_v40  ;;  %v6849_v40 = vld [vmem:[#allocation36 + $0x20] sm:$0xff]  }
 0xa3e   :  { %6288 = vmatprep.subr.bf16.mxu0 %v7879_v22 }
 0xa41   :  { %6289 = vmatpush3.bf16.msra.mxu0 %v6825_v41  ;;  %v6850_v41 = vld [vmem:[#allocation36 + $0x28] sm:$0xff]  }
 0xa42   :  { %6290 = vmatprep.subr.bf16.mxu0 %v7879_v22 }
 0xa45   :  { %6291 = vmatpush3.bf16.msra.mxu0 %v6826_v42  ;;  %v5687_v42 = vld [vmem:[#allocation31] ss:$0 sm:$0xff] }
 0xa46   :  { %6292 = vmatprep.subr.bf16.mxu0 %v7879_v22 }
 0xa49   :  { %6293 = vmatpush3.bf16.msra.mxu0 %v6827_v51 }
 0xa4a   :  { %6294 = vmatprep.subr.bf16.mxu0 %v7879_v22 }
 0xa4d   :  { %6295 = vmatpush3.bf16.msra.mxu0 %v6828_v53 }
 0xa4e   :  { %6320 = vmatprep.subr.bf16.mxu0 %v7879_v22 }
 0xb03   :  { %v2982_v44 = vpop.f32.mrb[20].mxu0 }
 0xb04   :  { %v2983_v45 = vadd.f32 %v5660_v43, %v2982_v44  ;;  %v6258_v46 = vpop.f32.mrb[21].mxu0 }
 0xb05   :  { %v2985_v47 = vpop.f32.mrb[22].mxu0 }
 0xb06   :  { %v2988_v48 = vmax.f32 %v2983_v45, 0.0  ;;  %v6259_v49 = vpop.f32.mrb[23].mxu0 }
 0xb08   :  { %v2989_v50 = vpack.c.bf16 %v2988_v48, %v2988_v48 }
 0xb0a   :  { %6277 = vmatmul.mubr.bf16.vlgmr.msra.gmra.mrb[24].mxu1 %v2989_v50 }
 0xb0b   :  { %6316 = vmatprep.mubr.msk.bf16.mxu1 %vm7880_vm0, %v7879_v22  ;;  %6301 = vmatpush3.bf16.msra.mxu1 %v6829_v54 }
 0xb0c   :  { %6302 = vmatprep.subr.bf16.mxu1 %v7879_v22 }
 0xb0f   :  { %6303 = vmatpush3.bf16.msra.mxu1 %v6830_v57  ;;  %v6855_v57 = vld [vmem:[#allocation37 + $0x4] ss:$8 sps:$4 sm:$0xff]  }
 0xb10   :  { %6304 = vmatprep.subr.bf16.mxu1 %v7879_v22 }
 0xb13   :  { %6305 = vmatpush3.bf16.msra.mxu1 %v6831_v58  ;;  %v6858_v58 = vld [vmem:[#allocation37 + $0x14] ss:$8 sps:$4 sm:$0xff]  }
 0xb14   :  { %6306 = vmatprep.subr.bf16.mxu1 %v7879_v22 }
 0xb17   :  { %6307 = vmatpush3.bf16.msra.mxu1 %v6832_v59  ;;  %v6861_v59 = vld [vmem:[#allocation37 + $0x24] ss:$8 sps:$4 sm:$0xff]  }
 0xb18   :  { %6308 = vmatprep.subr.bf16.mxu1 %v7879_v22 }
 0xb1b   :  { %6309 = vmatpush3.bf16.msra.mxu1 %v6833_v60  ;;  %v6859_v60 = vld [vmem:[#allocation37 + $0x20] ss:$8 sps:$4 sm:$0xff]  }
 0xb1c   :  { %6310 = vmatprep.subr.bf16.mxu1 %v7879_v22 }
 0xb1f   :  { %6311 = vmatpush3.bf16.msra.mxu1 %v6834_v61  ;;  %v6864_v61 = vld [vmem:[#allocation37 + $0x34] ss:$8 sps:$4 sm:$0xff]  }
 0xb20   :  { %6312 = vmatprep.subr.bf16.mxu1 %v7879_v22 }
 0xb23   :  { %6313 = vmatpush3.bf16.msra.mxu1 %v6835_v6 }
 0xb24   :  { %6314 = vmatprep.subr.bf16.mxu1 %v7879_v22 }
 0xb27   :  { %6315 = vmatpush3.bf16.msra.mxu1 %v6836_v26 }
 0xb28   :  { %6340 = vmatprep.subr.bf16.mxu1 %v7879_v22 }
 0xbdd   :  { %v3095_v63 = vpop.f32.mrb[24].mxu1 }
 0xbde   :  { %v3096_v0 = vadd.f32 %v5669_v62, %v3095_v63  ;;  %v6278_v1 = vpop.f32.mrb[25].mxu1  ;;  %v6862_v62 = vld [vmem:[#allocation37 + $0x30] ss:$8 sps:$4 sm:$0xff]   ;;  %v6867_v63 = vld [vmem:[#allocation37 + $0x44] ss:$8 sps:$4 sm:$0xff]  }
 0xbdf   :  { %v3098_v3 = vpop.f32.mrb[26].mxu1  ;;  %v6870_v1 = vld [vmem:[#allocation37 + $0x54] ss:$8 sps:$4 sm:$0xff]  }
 0xbe0   :  { %v8435_v4 = vmax.f32 %v3096_v0, 0.0  ;;  %v6279_v5 = vpop.f32.mrb[27].mxu1  ;;  %v6865_v0 = vld [vmem:[#allocation37 + $0x40] ss:$8 sps:$4 sm:$0xff]   ;;  %v6868_v3 = vld [vmem:[#allocation37 + $0x50] ss:$8 sps:$4 sm:$0xff]  }
 0xbe1   :  { %v6871_v5 = vld [vmem:[#allocation37 + $0x60] ss:$8 sps:$4 sm:$0xff]  }
 0xbe2   :  { %v3102_v55 = vpack.c.bf16 %v8435_v4, %v8435_v4 }
 0xbe4   :  { %6297 = vmatmul.mubr.bf16.vlgmr.msra.gmra.mrb[24].mxu0 %v3102_v55 }
 0xbe5   :  { %6336 = vmatprep.mubr.msk.bf16.mxu0 %vm7880_vm0, %v7879_v22  ;;  %6321 = vmatpush3.bf16.msra.mxu0 %v6837_v7 }
 0xbe6   :  { %6322 = vmatprep.subr.bf16.mxu0 %v7879_v22 }
 0xbe9   :  { %6323 = vmatpush3.bf16.msra.mxu0 %v6838_v19 }
 0xbea   :  { %6324 = vmatprep.subr.bf16.mxu0 %v7879_v22 }
 0xbed   :  { %6325 = vmatpush3.bf16.msra.mxu0 %v6839_v20 }
 0xbee   :  { %6326 = vmatprep.subr.bf16.mxu0 %v7879_v22 }
 0xbf1   :  { %6327 = vmatpush3.bf16.msra.mxu0 %v6840_v21 }
 0xbf2   :  { %6328 = vmatprep.subr.bf16.mxu0 %v7879_v22 }
 0xbf5   :  { %6329 = vmatpush3.bf16.msra.mxu0 %v6841_v52 }
 0xbf6   :  { %6330 = vmatprep.subr.bf16.mxu0 %v7879_v22 }
 0xbf9   :  { %6331 = vmatpush3.bf16.msra.mxu0 %v6842_v15 }
 0xbfa   :  { %6332 = vmatprep.subr.bf16.mxu0 %v7879_v22 }
 0xbfd   :  { %6333 = vmatpush3.bf16.msra.mxu0 %v6843_v32  ;;  %v6904_v32 = vld [vmem:[#allocation40 + $0xc8] ss:$12 sps:$4 sm:$0xff]  }
 0xbfe   :  { %6334 = vmatprep.subr.bf16.mxu0 %v7879_v22 }
 0xc01   :  { %6335 = vmatpush3.bf16.msra.mxu0 %v6844_v33  ;;  %v6883_v33 = vld [vmem:[#allocation40 + $0x30] ss:$12 sps:$4 sm:$0xff]  }
 0xc02   :  { %6360 = vmatprep.subr.bf16.mxu0 %v7879_v22 }
 0xcb7   :  { %v3208_v24 = vpop.f32.mrb[24].mxu0 }
 0xcb8   :  { %v3209_v27 = vadd.f32 %v5678_v23, %v3208_v24  ;;  %v6298_v28 = vpop.f32.mrb[25].mxu0  ;;  %v6876_v24 = vld [vmem:[#allocation37 + $0x74] ss:$8 sps:$4 sm:$0xff]  }
 0xcb9   :  { %v3211_v25 = vpop.f32.mrb[26].mxu0  ;;  %v6877_v28 = vld [vmem:[#allocation40] ss:$12 sps:$4 sm:$0xff]  }
 0xcba   :  { %v3214_v29 = vmax.f32 %v3209_v27, 0.0  ;;  %v6299_v30 = vpop.f32.mrb[27].mxu0  ;;  %v6874_v27 = vld [vmem:[#allocation37 + $0x70] ss:$8 sps:$4 sm:$0xff]  }
 0xcbb   :  { %v6879_v25 = vld [vmem:[#allocation40 + $0x4] ss:$12 sps:$4 sm:$0xff]  }
 0xcbc   :  { %v3215_v31 = vpack.c.bf16 %v3214_v29, %v3214_v29  ;;  %v6882_v29 = vld [vmem:[#allocation40 + $0x1c] ss:$12 sps:$4 sm:$0xff]   ;;  %v6880_v30 = vld [vmem:[#allocation40 + $0x18] ss:$12 sps:$4 sm:$0xff]  }
 0xcbe   :  { %6317 = vmatmul.mubr.bf16.vlgmr.msra.gmra.mrb[28].mxu1 %v3215_v31  ;;  %v6885_v31 = vld [vmem:[#allocation40 + $0x34] ss:$12 sps:$4 sm:$0xff]  }
 0xcbf   :  { %6356 = vmatprep.mubr.msk.bf16.mxu1 %vm7880_vm0, %v7879_v22  ;;  %6341 = vmatpush3.bf16.msra.mxu1 %v6845_v34  ;;  %v6888_v34 = vld [vmem:[#allocation40 + $0x4c] ss:$12 sps:$4 sm:$0xff]  }
 0xcc0   :  { %6342 = vmatprep.subr.bf16.mxu1 %v7879_v22 }
 0xcc3   :  { %6343 = vmatpush3.bf16.msra.mxu1 %v6846_v35  ;;  %v6886_v35 = vld [vmem:[#allocation40 + $0x48] ss:$12 sps:$4 sm:$0xff]  }
 0xcc4   :  { %6344 = vmatprep.subr.bf16.mxu1 %v7879_v22 }
 0xcc7   :  { %6345 = vmatpush3.bf16.msra.mxu1 %v6847_v37  ;;  %v6891_v37 = vld [vmem:[#allocation40 + $0x64] ss:$12 sps:$4 sm:$0xff]  }
 0xcc8   :  { %6346 = vmatprep.subr.bf16.mxu1 %v7879_v22 }
 0xccb   :  { %6347 = vmatpush3.bf16.msra.mxu1 %v6848_v39  ;;  %v6889_v39 = vld [vmem:[#allocation40 + $0x60] ss:$12 sps:$4 sm:$0xff]  }
 0xccc   :  { %6348 = vmatprep.subr.bf16.mxu1 %v7879_v22 }
 0xccf   :  { %6349 = vmatpush3.bf16.msra.mxu1 %v6849_v40  ;;  %v6894_v40 = vld [vmem:[#allocation40 + $0x7c] ss:$12 sps:$4 sm:$0xff]  }
 0xcd0   :  { %6350 = vmatprep.subr.bf16.mxu1 %v7879_v22 }
 0xcd3   :  { %6351 = vmatpush3.bf16.msra.mxu1 %v6850_v41  ;;  %v6892_v41 = vld [vmem:[#allocation40 + $0x78] ss:$12 sps:$4 sm:$0xff]  }
 0xcd4   :  { %6352 = vmatprep.subr.bf16.mxu1 %v7879_v22 }
 0xd91   :  { %v3321_v43 = vpop.f32.mrb[28].mxu1 }
 0xd92   :  { %v3322_v44 = vadd.f32 %v5687_v42, %v3321_v43  ;;  %v6318_v45 = vpop.f32.mrb[29].mxu1  ;;  %v6897_v42 = vld [vmem:[#allocation40 + $0x94] ss:$12 sps:$4 sm:$0xff]   ;;  %v6895_v43 = vld [vmem:[#allocation40 + $0x90] ss:$12 sps:$4 sm:$0xff]  }
 0xd93   :  { %v3324_v46 = vpop.f32.mrb[30].mxu1  ;;  %v6898_v45 = vld [vmem:[#allocation40 + $0xa8] ss:$12 sps:$4 sm:$0xff]  }
 0xd94   :  { %v3327_v47 = vadd.f32 %v3322_v44, %v8435_v4  ;;  %v6319_v48 = vpop.f32.mrb[31].mxu1  ;;  %v6873_v4 = vld [vmem:[#allocation37 + $0x64] ss:$8 sps:$4 sm:$0xff]  }
 0xd95   :  { %v6900_v44 = vld [vmem:[#allocation40 + $0xac] ss:$12 sps:$4 sm:$0xff]   ;;  %v6903_v46 = vld [vmem:[#allocation40 + $0xc4] ss:$12 sps:$4 sm:$0xff]   ;;  %v6908_v48 = vld [vmem:[#allocation40 + $0xdc] ss:$12 sps:$4 sm:$0xff]  }
 0xd96   :  { %v3328_v49 = vmax.f32 %v3327_v47, 0.0  ;;  %v6901_v47 = vld [vmem:[#allocation40 + $0xc0] ss:$12 sps:$4 sm:$0xff]  }
 0xd98   :  { %v3329_v50 = vpack.c.bf16 %v3328_v49, %v3328_v49  ;;  %v6906_v49 = vld [vmem:[#allocation40 + $0xd8] ss:$12 sps:$4 sm:$0xff]  }
 0xd9a   :  { %6337 = vmatmul.mubr.bf16.vlgmr.msra.gmra.mrb[28].mxu0 %v3329_v50  ;;  %v6913_v50 = vld [vmem:[#allocation40 + $0xf4] ss:$12 sps:$4 sm:$0xff]  }
 0xd9b   :  { %6361 = vmatpush3.bf16.msra.mxu0 %v8341_v8  ;;  %6376 = vmatprep.mubr.msk.bf16.mxu0 %vm7880_vm0, %v7879_v22  ;;  %v6851_v8 = vld [vmem:[#allocation36 + $0x30] sm:$0xff]  }
 0xd9c   :  { %6362 = vmatprep.subr.bf16.mxu0 %v7879_v22  ;;  %6353 = vmatpush3.bf16.msra.mxu1 %v6851_v8  ;;  %v6911_v8 = vld [vmem:[#allocation40 + $0xf0] ss:$12 sps:$4 sm:$0xff]  }
 0xd9d   :  { %6354 = vmatprep.subr.bf16.mxu1 %v7879_v22 }
 0xd9f   :  { %6363 = vmatpush3.bf16.msra.mxu0 %v8345_v9  ;;  %v6852_v9 = vld [vmem:[#allocation36 + $0x38] sm:$0xff]  }
 0xda0   :  { %6364 = vmatprep.subr.bf16.mxu0 %v7879_v22  ;;  %6355 = vmatpush3.bf16.msra.mxu1 %v6852_v9  ;;  %v6918_v9 = vld [vmem:[#allocation40 + $0x10c] ss:$12 sps:$4 sm:$0xff]  }
 0xda1   :  { %3704 = vmatprep.subr.bf16.mxu1 %v6855_v57 }
 0xda3   :  { %6365 = vmatpush3.bf16.msra.mxu0 %v8349_v10  ;;  %v5696_v10 = vld [vmem:[#allocation34] ss:$0 sm:$0xff] }
 0xda4   :  { %6366 = vmatprep.subr.bf16.mxu0 %v7879_v22 }
 0xda7   :  { %6367 = vmatpush3.bf16.msra.mxu0 %v8353_v11 }
 0xda8   :  { %6368 = vmatprep.subr.bf16.mxu0 %v7879_v22 }
 0xdab   :  { %6369 = vmatpush3.bf16.msra.mxu0 %v8357_v12 }
 0xdac   :  { %6370 = vmatprep.subr.bf16.mxu0 %v7879_v22 }
 0xdaf   :  { %6371 = vmatpush3.bf16.msra.mxu0 %v8361_v14 }
 0xdb0   :  { %6372 = vmatprep.subr.bf16.mxu0 %v7879_v22 }
 0xdb3   :  { %6373 = vmatpush3.bf16.msra.mxu0 %v8364_v17 }
 0xdb4   :  { %6374 = vmatprep.subr.bf16.mxu0 %v7879_v22  ;;  %v6856_v22 = vld [vmem:[#allocation37 + $0x10] ss:$8 sps:$4 sm:$0xff]  }
 0xdb7   :  { %6375 = vmatpush3.bf16.msra.mxu0 %v8368_v18  ;;  %v6853_v18 = vld [vmem:[#allocation37] ss:$8 sps:$4 sm:$0xff]  }
 0xdb8   :  { %4086 = vmatprep.subr.bf16.mxu0 %v6879_v25 }
 0xe6d   :  { %v3435_v11 = vpop.f32.mrb[28].mxu0 }
 0xe6e   :  { %v3436_v12 = vadd.f32 %v5696_v10, %v3435_v11  ;;  %v6338_v51 = vpop.f32.mrb[29].mxu0  ;;  %v6916_v10 = vld [vmem:[#allocation40 + $0x108] ss:$12 sps:$4 sm:$0xff]   ;;  %v6923_v11 = vld [vmem:[#allocation40 + $0x124] ss:$12 sps:$4 sm:$0xff]  }
 0xe6f   :  { %v3438_v53 = vpop.f32.mrb[30].mxu0  ;;  %v6928_v51 = vld [vmem:[#allocation40 + $0x13c] ss:$12 sps:$4 sm:$0xff]  }
 0xe70   :  { %v8478_v14 = vmax.f32 %v3436_v12, 0.0  ;;  %v6339_v54 = vpop.f32.mrb[31].mxu0  ;;  %v6921_v12 = vld [vmem:[#allocation40 + $0x120] ss:$12 sps:$4 sm:$0xff]   ;;  %v6926_v53 = vld [vmem:[#allocation40 + $0x138] ss:$12 sps:$4 sm:$0xff]  }
 0xe72   :  { %v3442_v17 = vpack.c.bf16 %v8478_v14, %v8478_v14 }
 0xe74   :  { %6357 = vmatmul.mubr.bf16.vlgmr.msra.gmra.mrb[32].mxu1 %v3442_v17 }
 0xe75   :  { %3736 = vmatprep.mubr.bf16.mxu1 %v7878_v56  ;;  %3705 = vmatpush1.bf16.msra.mxu1 %v6853_v18 }
 0xe76   :  { %3706 = vmatprep.subr.bf16.mxu1 %v6858_v58  ;;  %v6905_v58 = vld [vmem:[#allocation40 + $0x8] ss:$12 sps:$4 sm:$0xff]  }
 0xe79   :  { %3707 = vmatpush1.bf16.msra.mxu1 %v6856_v22 }
 0xe7a   :  { %3708 = vmatprep.subr.bf16.mxu1 %v6861_v59 }
 0xe7d   :  { %3709 = vmatpush1.bf16.msra.mxu1 %v6859_v60  ;;  %v6909_v60 = vld [vmem:[#allocation40 + $0xe0] ss:$12 sps:$4 sm:$0xff]  }
 0xe7e   :  { %3710 = vmatprep.subr.bf16.mxu1 %v6864_v61  ;;  %v6910_v61 = vld [vmem:[#allocation40 + $0x20] ss:$12 sps:$4 sm:$0xff]  }
 0xe81   :  { %3711 = vmatpush1.bf16.msra.mxu1 %v6862_v62  ;;  %v6914_v62 = vld [vmem:[#allocation40 + $0xf8] ss:$12 sps:$4 sm:$0xff]  }
 0xe82   :  { %3712 = vmatprep.subr.bf16.mxu1 %v6867_v63  ;;  %v6915_v63 = vld [vmem:[#allocation40 + $0x38] ss:$12 sps:$4 sm:$0xff]  }
 0xe85   :  { %3713 = vmatpush1.bf16.msra.mxu1 %v6865_v0  ;;  %v6919_v0 = vld [vmem:[#allocation40 + $0x110] ss:$12 sps:$4 sm:$0xff]  }
 0xe86   :  { %3714 = vmatprep.subr.bf16.mxu1 %v6870_v1  ;;  %v6920_v1 = vld [vmem:[#allocation40 + $0x50] ss:$12 sps:$4 sm:$0xff]  }
 0xe89   :  { %3715 = vmatpush1.bf16.msra.mxu1 %v6868_v3  ;;  %v6924_v3 = vld [vmem:[#allocation40 + $0x128] ss:$12 sps:$4 sm:$0xff]  }
 0xe8a   :  { %3716 = vmatprep.subr.bf16.mxu1 %v6873_v4  ;;  %v6929_v4 = vld [vmem:[#allocation40 + $0x140] ss:$12 sps:$4 sm:$0xff]  }
 0xe8d   :  { %3717 = vmatpush1.bf16.msra.mxu1 %v6871_v5  ;;  %v6930_v5 = vld [vmem:[#allocation40 + $0x80] ss:$12 sps:$4 sm:$0xff]  }
 0xe8e   :  { %3718 = vmatprep.subr.bf16.mxu1 %v6876_v24  ;;  %v3612_v24 = vld [vmem:[#allocation39] sm:$0x3] }
 0xe91   :  { %3719 = vmatpush1.bf16.msra.mxu1 %v6874_v27  ;;  %v3617_v27 = vrot.slane %v3612_v24, %v8293_v36 }
 0xe92   :  { %6118 = vmatprep.subr.bf16.mxu1 %v6904_v32 }
 0xf47   :  { %v3541_v55 = vpop.f32.mrb[32].mxu1 }
 0xf48   :  { %v3547_v6 = vsub.f32 0.0, %v3541_v55  ;;  %v6358_v26 = vpop.f32.mrb[33].mxu1  ;;  %v6933_v55 = vld [vmem:[#allocation40 + $0x154] ss:$12 sps:$4 sm:$0xff]  }
 0xf49   :  { %v3544_v7 = vpop.f32.mrb[34].mxu1  ;;  %v6931_v26 = vld [vmem:[#allocation40 + $0x150] ss:$12 sps:$4 sm:$0xff]  }
 0xf4a   :  { %v3548_v19 = vmul.f32 1.442695, %v3547_v6  ;;  %v6359_v20 = vpop.f32.mrb[35].mxu1  ;;  %v6934_v6 = vld [vmem:[#allocation40 + $0x158] ss:$12 sps:$4 sm:$0xff]  }
 0xf4b   :  { %v6935_v7 = vld [vmem:[#allocation40 + $0x98] ss:$12 sps:$4 sm:$0xff]   ;;  %v6939_v20 = vld [vmem:[#allocation40 + $0x170] ss:$12 sps:$4 sm:$0xff]  }
 0xf4c   :  { %7161 = vpow2.f32 %v3548_v19  ;;  %v6938_v19 = vld [vmem:[#allocation40 + $0x16c] ss:$12 sps:$4 sm:$0xff]  }
 0xf56   :  { %v7162_v21 = vpop.eup %7161 }
 0xf57   :  { %v3550_v52 = vadd.f32 1.0, %v7162_v21  ;;  %v6936_v21 = vld [vmem:[#allocation40 + $0x168] ss:$12 sps:$4 sm:$0xff]  }
 0xf59   :  { %7163 = vrcp.f32 %v3550_v52  ;;  %v6940_v52 = vld [vmem:[#allocation40 + $0xb0] ss:$12 sps:$4 sm:$0xff]  }
 0xf63   :  { %v7164_v15 = vpop.eup %7163 }
 0xf64   :  { %v3553_v23 = vpack.c.bf16 %v7164_v15, %v7164_v15  ;;  %v6943_v15 = vld [vmem:[%s8039_s3 + $0x4] ss:$24 sps:$4 sm:$0xff]  }
 0xf66   :  { %6377 = vmatmul.mubr.bf16.vlgmr.msra.gmra.mrb[32].mxu0 %v3553_v23  ;;  %v6946_v23 = vld [vmem:[%s8039_s3 + $0xc] ss:$24 sps:$4 sm:$0xff]  }
 0xf67   :  { %4087 = vmatpush1.bf16.msra.mxu0 %v6877_v28  ;;  %v3621_v28 = vrot.slane %v3612_v24, %v8297_v38  ;;  %v7010_v24 = vld [vmem:[%s8039_s3 + $0x218] ss:$24 sps:$4 sm:$0xff]  }
 0xf68   :  { %4088 = vmatprep.subr.bf16.mxu0 %v6882_v29 }
 0xf6b   :  { %4089 = vmatpush1.bf16.msra.mxu0 %v6880_v30 }
 0xf6c   :  { %4090 = vmatprep.subr.bf16.mxu0 %v6885_v31 }
 0xf6f   :  { %4091 = vmatpush1.bf16.msra.mxu0 %v6883_v33 }
 0xf70   :  { %4092 = vmatprep.subr.bf16.mxu0 %v6888_v34 }
 0xf73   :  { %4093 = vmatpush1.bf16.msra.mxu0 %v6886_v35 }
 0xf74   :  { %4094 = vmatprep.subr.bf16.mxu0 %v6891_v37 }
 0xf77   :  { %4095 = vmatpush1.bf16.msra.mxu0 %v6889_v39  ;;  %v6941_v39 = vld [vmem:[%s8039_s3] ss:$24 sps:$4 sm:$0xff]  }
 0xf78   :  { %4096 = vmatprep.subr.bf16.mxu0 %v6894_v40  ;;  %v6944_v40 = vld [vmem:[%s8039_s3 + $0x8] ss:$24 sps:$4 sm:$0xff]  }
 0xf7b   :  { %4097 = vmatpush1.bf16.msra.mxu0 %v6892_v41 }
 0xf7c   :  { %4098 = vmatprep.subr.bf16.mxu0 %v6897_v42  ;;  %v6949_v42 = vld [vmem:[%s8039_s3 + $0x34] ss:$24 sps:$4 sm:$0xff]  }
 0xf7f   :  { %4099 = vmatpush1.bf16.msra.mxu0 %v6895_v43  ;;  %v6952_v43 = vld [vmem:[%s8039_s3 + $0x3c] ss:$24 sps:$4 sm:$0xff]  }
 0xf80   :  { %4100 = vmatprep.subr.bf16.mxu0 %v6900_v44  ;;  %v6947_v44 = vld [vmem:[%s8039_s3 + $0x30] ss:$24 sps:$4 sm:$0xff]  }
 0xf83   :  { %4101 = vmatpush1.bf16.msra.mxu0 %v6898_v45  ;;  %v6950_v45 = vld [vmem:[%s8039_s3 + $0x38] ss:$24 sps:$4 sm:$0xff]  }
 0xf84   :  { %4102 = vmatprep.subr.bf16.mxu0 %v6903_v46  ;;  %v6955_v46 = vld [vmem:[%s8039_s3 + $0x64] ss:$24 sps:$4 sm:$0xff]  }
 0xf87   :  { %4103 = vmatpush1.bf16.msra.mxu0 %v6901_v47  ;;  %v6958_v47 = vld [vmem:[%s8039_s3 + $0x6c] ss:$24 sps:$4 sm:$0xff]  }
 0xf88   :  { %4104 = vmatprep.subr.bf16.mxu0 %v6908_v48  ;;  %v6953_v48 = vld [vmem:[%s8039_s3 + $0x60] ss:$24 sps:$4 sm:$0xff]  }
 0xf8b   :  { %4105 = vmatpush1.bf16.msra.mxu0 %v6906_v49  ;;  %v6956_v49 = vld [vmem:[%s8039_s3 + $0x68] ss:$24 sps:$4 sm:$0xff]  }
 0xf8c   :  { %4106 = vmatprep.subr.bf16.mxu0 %v6913_v50  ;;  %v6961_v50 = vld [vmem:[%s8039_s3 + $0x94] ss:$24 sps:$4 sm:$0xff]  }
 0xf8f   :  { %4107 = vmatpush1.bf16.msra.mxu0 %v6911_v8  ;;  %v6964_v8 = vld [vmem:[%s8039_s3 + $0x9c] ss:$24 sps:$4 sm:$0xff]  }
 0xf90   :  { %4108 = vmatprep.subr.bf16.mxu0 %v6918_v9  ;;  %v6959_v9 = vld [vmem:[%s8039_s3 + $0x90] ss:$24 sps:$4 sm:$0xff]  }
 0xf93   :  { %4109 = vmatpush1.bf16.msra.mxu0 %v6916_v10  ;;  %v6962_v10 = vld [vmem:[%s8039_s3 + $0x98] ss:$24 sps:$4 sm:$0xff]  }
 0xf94   :  { %4110 = vmatprep.subr.bf16.mxu0 %v6923_v11  ;;  %v6967_v11 = vld [vmem:[%s8039_s3 + $0xc4] ss:$24 sps:$4 sm:$0xff]  }
 0xf97   :  { %4111 = vmatpush1.bf16.msra.mxu0 %v6921_v12  ;;  %v6970_v12 = vld [vmem:[%s8039_s3 + $0xcc] ss:$24 sps:$4 sm:$0xff]  }
 0xf98   :  { %4112 = vmatprep.subr.bf16.mxu0 %v6928_v51  ;;  %v6965_v51 = vld [vmem:[%s8039_s3 + $0xc0] ss:$24 sps:$4 sm:$0xff]  }
 0xf9b   :  { %4113 = vmatpush1.bf16.msra.mxu0 %v6926_v53  ;;  %v6968_v53 = vld [vmem:[%s8039_s3 + $0xc8] ss:$24 sps:$4 sm:$0xff]  }
 0xf9c   :  { %4114 = vmatprep.subr.bf16.mxu0 %v6933_v55  ;;  %v7000_v55 = vld [vmem:[%s8039_s3 + $0x1bc] ss:$24 sps:$4 sm:$0xff]  }
 0xf9f   :  { %4115 = vmatpush1.bf16.msra.mxu0 %v6931_v26  ;;  %v6998_v26 = vld [vmem:[%s8039_s3 + $0x1b8] ss:$24 sps:$4 sm:$0xff]  }
 0xfa0   :  { %4116 = vmatprep.subr.bf16.mxu0 %v6938_v19  ;;  %v7006_v19 = vld [vmem:[%s8039_s3 + $0x1ec] ss:$24 sps:$4 sm:$0xff]  }
 0xfa3   :  { %4117 = vmatpush1.bf16.msra.mxu0 %v6936_v21  ;;  %v7004_v21 = vld [vmem:[%s8039_s3 + $0x1e8] ss:$24 sps:$4 sm:$0xff]  }
 0xfa4   :  { %5151 = vmatprep.subr.bf16.mxu0 %v6946_v23  ;;  %v7007_v23 = vld [vmem:[%s8039_s3 + $0x210] ss:$24 sps:$4 sm:$0xff]  }
0x1039   :  { %v3588_v54 = vpop.f32.mrb[32].mxu0 }
0x103a   :  { %v3594_v17 = vmul.f32 %v3588_v54, %v8478_v14  ;;  %v6378_v18 = vpop.f32.mrb[33].mxu0  ;;  %v6925_v14 = vld [vmem:[#allocation40 + $0x68] ss:$12 sps:$4 sm:$0xff]   ;;  %v6973_v54 = vld [vmem:[%s8039_s3 + $0xf4] ss:$24 sps:$4 sm:$0xff]  }
0x103b   :  { %v3591_v57 = vpop.f32.mrb[34].mxu0  ;;  %v6971_v18 = vld [vmem:[%s8039_s3 + $0xf0] ss:$24 sps:$4 sm:$0xff]  }
0x103c   :  { %v3595_v22 = vpack.c.bf16 %v3594_v17, %v3594_v17  ;;  %v6379_v59 = vpop.f32.mrb[35].mxu0  ;;  %v6976_v17 = vld [vmem:[%s8039_s3 + $0xfc] ss:$24 sps:$4 sm:$0xff]   ;;  %v6974_v57 = vld [vmem:[%s8039_s3 + $0xf8] ss:$24 sps:$4 sm:$0xff]  }
0x103d   :  { %v6977_v59 = vld [vmem:[%s8039_s3 + $0x120] ss:$24 sps:$4 sm:$0xff]  }
0x103e   :  { %3737 = vmatmul.mubr.bf16.vlgmr.msra.gmra.mrb[36].mxu1 %v3595_v22  ;;  %v6982_v22 = vld [vmem:[%s8039_s3 + $0x12c] ss:$24 sps:$4 sm:$0xff]  }
0x103f   :  { %6119 = vmatpush3.bf16.msra.mxu1 %v6905_v58  ;;  %v6979_v58 = vld [vmem:[%s8039_s3 + $0x124] ss:$24 sps:$4 sm:$0xff]  }
0x1040   :  { %6120 = vmatprep.subr.bf16.mxu1 %v6909_v60  ;;  %v6980_v60 = vld [vmem:[%s8039_s3 + $0x128] ss:$24 sps:$4 sm:$0xff]  }
0x1043   :  { %6121 = vmatpush3.bf16.msra.mxu1 %v6910_v61  ;;  %v6985_v61 = vld [vmem:[%s8039_s3 + $0x154] ss:$24 sps:$4 sm:$0xff]  }
0x1044   :  { %6122 = vmatprep.subr.bf16.mxu1 %v6914_v62  ;;  %v6988_v62 = vld [vmem:[%s8039_s3 + $0x15c] ss:$24 sps:$4 sm:$0xff]  }
0x1047   :  { %6123 = vmatpush3.bf16.msra.mxu1 %v6915_v63  ;;  %v6983_v63 = vld [vmem:[%s8039_s3 + $0x150] ss:$24 sps:$4 sm:$0xff]  }
0x1048   :  { %6124 = vmatprep.subr.bf16.mxu1 %v6919_v0  ;;  %v6986_v0 = vld [vmem:[%s8039_s3 + $0x158] ss:$24 sps:$4 sm:$0xff]  }
0x104b   :  { %6125 = vmatpush3.bf16.msra.mxu1 %v6920_v1  ;;  %v6991_v1 = vld [vmem:[%s8039_s3 + $0x184] ss:$24 sps:$4 sm:$0xff]  }
0x104c   :  { %6126 = vmatprep.subr.bf16.mxu1 %v6924_v3  ;;  %v6994_v3 = vld [vmem:[%s8039_s3 + $0x18c] ss:$24 sps:$4 sm:$0xff]  }
0x104f   :  { %6127 = vmatpush3.bf16.msra.mxu1 %v6925_v14  ;;  %v6989_v14 = vld [vmem:[%s8039_s3 + $0x180] ss:$24 sps:$4 sm:$0xff]  }
0x1050   :  { %6128 = vmatprep.subr.bf16.mxu1 %v6929_v4  ;;  %v6992_v4 = vld [vmem:[%s8039_s3 + $0x188] ss:$24 sps:$4 sm:$0xff]  }
0x1053   :  { %6129 = vmatpush3.bf16.msra.mxu1 %v6930_v5  ;;  %v6997_v5 = vld [vmem:[%s8039_s3 + $0x1b4] ss:$24 sps:$4 sm:$0xff]  }
0x1054   :  { %6130 = vmatprep.subr.bf16.mxu1 %v6934_v6  ;;  %v6995_v6 = vld [vmem:[%s8039_s3 + $0x1b0] ss:$24 sps:$4 sm:$0xff]  }
0x1057   :  { %6131 = vmatpush3.bf16.msra.mxu1 %v6935_v7  ;;  %v7003_v7 = vld [vmem:[%s8039_s3 + $0x1e4] ss:$24 sps:$4 sm:$0xff]  }
0x1058   :  { %6132 = vmatprep.subr.bf16.mxu1 %v6939_v20  ;;  %v7001_v20 = vld [vmem:[%s8039_s3 + $0x1e0] ss:$24 sps:$4 sm:$0xff]  }
0x105b   :  { %6133 = vmatpush3.bf16.msra.mxu1 %v6940_v52  ;;  %v7009_v52 = vld [vmem:[%s8039_s3 + $0x214] ss:$24 sps:$4 sm:$0xff]  }
0x105c   :  { %5069 = vmatprep.subr.bf16.mxu1 %v6943_v15  ;;  %v7012_v15 = vld [vmem:[%s8039_s3 + $0x21c] ss:$24 sps:$4 sm:$0xff]  }
0x1111   :  { %v3738_v25 = vpop.f32.mrb[36].mxu1 }
0x1112   :  { %v3739_v29 = vadd.f32 %v3738_v25, %v3617_v27  ;;  %v3740_v30 = vpop.f32.mrb[37].mxu1  ;;  %v7015_v27 = vld [vmem:[%s8039_s3 + $0x244] ss:$24 sps:$4 sm:$0xff]   ;;  %v7013_v25 = vld [vmem:[%s8039_s3 + $0x240] ss:$24 sps:$4 sm:$0xff]  }
0x1113   :  { %v3741_v31 = vadd.f32 %v3740_v30, %v3621_v28  ;;  %v3742_v32 = vpop.f32.mrb[38].mxu1  ;;  %v7018_v28 = vld [vmem:[%s8039_s3 + $0x24c] ss:$24 sps:$4 sm:$0xff]  }
0x1114   :  { %v3745_v33 = vmax.f32 %v3739_v29, 0.0  ;;  %v3743_v34 = vpop.f32.mrb[39].mxu1  ;;  %v7016_v29 = vld [vmem:[%s8039_s3 + $0x248] ss:$24 sps:$4 sm:$0xff]   ;;  %v7021_v30 = vld [vmem:[%s8039_s3 + $0x274] ss:$24 sps:$4 sm:$0xff]  }
0x1115   :  { %v3746_v35 = vmax.f32 %v3741_v31, 0.0  ;;  %v7024_v31 = vld [vmem:[%s8039_s3 + $0x27c] ss:$24 sps:$4 sm:$0xff]   ;;  %v7019_v32 = vld [vmem:[%s8039_s3 + $0x270] ss:$24 sps:$4 sm:$0xff]  }
0x1116   :  { %v3747_v41 = vpack.c.bf16 %v3745_v33, %v3745_v33  ;;  %v7022_v33 = vld [vmem:[%s8039_s3 + $0x278] ss:$24 sps:$4 sm:$0xff]   ;;  %v7027_v34 = vld [vmem:[%s8039_s3 + $0x2a4] ss:$24 sps:$4 sm:$0xff]  }
0x1117   :  { %v3748_v37 = vpack.c.bf16 %v3746_v35, %v3746_v35  ;;  %v7030_v35 = vld [vmem:[%s8039_s3 + $0x2ac] ss:$24 sps:$4 sm:$0xff]  }
0x1119   :  { %4118 = vmatprep.mubr.bf16.mxu0 %v3748_v37  ;;  %4159 = vmatprep.mubr.bf16.mxu1 %v3748_v37  ;;  %v7025_v37 = vld [vmem:[%s8039_s3 + $0x2a0] ss:$24 sps:$4 sm:$0xff]  }
0x111a   :  { %4119 = vmatmul.mubr.bf16.vlgmr.msra.gmra.mrb[36].mxu0 %v3747_v41  ;;  %4160 = vmatmul.mubr.bf16.vlgmr.msra.gmra.mrb[40].mxu1 %v3747_v41  ;;  %v7036_v41 = vld [vmem:[%s8039_s3 + $0x2dc] ss:$24 sps:$4 sm:$0xff]  }
0x111b   :  { %5070 = vmatpush1.bf16.msra.mxu1 %v6941_v39  ;;  %5152 = vmatpush1.bf16.msra.mxu0 %v6944_v40  ;;  %v7028_v39 = vld [vmem:[%s8039_s3 + $0x2a8] ss:$24 sps:$4 sm:$0xff]   ;;  %v7033_v40 = vld [vmem:[%s8039_s3 + $0x2d4] ss:$24 sps:$4 sm:$0xff]  }
0x111c   :  { %5071 = vmatprep.subr.bf16.mxu1 %v6949_v42  ;;  %5153 = vmatprep.subr.bf16.mxu0 %v6952_v43  ;;  %v7031_v42 = vld [vmem:[%s8039_s3 + $0x2d0] ss:$24 sps:$4 sm:$0xff]  }
0x111d   :  { %v7034_v43 = vld [vmem:[%s8039_s3 + $0x2d8] ss:$24 sps:$4 sm:$0xff]  }
0x111f   :  { %5072 = vmatpush1.bf16.msra.mxu1 %v6947_v44  ;;  %5154 = vmatpush1.bf16.msra.mxu0 %v6950_v45  ;;  %v7039_v44 = vld [vmem:[%s8039_s3 + $0x304] ss:$24 sps:$4 sm:$0xff]  }
0x1120   :  { %5073 = vmatprep.subr.bf16.mxu1 %v6955_v46  ;;  %5155 = vmatprep.subr.bf16.mxu0 %v6958_v47  ;;  %v7042_v45 = vld [vmem:[%s8039_s3 + $0x30c] ss:$24 sps:$4 sm:$0xff]   ;;  %v8552_v46 = vld [vmem:[#allocation42] sm:$0x7] }
0x1121   :  { %v3818_v47 = vrot.slane %v8552_v46, %v8293_v36 }
0x1123   :  { %5074 = vmatpush1.bf16.msra.mxu1 %v6953_v48  ;;  %5156 = vmatpush1.bf16.msra.mxu0 %v6956_v49  ;;  %v3822_v48 = vrot.slane %v8552_v46, %v8297_v38 }
0x1124   :  { %5075 = vmatprep.subr.bf16.mxu1 %v6961_v50  ;;  %5157 = vmatprep.subr.bf16.mxu0 %v6964_v8 }
0x1127   :  { %5076 = vmatpush1.bf16.msra.mxu1 %v6959_v9  ;;  %5158 = vmatpush1.bf16.msra.mxu0 %v6962_v10 }
0x1128   :  { %5077 = vmatprep.subr.bf16.mxu1 %v6967_v11  ;;  %5159 = vmatprep.subr.bf16.mxu0 %v6970_v12 }
0x112b   :  { %5078 = vmatpush1.bf16.msra.mxu1 %v6965_v51  ;;  %5160 = vmatpush1.bf16.msra.mxu0 %v6968_v53 }
0x112c   :  { %5079 = vmatprep.subr.bf16.mxu1 %v6973_v54  ;;  %5161 = vmatprep.subr.bf16.mxu0 %v6976_v17 }
0x112f   :  { %5080 = vmatpush1.bf16.msra.mxu1 %v6971_v18  ;;  %5162 = vmatpush1.bf16.msra.mxu0 %v6974_v57 }
0x1130   :  { %5081 = vmatprep.subr.bf16.mxu1 %v6979_v58  ;;  %5163 = vmatprep.subr.bf16.mxu0 %v6982_v22  ;;  %v7037_v22 = vld [vmem:[%s8039_s3 + $0x300] ss:$24 sps:$4 sm:$0xff]  }
0x1133   :  { %5082 = vmatpush1.bf16.msra.mxu1 %v6977_v59  ;;  %5164 = vmatpush1.bf16.msra.mxu0 %v6980_v60  ;;  %v7040_v59 = vld [vmem:[%s8039_s3 + $0x308] ss:$24 sps:$4 sm:$0xff]  }
0x1134   :  { %5083 = vmatprep.subr.bf16.mxu1 %v6985_v61  ;;  %5165 = vmatprep.subr.bf16.mxu0 %v6988_v62  ;;  %v7045_v61 = vld [vmem:[%s8039_s3 + $0x334] ss:$24 sps:$4 sm:$0xff]  }
0x1135   :  { %v7048_v62 = vld [vmem:[%s8039_s3 + $0x33c] ss:$24 sps:$4 sm:$0xff]  }
0x1137   :  { %5084 = vmatpush1.bf16.msra.mxu1 %v6983_v63  ;;  %5166 = vmatpush1.bf16.msra.mxu0 %v6986_v0  ;;  %v7043_v63 = vld [vmem:[%s8039_s3 + $0x330] ss:$24 sps:$4 sm:$0xff]  }
0x1138   :  { %5085 = vmatprep.subr.bf16.mxu1 %v6991_v1  ;;  %5167 = vmatprep.subr.bf16.mxu0 %v6994_v3  ;;  %v7046_v0 = vld [vmem:[%s8039_s3 + $0x338] ss:$24 sps:$4 sm:$0xff]   ;;  %v7051_v1 = vld [vmem:[%s8039_s3 + $0x364] ss:$24 sps:$4 sm:$0xff]  }
0x1139   :  { %v7054_v3 = vld [vmem:[%s8039_s3 + $0x36c] ss:$24 sps:$4 sm:$0xff]  }
0x113b   :  { %5086 = vmatpush1.bf16.msra.mxu1 %v6989_v14  ;;  %5168 = vmatpush1.bf16.msra.mxu0 %v6992_v4  ;;  %v7049_v14 = vld [vmem:[%s8039_s3 + $0x360] ss:$24 sps:$4 sm:$0xff]  }
0x113c   :  { %5087 = vmatprep.subr.bf16.mxu1 %v6997_v5  ;;  %5169 = vmatprep.subr.bf16.mxu0 %v7000_v55  ;;  %v7052_v4 = vld [vmem:[%s8039_s3 + $0x368] ss:$24 sps:$4 sm:$0xff]   ;;  %v7057_v5 = vld [vmem:[%s8039_s3 + $0x394] ss:$24 sps:$4 sm:$0xff]  }
0x113d   :  { %v7060_v55 = vld [vmem:[%s8039_s3 + $0x39c] ss:$24 sps:$4 sm:$0xff]  }
0x113f   :  { %5088 = vmatpush1.bf16.msra.mxu1 %v6995_v6  ;;  %5170 = vmatpush1.bf16.msra.mxu0 %v6998_v26  ;;  %v7055_v6 = vld [vmem:[%s8039_s3 + $0x390] ss:$24 sps:$4 sm:$0xff]  }
0x1140   :  { %5089 = vmatprep.subr.bf16.mxu1 %v7003_v7  ;;  %5171 = vmatprep.subr.bf16.mxu0 %v7006_v19  ;;  %v7058_v26 = vld [vmem:[%s8039_s3 + $0x398] ss:$24 sps:$4 sm:$0xff]   ;;  %v7063_v7 = vld [vmem:[%s8039_s3 + $0x3c4] ss:$24 sps:$4 sm:$0xff]  }
0x1141   :  { %v7066_v19 = vld [vmem:[%s8039_s3 + $0x3cc] ss:$24 sps:$4 sm:$0xff]  }
0x1143   :  { %5090 = vmatpush1.bf16.msra.mxu1 %v7001_v20  ;;  %5172 = vmatpush1.bf16.msra.mxu0 %v7004_v21  ;;  %v7061_v20 = vld [vmem:[%s8039_s3 + $0x3c0] ss:$24 sps:$4 sm:$0xff]  }
0x1144   :  { %5091 = vmatprep.subr.bf16.mxu1 %v7009_v52  ;;  %5173 = vmatprep.subr.bf16.mxu0 %v7012_v15  ;;  %v7064_v21 = vld [vmem:[%s8039_s3 + $0x3c8] ss:$24 sps:$4 sm:$0xff]   ;;  %v7069_v52 = vld [vmem:[%s8039_s3 + $0x3f4] ss:$24 sps:$4 sm:$0xff]  }
0x1145   :  { %v7072_v15 = vld [vmem:[%s8039_s3 + $0x3fc] ss:$24 sps:$4 sm:$0xff]  }
0x1147   :  { %5092 = vmatpush1.bf16.msra.mxu1 %v7007_v23  ;;  %5174 = vmatpush1.bf16.msra.mxu0 %v7010_v24  ;;  %v7067_v23 = vld [vmem:[%s8039_s3 + $0x3f0] ss:$24 sps:$4 sm:$0xff]  }
0x1148   :  { %5093 = vmatprep.subr.bf16.mxu1 %v7015_v27  ;;  %5175 = vmatprep.subr.bf16.mxu0 %v7018_v28  ;;  %v7070_v24 = vld [vmem:[%s8039_s3 + $0x3f8] ss:$24 sps:$4 sm:$0xff]   ;;  %v3826_v27 = vrot.slane %v8552_v46, %v8303_v2  ;;  %v7075_v28 = vld [vmem:[%s8039_s3 + $0x424] ss:$24 sps:$4 sm:$0xff]  }
0x1149   :  { %v7096_v46 = vld [vmem:[%s8039_s3 + $0xa4] ss:$24 sps:$4 sm:$0xff]  }
0x114b   :  { %5094 = vmatpush1.bf16.msra.mxu1 %v7013_v25  ;;  %5176 = vmatpush1.bf16.msra.mxu0 %v7016_v29  ;;  %v7078_v25 = vld [vmem:[%s8039_s3 + $0x42c] ss:$24 sps:$4 sm:$0xff]   ;;  %v7073_v29 = vld [vmem:[%s8039_s3 + $0x420] ss:$24 sps:$4 sm:$0xff]  }
0x114c   :  { %5095 = vmatprep.subr.bf16.mxu1 %v7021_v30  ;;  %5177 = vmatprep.subr.bf16.mxu0 %v7024_v31  ;;  %v7076_v30 = vld [vmem:[%s8039_s3 + $0x428] ss:$24 sps:$4 sm:$0xff]  }
0x114f   :  { %5096 = vmatpush1.bf16.msra.mxu1 %v7019_v32  ;;  %5178 = vmatpush1.bf16.msra.mxu0 %v7022_v33  ;;  %v7081_v32 = vld [vmem:[%s8039_s3 + $0x454] ss:$24 sps:$4 sm:$0xff]  }
0x1150   :  { %5097 = vmatprep.subr.bf16.mxu1 %v7027_v34  ;;  %5179 = vmatprep.subr.bf16.mxu0 %v7030_v35  ;;  %v7084_v33 = vld [vmem:[%s8039_s3 + $0x45c] ss:$24 sps:$4 sm:$0xff]   ;;  %v7079_v34 = vld [vmem:[%s8039_s3 + $0x450] ss:$24 sps:$4 sm:$0xff]  }
0x1151   :  { %v7082_v35 = vld [vmem:[%s8039_s3 + $0x458] ss:$24 sps:$4 sm:$0xff]  }
0x1153   :  { %5098 = vmatpush1.bf16.msra.mxu1 %v7025_v37  ;;  %5180 = vmatpush1.bf16.msra.mxu0 %v7028_v39  ;;  %v7087_v39 = vld [vmem:[%s8039_s3 + $0x14] ss:$24 sps:$4 sm:$0xff]  }
0x1154   :  { %5099 = vmatprep.subr.bf16.mxu1 %v7033_v40  ;;  %5181 = vmatprep.subr.bf16.mxu0 %v7036_v41  ;;  %v7085_v40 = vld [vmem:[%s8039_s3 + $0x10] ss:$24 sps:$4 sm:$0xff]  }
0x1157   :  { %5100 = vmatpush1.bf16.msra.mxu1 %v7031_v42  ;;  %5182 = vmatpush1.bf16.msra.mxu0 %v7034_v43  ;;  %v7090_v42 = vld [vmem:[%s8039_s3 + $0x44] ss:$24 sps:$4 sm:$0xff]   ;;  %v7088_v43 = vld [vmem:[%s8039_s3 + $0x40] ss:$24 sps:$4 sm:$0xff]  }
0x1158   :  { %5110 = vmatprep.subr.bf16.mxu1 %v7039_v44  ;;  %5192 = vmatprep.subr.bf16.mxu0 %v7042_v45  ;;  %v7093_v44 = vld [vmem:[%s8039_s3 + $0x74] ss:$24 sps:$4 sm:$0xff]   ;;  %v7091_v45 = vld [vmem:[%s8039_s3 + $0x70] ss:$24 sps:$4 sm:$0xff]  }
0x11ed   :  { %v4120_v49 = vpop.f32.mrb[36].mxu0  ;;  %v6134_v50 = vpop.f32.mrb[40].mxu1 }
0x11ee   :  { %v4121_v8 = vadd.f32 %v4120_v49, %v3818_v47  ;;  %v4122_v9 = vpop.f32.mrb[37].mxu0  ;;  %v6135_v10 = vpop.f32.mrb[41].mxu1  ;;  %v7094_v47 = vld [vmem:[%s8039_s3 + $0xa0] ss:$24 sps:$4 sm:$0xff]   ;;  %v7097_v49 = vld [vmem:[%s8039_s3 + $0xd0] ss:$24 sps:$4 sm:$0xff]  }
0x11ef   :  { %v4123_v11 = vadd.f32 %v4122_v9, %v3822_v48  ;;  %v8558_v12 = vadd.f32 %v6135_v10, %v6134_v50  ;;  %v4124_v51 = vpop.f32.mrb[38].mxu0  ;;  %v6137_v53 = vpop.f32.mrb[42].mxu1  ;;  %v7099_v48 = vld [vmem:[%s8039_s3 + $0xd4] ss:$24 sps:$4 sm:$0xff]   ;;  %v7102_v50 = vld [vmem:[%s8039_s3 + $0x104] ss:$24 sps:$4 sm:$0xff]  }
0x11f0   :  { %v4167_v54 = vmax.f32 %v4121_v8, 0.0  ;;  %v4125_v17 = vpop.f32.mrb[39].mxu0  ;;  %v6138_v18 = vpop.f32.mrb[43].mxu1  ;;  %v7100_v8 = vld [vmem:[%s8039_s3 + $0x100] ss:$24 sps:$4 sm:$0xff]  }
0x11f1   :  { %v4168_v57 = vmax.f32 %v4123_v11, 0.0  ;;  %v4162_v31 = vadd.f32 %v8558_v12, %v3826_v27  ;;  %v7105_v9 = vld [vmem:[%s8039_s3 + $0x134] ss:$24 sps:$4 sm:$0xff]   ;;  %v7103_v10 = vld [vmem:[%s8039_s3 + $0x130] ss:$24 sps:$4 sm:$0xff]  }
0x11f2   :  { %v8564_v60 = vpack.c.bf16 %v4167_v54, %v4167_v54  ;;  %v7108_v11 = vld [vmem:[%s8039_s3 + $0x164] ss:$24 sps:$4 sm:$0xff]   ;;  %v7106_v12 = vld [vmem:[%s8039_s3 + $0x160] ss:$24 sps:$4 sm:$0xff]   ;;  %v7111_v51 = vld [vmem:[%s8039_s3 + $0x194] ss:$24 sps:$4 sm:$0xff]  }
0x11f3   :  { %v8560_v58 = vpack.c.bf16 %v4168_v57, %v4168_v57  ;;  %v4169_v37 = vmax.f32 %v4162_v31, 0.0  ;;  %v7109_v53 = vld [vmem:[%s8039_s3 + $0x190] ss:$24 sps:$4 sm:$0xff]   ;;  %v7114_v54 = vld [vmem:[%s8039_s3 + $0x1c4] ss:$24 sps:$4 sm:$0xff]  }
0x11f4   :  { %v7112_v17 = vld [vmem:[%s8039_s3 + $0x1c0] ss:$24 sps:$4 sm:$0xff]   ;;  %v7117_v18 = vld [vmem:[%s8039_s3 + $0x1f4] ss:$24 sps:$4 sm:$0xff]   ;;  %v7115_v57 = vld [vmem:[%s8039_s3 + $0x1f0] ss:$24 sps:$4 sm:$0xff]  }
0x11f5   :  { %5101 = vmatprep.mubr.bf16.mxu1 %v8560_v58  ;;  %5183 = vmatprep.mubr.bf16.mxu0 %v8560_v58  ;;  %v8605_v41 = vpack.c.bf16 %v4169_v37, %v4169_v37  ;;  %v7154_v27 = vld [vmem:[%s8039_s3 + $0x460] ss:$24 sps:$4 sm:$0xff]  }
0x11f6   :  { %5102 = vmatmul.mubr.bf16.vlgmr.msra.gmra.mrb[44].mxu1 %v8564_v60  ;;  %5184 = vmatmul.mubr.bf16.vlgmr.msra.gmra.mrb[40].mxu0 %v8564_v60 }
0x11f7   :  { %5111 = vmatpush1.bf16.msra.mxu1 %v7037_v22  ;;  %5193 = vmatpush1.bf16.msra.mxu0 %v7040_v59  ;;  %v7118_v22 = vld [vmem:[%s8039_s3 + $0x220] ss:$24 sps:$4 sm:$0xff]   ;;  %v7123_v59 = vld [vmem:[%s8039_s3 + $0x254] ss:$24 sps:$4 sm:$0xff]  }
0x11f8   :  { %5112 = vmatprep.subr.bf16.mxu1 %v7045_v61  ;;  %5194 = vmatprep.subr.bf16.mxu0 %v7048_v62  ;;  %v7121_v61 = vld [vmem:[%s8039_s3 + $0x250] ss:$24 sps:$4 sm:$0xff]   ;;  %v7126_v62 = vld [vmem:[%s8039_s3 + $0x284] ss:$24 sps:$4 sm:$0xff]  }
0x11f9   :  { %5142 = vmatprep.mubr.bf16.mxu1 %v7878_v56  ;;  %5224 = vmatprep.mubr.bf16.mxu0 %v7878_v56 }
0x11fb   :  { %5113 = vmatpush1.bf16.msra.mxu1 %v7043_v63  ;;  %5195 = vmatpush1.bf16.msra.mxu0 %v7046_v0  ;;  %v7124_v63 = vld [vmem:[%s8039_s3 + $0x280] ss:$24 sps:$4 sm:$0xff]   ;;  %v7129_v0 = vld [vmem:[%s8039_s3 + $0x2b4] ss:$24 sps:$4 sm:$0xff]  }
0x11fc   :  { %5114 = vmatprep.subr.bf16.mxu1 %v7051_v1  ;;  %5196 = vmatprep.subr.bf16.mxu0 %v7054_v3  ;;  %v7127_v1 = vld [vmem:[%s8039_s3 + $0x2b0] ss:$24 sps:$4 sm:$0xff]   ;;  %v7132_v3 = vld [vmem:[%s8039_s3 + $0x2e4] ss:$24 sps:$4 sm:$0xff]  }
0x11ff   :  { %5115 = vmatpush1.bf16.msra.mxu1 %v7049_v14  ;;  %5197 = vmatpush1.bf16.msra.mxu0 %v7052_v4  ;;  %v7130_v14 = vld [vmem:[%s8039_s3 + $0x2e0] ss:$24 sps:$4 sm:$0xff]   ;;  %v7135_v4 = vld [vmem:[%s8039_s3 + $0x314] ss:$24 sps:$4 sm:$0xff]  }
0x1200   :  { %5116 = vmatprep.subr.bf16.mxu1 %v7057_v5  ;;  %5198 = vmatprep.subr.bf16.mxu0 %v7060_v55  ;;  %v7133_v5 = vld [vmem:[%s8039_s3 + $0x310] ss:$24 sps:$4 sm:$0xff]   ;;  %v7138_v55 = vld [vmem:[%s8039_s3 + $0x344] ss:$24 sps:$4 sm:$0xff]  }
0x1203   :  { %5117 = vmatpush1.bf16.msra.mxu1 %v7055_v6  ;;  %5199 = vmatpush1.bf16.msra.mxu0 %v7058_v26  ;;  %v7136_v6 = vld [vmem:[%s8039_s3 + $0x340] ss:$24 sps:$4 sm:$0xff]   ;;  %v7141_v26 = vld [vmem:[%s8039_s3 + $0x374] ss:$24 sps:$4 sm:$0xff]  }
0x1204   :  { %5118 = vmatprep.subr.bf16.mxu1 %v7063_v7  ;;  %5200 = vmatprep.subr.bf16.mxu0 %v7066_v19  ;;  %v7139_v7 = vld [vmem:[%s8039_s3 + $0x370] ss:$24 sps:$4 sm:$0xff]   ;;  %v7144_v19 = vld [vmem:[%s8039_s3 + $0x3a4] ss:$24 sps:$4 sm:$0xff]  }
0x1207   :  { %5119 = vmatpush1.bf16.msra.mxu1 %v7061_v20  ;;  %5201 = vmatpush1.bf16.msra.mxu0 %v7064_v21  ;;  %v7142_v20 = vld [vmem:[%s8039_s3 + $0x3a0] ss:$24 sps:$4 sm:$0xff]   ;;  %v7145_v21 = vld [vmem:[%s8039_s3 + $0x3d0] ss:$24 sps:$4 sm:$0xff]  }
0x1208   :  { %5120 = vmatprep.subr.bf16.mxu1 %v7069_v52  ;;  %5202 = vmatprep.subr.bf16.mxu0 %v7072_v15  ;;  %v7150_v52 = vld [vmem:[%s8039_s3 + $0x404] ss:$24 sps:$4 sm:$0xff]   ;;  %v7153_v15 = vld [vmem:[%s8039_s3 + $0x434] ss:$24 sps:$4 sm:$0xff]  }
0x120b   :  { %5121 = vmatpush1.bf16.msra.mxu1 %v7067_v23  ;;  %5203 = vmatpush1.bf16.msra.mxu0 %v7070_v24  ;;  %v7151_v23 = vld [vmem:[%s8039_s3 + $0x430] ss:$24 sps:$4 sm:$0xff]   ;;  %v7156_v24 = vld [vmem:[%s8039_s3 + $0x464] ss:$24 sps:$4 sm:$0xff]  }
0x120c   :  { %5122 = vmatprep.subr.bf16.mxu1 %v7075_v28  ;;  %5204 = vmatprep.subr.bf16.mxu0 %v7078_v25  ;;  %v4317_v28 = vld [vmem:[#allocation43] sm:$0x3f]  ;;  %v4333_v25 = vsub.s32 3, %v8247_v13 }
0x120d   :  { %v4326_v31 = vrot.slane %v4317_v28, %v8297_v38 }
0x120f   :  { %5123 = vmatpush1.bf16.msra.mxu1 %v7073_v29  ;;  %5205 = vmatpush1.bf16.msra.mxu0 %v7076_v30  ;;  %v4322_v29 = vrot.slane %v4317_v28, %v8293_v36  ;;  %v4330_v30 = vrot.slane %v4317_v28, %v8303_v2 }
0x1210   :  { %5124 = vmatprep.subr.bf16.mxu1 %v7081_v32  ;;  %5206 = vmatprep.subr.bf16.mxu0 %v7084_v33  ;;  %v4334_v32 = vrot.slane %v4317_v28, %v4333_v25 }
0x1213   :  { %5125 = vmatpush1.bf16.msra.mxu1 %v7079_v34  ;;  %5207 = vmatpush1.bf16.msra.mxu0 %v7082_v35 }
0x1214   :  { %5233 = vmatprep.subr.bf16.mxu1 %v7087_v39 }
0x1216   :  { %5143 = vmatmul.mubr.bf16.vlgmr.msra.gmra.mrb[44].mxu1 %v8605_v41  ;;  %5225 = vmatmul.mubr.bf16.vlgmr.msra.gmra.mrb[40].mxu0 %v8605_v41 }
0x1217   :  { %5234 = vmatpush1.bf16.msra.mxu1 %v7085_v40  ;;  %5265 = vmatprep.mubr.bf16.mxu1 %v8560_v58  ;;  %v7120_v58 = vld [vmem:[%s8039_s3 + $0x224] ss:$24 sps:$4 sm:$0xff]  }
0x1218   :  { %5235 = vmatprep.subr.bf16.mxu1 %v7090_v42 }
0x121b   :  { %5236 = vmatpush1.bf16.msra.mxu1 %v7088_v43 }
0x121c   :  { %5237 = vmatprep.subr.bf16.mxu1 %v7093_v44 }
0x121f   :  { %5238 = vmatpush1.bf16.msra.mxu1 %v7091_v45 }
0x1220   :  { %5239 = vmatprep.subr.bf16.mxu1 %v7096_v46 }
0x1223   :  { %5240 = vmatpush1.bf16.msra.mxu1 %v7094_v47 }
0x1224   :  { %5241 = vmatprep.subr.bf16.mxu1 %v7099_v48 }
0x1227   :  { %5242 = vmatpush1.bf16.msra.mxu1 %v7097_v49 }
0x1228   :  { %5243 = vmatprep.subr.bf16.mxu1 %v7102_v50 }
0x122b   :  { %5244 = vmatpush1.bf16.msra.mxu1 %v7100_v8 }
0x122c   :  { %5245 = vmatprep.subr.bf16.mxu1 %v7105_v9 }
0x122f   :  { %5246 = vmatpush1.bf16.msra.mxu1 %v7103_v10  ;;  %v4337_v10 = vsub.s32 4, %v8247_v13 }
0x1230   :  { %5247 = vmatprep.subr.bf16.mxu1 %v7108_v11  ;;  %v4341_v11 = vsub.s32 5, %v8247_v13 }
0x1233   :  { %5248 = vmatpush1.bf16.msra.mxu1 %v7106_v12  ;;  %v4338_v12 = vrot.slane %v4317_v28, %v4337_v10 }
0x1234   :  { %5249 = vmatprep.subr.bf16.mxu1 %v7111_v51  ;;  %v4342_v51 = vrot.slane %v4317_v28, %v4341_v11 }
0x1237   :  { %5250 = vmatpush1.bf16.msra.mxu1 %v7109_v53 }
0x1238   :  { %5251 = vmatprep.subr.bf16.mxu1 %v7114_v54 }
0x123b   :  { %5252 = vmatpush1.bf16.msra.mxu1 %v7112_v17 }
0x123c   :  { %5253 = vmatprep.subr.bf16.mxu1 %v7117_v18 }
0x123f   :  { %5254 = vmatpush1.bf16.msra.mxu1 %v7115_v57 }
0x1240   :  { %5255 = vmatprep.subr.bf16.mxu1 %v7120_v58 }
0x1243   :  { %5256 = vmatpush1.bf16.msra.mxu1 %v7118_v22 }
0x1244   :  { %5257 = vmatprep.subr.bf16.mxu1 %v7123_v59 }
0x1247   :  { %5258 = vmatpush1.bf16.msra.mxu1 %v7121_v61 }
0x1248   :  { %5259 = vmatprep.subr.bf16.mxu1 %v7126_v62 }
0x124b   :  { %5260 = vmatpush1.bf16.msra.mxu1 %v7124_v63 }
0x124c   :  { %5261 = vmatprep.subr.bf16.mxu1 %v7129_v0 }
0x124f   :  { %5262 = vmatpush1.bf16.msra.mxu1 %v7127_v1 }
0x1250   :  { %5263 = vmatprep.subr.bf16.mxu1 %v7132_v3 }
0x1253   :  { %5264 = vmatpush1.bf16.msra.mxu1 %v7130_v14 }
0x1254   :  { %5274 = vmatprep.subr.bf16.mxu1 %v7135_v4 }
0x1256   :  { %5266 = vmatmul.mubr.bf16.vlgmr.msra.gmra.mrb[48].mxu1 %v8564_v60  ;;  %v7147_v60 = vld [vmem:[%s8039_s3 + $0x3d4] ss:$24 sps:$4 sm:$0xff]  }
0x1257   :  { %5275 = vmatpush1.bf16.msra.mxu1 %v7133_v5  ;;  %5306 = vmatprep.mubr.bf16.mxu1 %v7878_v56  ;;  %v7148_v56 = vld [vmem:[%s8039_s3 + $0x400] ss:$24 sps:$4 sm:$0xff]  }
0x1258   :  { %5276 = vmatprep.subr.bf16.mxu1 %v7138_v55 }
0x125b   :  { %5277 = vmatpush1.bf16.msra.mxu1 %v7136_v6 }
0x125c   :  { %5278 = vmatprep.subr.bf16.mxu1 %v7141_v26 }
0x125f   :  { %5279 = vmatpush1.bf16.msra.mxu1 %v7139_v7 }
0x1260   :  { %5280 = vmatprep.subr.bf16.mxu1 %v7144_v19 }
0x1263   :  { %5281 = vmatpush1.bf16.msra.mxu1 %v7142_v20 }
0x1264   :  { %5282 = vmatprep.subr.bf16.mxu1 %v7147_v60 }
0x1267   :  { %5283 = vmatpush1.bf16.msra.mxu1 %v7145_v21 }
0x1268   :  { %5284 = vmatprep.subr.bf16.mxu1 %v7150_v52 }
0x126b   :  { %5285 = vmatpush1.bf16.msra.mxu1 %v7148_v56 }
0x126c   :  { %5286 = vmatprep.subr.bf16.mxu1 %v7153_v15 }
0x126f   :  { %5287 = vmatpush1.bf16.msra.mxu1 %v7151_v23 }
0x1270   :  { %5288 = vmatprep.subr.bf16.mxu1 %v7156_v24 }
0x1273   :  { %5289 = vmatpush1.bf16.msra.mxu1 %v7154_v27 }
0x1276   :  { %5307 = vmatmul.mubr.bf16.vlgmr.msra.gmra.mrb[48].mxu1 %v8605_v41 }
0x12e9   :  { %v5144_v33 = vpop.f32.mrb[44].mxu1  ;;  %v5226_v34 = vpop.f32.mrb[40].mxu0 }
0x12ea   :  { %v6384_v35 = vadd.f32 %v5144_v33, %v4322_v29  ;;  %v6386_v37 = vadd.f32 %v5226_v34, %v4330_v30  ;;  %v5146_v39 = vpop.f32.mrb[45].mxu1  ;;  %v5228_v40 = vpop.f32.mrb[41].mxu0 }
0x12eb   :  { %v6385_v42 = vadd.f32 %v5146_v39, %v4326_v31  ;;  %v6387_v43 = vadd.f32 %v5228_v40, %v4334_v32  ;;  %v5148_v41 = vpop.f32.mrb[46].mxu1  ;;  %v5230_v44 = vpop.f32.mrb[42].mxu0 }
0x12ec   :  { %v5315_v45 = vmax.f32 %v6384_v35, 0.0  ;;  %v5317_v46 = vmax.f32 %v6386_v37, 0.0  ;;  %v5149_v47 = vpop.f32.mrb[47].mxu1  ;;  %v5231_v36 = vpop.f32.mrb[43].mxu0 }
0x12ed   :  { %v5316_v48 = vmax.f32 %v6385_v42, 0.0  ;;  %v5318_v2 = vmax.f32 %v6387_v43, 0.0 }
0x12ef   :  { %v5327_v49 = vcombine.low %v5315_v45, %v5316_v48  ;;  %v5328_v38 = vcombine.low %v5317_v46, %v5318_v2 }
0x12f1   :  { %v5335_v50 = vrot.slane %v5327_v49, %v8250_v16  ;;  %v5342_v8 = vrot.slane %v5328_v38, %v8250_v16 }
0x12f3   :  { %v5343_v9 = vcombine.low %v5335_v50, %v5342_v8 }
0x12f5   :  { %5354 = vst [vmem:[%s8049_s25] sm:$0xff] %v5343_v9 }
0x1349   :  { %v5308_v53 = vpop.f32.mrb[48].mxu1 }
0x134a   :  { %v6388_v54 = vadd.f32 %v5308_v53, %v4338_v12  ;;  %v5310_v17 = vpop.f32.mrb[49].mxu1 }
0x134b   :  { %v6389_v18 = vadd.f32 %v5310_v17, %v4342_v51  ;;  %v5312_v57 = vpop.f32.mrb[50].mxu1 }
0x134c   :  { %v5319_v58 = vmax.f32 %v6388_v54, 0.0  ;;  %v5313_v22 = vpop.f32.mrb[51].mxu1 }
0x134d   :  { %v5320_v59 = vmax.f32 %v6389_v18, 0.0 }
0x134f   :  { %v5344_v61 = vcombine.low %v5319_v58, %v5320_v59 }
0x1351   :  { %5921 = vst.sshfl [vmem:[%s8049_s25 + $0x8] sm:$0x33 pattern:$0x76325410] %v5344_v61 }
0x1352   :  { %5360 = vsyncpa [#allocation3], 1 }
0x1353   :  { %5361 = vsyncpa [#allocation5], 1 }
0x1354   :  { %5362 = vsyncpa [#allocation8], 1 }
0x1355   :  { %5363 = vsyncpa [#allocation11], 1 }
0x1356   :  { %5364 = vsyncpa [#allocation14], 1 }
0x1357   :  { %5365 = vsyncpa [#allocation17], 1 }
0x1358   :  { %5366 = vsyncpa [#allocation20], 1 }
0x1359   :  { %5367 = vsyncpa [#allocation23], 1 }
0x135a   :  { %5368 = vsyncpa [#allocation26], 1 }
0x135b   :  { %5369 = vsyncpa [#allocation29], 1 }
0x135c   :  { %5370 = vsyncpa [#allocation32], 1 }
0x135d   :  { %5371 = vsyncpa [#allocation35], 1 }
0x135e   :  { %5372 = vsyncpa [#allocation38], 1 }
0x135f   :  { %5373 = vsyncpa [#allocation41], 1 }
0x1360   :  { %5374 = vsyncpa [#allocation44], 1 }

</bundles_post_ra>
